<compile_context>
chip_gen: v6e
topology: v6e:2x2x1
jax: 0.10.0
libtpu: 0.0.40
codegen_flags: <defaults>
</compile_context>

<pallas_src>
import functools

import jax
import jax.numpy as jnp
from jax import lax
from jax.experimental import pallas as pl
from jax.experimental.pallas import tpu as pltpu


def grucov_kernel(feat_ref, m_ref, w_ih_ref, w_hh_ref, b_x_ref, b_hn_ref,
                  w_self_ref, w_neigh_ref, alpha_ref, out_ref, *, chunk_n):
    """Lane-dense Graph-GRU aggregation over one node tile.

    Layouts (lane axis = nodes, 128-dense):
      feat_ref : [D_in, tn]        m_ref    : [T, D_in, tn]
      w_ih_ref : [3H, D_in]        w_hh_ref : [3H, H]      (PyTorch r|z|n rows)
      b_x_ref  : [3H, 1] f32       b_hn_ref : [H, 1] f32
      w_self   : [D_out, D_in]     w_neigh  : [D_out, H]   alpha: [D_out, 1] f32
      out_ref  : [D_out, tn]
    """
    T, _d_in, tn = m_ref.shape
    _three_h, H = w_hh_ref.shape
    cdt = w_hh_ref.dtype

    w_ih = w_ih_ref[...]
    w_hh = w_hh_ref[...]
    b_x = b_x_ref[...]
    b_hn = b_hn_ref[...]
    w_self = w_self_ref[...]
    w_neigh = w_neigh_ref[...]
    alpha = alpha_ref[...]

    # 128-lane node chunks bound the vreg working set of the unrolled T loop
    # (review item 2).  Chunks are independent recurrences, so the scheduler is
    # also free to interleave two chunks' chains (depth-2 pipelining on v5e).
    for c in range(tn // chunk_n):
        cs = slice(c * chunk_n, (c + 1) * chunk_n)            # static lane slice
        h = jnp.zeros((H, chunk_n), jnp.float32)

        # GRU recurrence, fully unrolled (T small & static). Gate order: r, z, n.
        for t in range(T):
            # x-projection per (t, chunk): independent of h -> overlapped by the
            # scheduler; never materialized for all T (review items 2 & 7).
            xg = jnp.dot(w_ih, m_ref[t, :, cs],
                         preferred_element_type=jnp.float32) + b_x       # [3H, cn]
            hg = jnp.dot(w_hh, h.astype(cdt),
                         preferred_element_type=jnp.float32)             # [3H, cn]
            rz = jax.nn.sigmoid(xg[:2 * H] + hg[:2 * H])                 # one EUP stream (r|z)
            r = rz[:H]
            z = rz[H:]
            n = jnp.tanh(xg[2 * H:] + r * (hg[2 * H:] + b_hn))
            h = (1.0 - z) * n + z * h

        # Epilogue: fc_self(feat) + fc_neigh(h) (no concat, review item 9),
        # per-channel PReLU, lane-dense [D_out, cn] store (review item 4).
        rst = (jnp.dot(w_self, feat_ref[:, cs], preferred_element_type=jnp.float32)
               + jnp.dot(w_neigh, h.astype(cdt), preferred_element_type=jnp.float32))
        out_ref[:, cs] = jnp.where(rst >= 0.0, rst, alpha * rst).astype(out_ref.dtype)


def grucov_forward(feat_t, mailbox_t, params, *, tile_n=256, chunk_n=128,
                   compute_dtype=jnp.bfloat16, out_dtype=jnp.bfloat16,
                   mailbox_buffers=2):
    """feat_t: [D_in, N] node features (node on the lane axis).
    mailbox_t: [T, D_in, N] neighbor mailbox, t-major / node-lane-major
    (produced upstream in this layout/dtype; the wrapper does no HBM pre-pass).
    Returns [D_out, N] in `out_dtype` (lane-dense, no padding, no post-slice).

    Tuning: tile_n = grid block along N (sweep up to 1024-2048 on v5e/v6e,
    keep G = N/tile_n even and >= 4 on v7x); chunk_n = inner 128-lane chunk;
    mailbox_buffers > 2 deepens mailbox pipelining (v5e, exposed DMA).
    """
    d_in, N = feat_t.shape
    T = mailbox_t.shape[0]
    assert mailbox_t.shape[1] == d_in and mailbox_t.shape[2] == N
    three_h, H = params["w_hh_k"].shape
    d_out = params["w_self_k"].shape[0]

    tile_n = min(tile_n, N)
    chunk_n = min(chunk_n, tile_n)
    assert N % tile_n == 0 and tile_n % chunk_n == 0 and chunk_n % 128 == 0
    G = N // tile_n
    cdt = compute_dtype

    # Weights are tiny; casting them here is negligible (no data-array casts).
    w_ih = params["w_ih_k"].astype(cdt)        # [3H, D_in]
    w_hh = params["w_hh_k"].astype(cdt)        # [3H, H]
    w_self = params["w_self_k"].astype(cdt)    # [D_out, D_in]
    w_neigh = params["w_neigh_k"].astype(cdt)  # [D_out, H]

    mb_idx = lambda i: (0, 0, i)
    if mailbox_buffers is not None and mailbox_buffers > 2:
        # v5e: deepen buffering on the dominant input if the bundle shows exposed DMA.
        mb_spec = pl.BlockSpec((T, d_in, tile_n), mb_idx,
                               pipeline_mode=pl.Buffered(mailbox_buffers))
    else:
        mb_spec = pl.BlockSpec((T, d_in, tile_n), mb_idx)

    # VMEM budget: multi-buffered blocks + headroom; only raise the scoped limit
    # when sweeping tile_n upward (v5e/v6e); stays well under v7x's 64 MiB.
    nbuf = max(2, mailbox_buffers or 2)
    blk_bytes = (T * d_in * tile_n * mailbox_t.dtype.itemsize * nbuf
                 + d_in * tile_n * feat_t.dtype.itemsize * 2
                 + d_out * tile_n * jnp.dtype(out_dtype).itemsize * 2)
    vmem_limit = int(1.5 * blk_bytes) + (1 << 20)
    cp_kwargs = dict(dimension_semantics=("parallel",))   # megacore / v7x 2-TC sharding
    if vmem_limit > (16 << 20):
        cp_kwargs["vmem_limit_bytes"] = vmem_limit

    kernel = functools.partial(grucov_kernel, chunk_n=chunk_n)
    out = pl.pallas_call(
        kernel,
        out_shape=jax.ShapeDtypeStruct((d_out, N), out_dtype),
        grid=(G,),
        in_specs=[
            pl.BlockSpec((d_in, tile_n), lambda i: (0, i)),     # feat tile (lane = node)
            mb_spec,                                            # mailbox tile (lane = node)
            pl.BlockSpec((three_h, d_in), lambda i: (0, 0)),    # fused W_ih
            pl.BlockSpec((three_h, H), lambda i: (0, 0)),       # fused W_hh
            pl.BlockSpec((three_h, 1), lambda i: (0, 0)),       # folded x-bias
            pl.BlockSpec((H, 1), lambda i: (0, 0)),             # b_hh[n]
            pl.BlockSpec((d_out, d_in), lambda i: (0, 0)),      # fc_self weight
            pl.BlockSpec((d_out, H), lambda i: (0, 0)),         # fc_neigh weight
            pl.BlockSpec((d_out, 1), lambda i: (0, 0)),         # PReLU alpha
        ],
        out_specs=pl.BlockSpec((d_out, tile_n), lambda i: (0, i)),
        compiler_params=pltpu.CompilerParams(**cp_kwargs),
    )(feat_t, mailbox_t, w_ih, w_hh, params["b_x_k"], params["b_hn_k"],
      w_self, w_neigh, params["alpha_k"])
    return out


def init_params(key, d_in, d_out):
    """PyTorch-shaped GRU / Linear / PReLU params plus the fused kernel layout."""
    H = d_in
    ks = jax.random.split(key, 6)
    k_gru = 1.0 / jnp.sqrt(jnp.float32(H))
    k_lin = 1.0 / jnp.sqrt(jnp.float32(d_in))
    u = lambda k, shape, s: jax.random.uniform(k, shape, jnp.float32, -s, s)

    # nn.GRU(emb, emb, batch_first=True): weight_ih_l0 [3H, D_in], weight_hh_l0
    # [3H, H], bias_ih_l0 / bias_hh_l0 [3H]; PyTorch gate order (r, z, n).
    w_ih = u(ks[0], (3 * H, d_in), k_gru)
    w_hh = u(ks[1], (3 * H, H), k_gru)
    b_ih = u(ks[2], (3 * H,), k_gru)
    b_hh = u(ks[3], (3 * H,), k_gru)
    # fc_self / fc_neigh: Linear(d, d_out, bias=False) -> weight [d_out, d]
    w_self = u(ks[4], (d_out, d_in), k_lin)
    w_neigh = u(ks[5], (d_out, H), k_lin)
    alpha = jnp.full((d_out,), 0.25, jnp.float32)            # PReLU(d_out)

    # Kernel (lane-dense / transposed) layout: PyTorch weight matrices are used
    # as-is ([rows, contraction]); r/z biases folded, only b_hh[n] kept separate.
    b_x = jnp.concatenate([b_ih[:2 * H] + b_hh[:2 * H], b_ih[2 * H:]])[:, None]  # [3H, 1]
    b_hn = b_hh[2 * H:][:, None]                                                  # [H, 1]
    return dict(
        # raw PyTorch-shaped params (used by the torch-parity reference)
        w_ih=w_ih, w_hh=w_hh, b_ih=b_ih, b_hh=b_hh,
        w_self=w_self, w_neigh=w_neigh, alpha=alpha,
        # kernel layout
        w_ih_k=w_ih, w_hh_k=w_hh, b_x_k=b_x, b_hn_k=b_hn,
        w_self_k=w_self, w_neigh_k=w_neigh, alpha_k=alpha[:, None])


def ref_forward(feat, mailbox, p):
    """Pure-JAX f32 reference with PyTorch GRU/Linear/PReLU semantics on the RAW
    (unfused) parameters.  feat: [N, D_in]; mailbox: [N, T, D_in] (batch_first)."""
    hi = lax.Precision.HIGHEST
    N, T, _ = mailbox.shape
    H = p["w_hh"].shape[1]
    w_ih, w_hh, b_ih, b_hh = p["w_ih"], p["w_hh"], p["b_ih"], p["b_hh"]
    h = jnp.zeros((N, H), jnp.float32)
    for t in range(T):
        x = mailbox[:, t, :].astype(jnp.float32)
        gi = jnp.dot(x, w_ih.T, precision=hi) + b_ih
        gh = jnp.dot(h, w_hh.T, precision=hi) + b_hh
        r = jax.nn.sigmoid(gi[:, :H] + gh[:, :H])
        z = jax.nn.sigmoid(gi[:, H:2 * H] + gh[:, H:2 * H])
        n = jnp.tanh(gi[:, 2 * H:] + r * gh[:, 2 * H:])
        h = (1.0 - z) * n + z * h
    rst = (jnp.dot(feat.astype(jnp.float32), p["w_self"].T, precision=hi)
           + jnp.dot(h, p["w_neigh"].T, precision=hi))
    return jnp.where(rst >= 0.0, rst, p["alpha"][None, :] * rst)


if __name__ == "__main__":
    # nodes, neighbors/messages per node, emb_size (GRU in == hidden), output dim
    N, T, D_IN, D_OUT = 1024, 8, 32, 64

    key = jax.random.PRNGKey(0)
    k_feat, k_msg, k_par = jax.random.split(key, 3)
    feat = jax.random.normal(k_feat, (N, D_IN), jnp.float32)       # module layout
    mailbox = jax.random.normal(k_msg, (N, T, D_IN), jnp.float32)  # [N, T, D_in]
    params = init_params(k_par, D_IN, D_OUT)

    ref = ref_forward(feat, mailbox, params)                       # [N, D_OUT] f32

    # Kernel-layout inputs, "produced upstream" (review item 3): this one-time
    # relayout models the producer; the wrapper itself does no HBM pre-pass.
    feat_t = jnp.asarray(feat.T)                                   # [D_in, N]
    mailbox_t = jnp.asarray(mailbox.transpose(1, 2, 0))            # [T, D_in, N]

    # f32 path: tight check (validates the transposed/chunked/fused algorithm).
    # tile_n=256 -> G=4 (even, >= 2 grid steps per TC on v7x); chunk_n=128.
    out_f32 = jax.block_until_ready(
        grucov_forward(feat_t, mailbox_t, params, tile_n=256, chunk_n=128,
                       compute_dtype=jnp.float32, out_dtype=jnp.float32))
    assert out_f32.shape == (D_OUT, N)
    assert jnp.allclose(out_f32.T, ref, atol=1e-4, rtol=1e-4), "f32 kernel mismatch"

    # bf16 matmul operands + bf16 lane-dense output (f32 state/accumulation).
    out_bf16 = jax.block_until_ready(
        grucov_forward(feat_t.astype(jnp.bfloat16), mailbox_t.astype(jnp.bfloat16),
                       params, tile_n=256, chunk_n=128,
                       compute_dtype=jnp.bfloat16, out_dtype=jnp.bfloat16))
    assert out_bf16.shape == (D_OUT, N)
    assert jnp.allclose(out_bf16.astype(jnp.float32).T, ref,
                        atol=1e-1, rtol=1e-1), "bf16 kernel mismatch"

    print("KERNEL_OK")
</pallas_src>

<mosaic_0001>
module attributes {stable_mosaic.version = 11 : i64} {
  func.func @grucov_kernel(%arg0: i32, %arg1: memref<32x256xf32, #tpu.memory_space<vmem>>, %arg2: memref<8x32x256xf32, #tpu.memory_space<vmem>>, %arg3: memref<96x32xf32, #tpu.memory_space<vmem>>, %arg4: memref<96x32xf32, #tpu.memory_space<vmem>>, %arg5: memref<96x1xf32, #tpu.memory_space<vmem>>, %arg6: memref<32x1xf32, #tpu.memory_space<vmem>>, %arg7: memref<64x32xf32, #tpu.memory_space<vmem>>, %arg8: memref<64x32xf32, #tpu.memory_space<vmem>>, %arg9: memref<64x1xf32, #tpu.memory_space<vmem>>, %arg10: memref<64x256xf32, #tpu.memory_space<vmem>>) attributes {dimension_semantics = [#tpu.dimension_semantics<parallel>], iteration_bounds = array<i64: 4>, scalar_prefetch = 0 : i64, scratch_operands = 0 : i64, tpu.core_type = #tpu.core_type<tc>, window_params = [{transform_indices = @transform_0, window_bounds = array<i64: 32, 256>}, {transform_indices = @transform_1, window_bounds = array<i64: 8, 32, 256>}, {pipeline_mode = #tpu.pipeline_mode<synchronous>, transform_indices = @transform_2, window_bounds = array<i64: 96, 32>}, {pipeline_mode = #tpu.pipeline_mode<synchronous>, transform_indices = @transform_3, window_bounds = array<i64: 96, 32>}, {pipeline_mode = #tpu.pipeline_mode<synchronous>, transform_indices = @transform_4, window_bounds = array<i64: 96, 1>}, {pipeline_mode = #tpu.pipeline_mode<synchronous>, transform_indices = @transform_5, window_bounds = array<i64: 32, 1>}, {pipeline_mode = #tpu.pipeline_mode<synchronous>, transform_indices = @transform_6, window_bounds = array<i64: 64, 32>}, {pipeline_mode = #tpu.pipeline_mode<synchronous>, transform_indices = @transform_7, window_bounds = array<i64: 64, 32>}, {pipeline_mode = #tpu.pipeline_mode<synchronous>, transform_indices = @transform_8, window_bounds = array<i64: 64, 1>}, {transform_indices = @transform_9, window_bounds = array<i64: 64, 256>}]} {
    %c0 = arith.constant 0 : index
    %c0_0 = arith.constant 0 : index
    %0 = vector.load %arg3[%c0, %c0_0] : memref<96x32xf32, #tpu.memory_space<vmem>>, vector<96x32xf32>
    %c0_1 = arith.constant 0 : index
    %c0_2 = arith.constant 0 : index
    %1 = vector.load %arg4[%c0_1, %c0_2] : memref<96x32xf32, #tpu.memory_space<vmem>>, vector<96x32xf32>
    %c0_3 = arith.constant 0 : index
    %c0_4 = arith.constant 0 : index
    %2 = vector.load %arg5[%c0_3, %c0_4] : memref<96x1xf32, #tpu.memory_space<vmem>>, vector<96x1xf32>
    %c0_5 = arith.constant 0 : index
    %c0_6 = arith.constant 0 : index
    %3 = vector.load %arg6[%c0_5, %c0_6] : memref<32x1xf32, #tpu.memory_space<vmem>>, vector<32x1xf32>
    %c0_7 = arith.constant 0 : index
    %c0_8 = arith.constant 0 : index
    %4 = vector.load %arg7[%c0_7, %c0_8] : memref<64x32xf32, #tpu.memory_space<vmem>>, vector<64x32xf32>
    %c0_9 = arith.constant 0 : index
    %c0_10 = arith.constant 0 : index
    %5 = vector.load %arg8[%c0_9, %c0_10] : memref<64x32xf32, #tpu.memory_space<vmem>>, vector<64x32xf32>
    %c0_11 = arith.constant 0 : index
    %c0_12 = arith.constant 0 : index
    %6 = vector.load %arg9[%c0_11, %c0_12] : memref<64x1xf32, #tpu.memory_space<vmem>>, vector<64x1xf32>
    %cst = arith.constant 0.000000e+00 : f32
    %7 = vector.broadcast %cst : f32 to vector<32x128xf32>
    %c0_13 = arith.constant 0 : index
    %c0_14 = arith.constant 0 : index
    %c0_15 = arith.constant 0 : index
    %8 = vector.load %arg2[%c0_13, %c0_14, %c0_15] : memref<8x32x256xf32, #tpu.memory_space<vmem>>, vector<1x32x128xf32>
    %9 = vector.shape_cast %8 : vector<1x32x128xf32> to vector<32x128xf32>
    %cst_16 = arith.constant dense<0.000000e+00> : vector<96x128xf32>
    %10 = tpu.matmul %0, %9, %cst_16 {dimension_numbers = #tpu.dot_dimension_numbers<[1], [0], [0], [1], [0, 0, 1, 1], [], []>} : vector<96x32xf32>, vector<32x128xf32>, vector<96x128xf32> -> vector<96x128xf32>
    %11 = vector.broadcast %2 : vector<96x1xf32> to vector<96x128xf32>
    %12 = arith.addf %10, %11 : vector<96x128xf32>
    %cst_17 = arith.constant dense<0.000000e+00> : vector<96x128xf32>
    %13 = tpu.matmul %1, %7, %cst_17 {dimension_numbers = #tpu.dot_dimension_numbers<[1], [0], [0], [1], [0, 0, 1, 1], [], []>} : vector<96x32xf32>, vector<32x128xf32>, vector<96x128xf32> -> vector<96x128xf32>
    %14 = vector.extract_strided_slice %12 {offsets = [0, 0], sizes = [64, 128], strides = [1, 1]} : vector<96x128xf32> to vector<64x128xf32>
    %15 = vector.extract_strided_slice %13 {offsets = [0, 0], sizes = [64, 128], strides = [1, 1]} : vector<96x128xf32> to vector<64x128xf32>
    %16 = arith.addf %14, %15 : vector<64x128xf32>
    %17 = arith.negf %16 : vector<64x128xf32>
    %18 = math.exp %17 : vector<64x128xf32>
    %cst_18 = arith.constant 1.000000e+00 : f32
    %19 = vector.broadcast %cst_18 : f32 to vector<64x128xf32>
    %20 = arith.addf %19, %18 : vector<64x128xf32>
    %21 = arith.divf %19, %20 : vector<64x128xf32>
    %22 = vector.extract_strided_slice %21 {offsets = [0, 0], sizes = [32, 128], strides = [1, 1]} : vector<64x128xf32> to vector<32x128xf32>
    %23 = vector.extract_strided_slice %21 {offsets = [32, 0], sizes = [32, 128], strides = [1, 1]} : vector<64x128xf32> to vector<32x128xf32>
    %24 = vector.extract_strided_slice %12 {offsets = [64, 0], sizes = [32, 128], strides = [1, 1]} : vector<96x128xf32> to vector<32x128xf32>
    %25 = vector.extract_strided_slice %13 {offsets = [64, 0], sizes = [32, 128], strides = [1, 1]} : vector<96x128xf32> to vector<32x128xf32>
    %26 = vector.broadcast %3 : vector<32x1xf32> to vector<32x128xf32>
    %27 = arith.addf %25, %26 : vector<32x128xf32>
    %28 = arith.mulf %22, %27 : vector<32x128xf32>
    %29 = arith.addf %24, %28 : vector<32x128xf32>
    %30 = math.tanh %29 : vector<32x128xf32>
    %cst_19 = arith.constant 1.000000e+00 : f32
    %31 = vector.broadcast %cst_19 : f32 to vector<32x128xf32>
    %32 = arith.subf %31, %23 : vector<32x128xf32>
    %33 = arith.mulf %32, %30 : vector<32x128xf32>
    %34 = arith.mulf %23, %7 : vector<32x128xf32>
    %35 = arith.addf %33, %34 : vector<32x128xf32>
    %c1 = arith.constant 1 : index
    %c0_20 = arith.constant 0 : index
    %c0_21 = arith.constant 0 : index
    %36 = vector.load %arg2[%c1, %c0_20, %c0_21] : memref<8x32x256xf32, #tpu.memory_space<vmem>>, vector<1x32x128xf32>
    %37 = vector.shape_cast %36 : vector<1x32x128xf32> to vector<32x128xf32>
    %cst_22 = arith.constant dense<0.000000e+00> : vector<96x128xf32>
    %38 = tpu.matmul %0, %37, %cst_22 {dimension_numbers = #tpu.dot_dimension_numbers<[1], [0], [0], [1], [0, 0, 1, 1], [], []>} : vector<96x32xf32>, vector<32x128xf32>, vector<96x128xf32> -> vector<96x128xf32>
    %39 = vector.broadcast %2 : vector<96x1xf32> to vector<96x128xf32>
    %40 = arith.addf %38, %39 : vector<96x128xf32>
    %cst_23 = arith.constant dense<0.000000e+00> : vector<96x128xf32>
    %41 = tpu.matmul %1, %35, %cst_23 {dimension_numbers = #tpu.dot_dimension_numbers<[1], [0], [0], [1], [0, 0, 1, 1], [], []>} : vector<96x32xf32>, vector<32x128xf32>, vector<96x128xf32> -> vector<96x128xf32>
    %42 = vector.extract_strided_slice %40 {offsets = [0, 0], sizes = [64, 128], strides = [1, 1]} : vector<96x128xf32> to vector<64x128xf32>
    %43 = vector.extract_strided_slice %41 {offsets = [0, 0], sizes = [64, 128], strides = [1, 1]} : vector<96x128xf32> to vector<64x128xf32>
    %44 = arith.addf %42, %43 : vector<64x128xf32>
    %45 = arith.negf %44 : vector<64x128xf32>
    %46 = math.exp %45 : vector<64x128xf32>
    %cst_24 = arith.constant 1.000000e+00 : f32
    %47 = vector.broadcast %cst_24 : f32 to vector<64x128xf32>
    %48 = arith.addf %47, %46 : vector<64x128xf32>
    %49 = arith.divf %47, %48 : vector<64x128xf32>
    %50 = vector.extract_strided_slice %49 {offsets = [0, 0], sizes = [32, 128], strides = [1, 1]} : vector<64x128xf32> to vector<32x128xf32>
    %51 = vector.extract_strided_slice %49 {offsets = [32, 0], sizes = [32, 128], strides = [1, 1]} : vector<64x128xf32> to vector<32x128xf32>
    %52 = vector.extract_strided_slice %40 {offsets = [64, 0], sizes = [32, 128], strides = [1, 1]} : vector<96x128xf32> to vector<32x128xf32>
    %53 = vector.extract_strided_slice %41 {offsets = [64, 0], sizes = [32, 128], strides = [1, 1]} : vector<96x128xf32> to vector<32x128xf32>
    %54 = vector.broadcast %3 : vector<32x1xf32> to vector<32x128xf32>
    %55 = arith.addf %53, %54 : vector<32x128xf32>
    %56 = arith.mulf %50, %55 : vector<32x128xf32>
    %57 = arith.addf %52, %56 : vector<32x128xf32>
    %58 = math.tanh %57 : vector<32x128xf32>
    %cst_25 = arith.constant 1.000000e+00 : f32
    %59 = vector.broadcast %cst_25 : f32 to vector<32x128xf32>
    %60 = arith.subf %59, %51 : vector<32x128xf32>
    %61 = arith.mulf %60, %58 : vector<32x128xf32>
    %62 = arith.mulf %51, %35 : vector<32x128xf32>
    %63 = arith.addf %61, %62 : vector<32x128xf32>
    %c2 = arith.constant 2 : index
    %c0_26 = arith.constant 0 : index
    %c0_27 = arith.constant 0 : index
    %64 = vector.load %arg2[%c2, %c0_26, %c0_27] : memref<8x32x256xf32, #tpu.memory_space<vmem>>, vector<1x32x128xf32>
    %65 = vector.shape_cast %64 : vector<1x32x128xf32> to vector<32x128xf32>
    %cst_28 = arith.constant dense<0.000000e+00> : vector<96x128xf32>
    %66 = tpu.matmul %0, %65, %cst_28 {dimension_numbers = #tpu.dot_dimension_numbers<[1], [0], [0], [1], [0, 0, 1, 1], [], []>} : vector<96x32xf32>, vector<32x128xf32>, vector<96x128xf32> -> vector<96x128xf32>
    %67 = vector.broadcast %2 : vector<96x1xf32> to vector<96x128xf32>
    %68 = arith.addf %66, %67 : vector<96x128xf32>
    %cst_29 = arith.constant dense<0.000000e+00> : vector<96x128xf32>
    %69 = tpu.matmul %1, %63, %cst_29 {dimension_numbers = #tpu.dot_dimension_numbers<[1], [0], [0], [1], [0, 0, 1, 1], [], []>} : vector<96x32xf32>, vector<32x128xf32>, vector<96x128xf32> -> vector<96x128xf32>
    %70 = vector.extract_strided_slice %68 {offsets = [0, 0], sizes = [64, 128], strides = [1, 1]} : vector<96x128xf32> to vector<64x128xf32>
    %71 = vector.extract_strided_slice %69 {offsets = [0, 0], sizes = [64, 128], strides = [1, 1]} : vector<96x128xf32> to vector<64x128xf32>
    %72 = arith.addf %70, %71 : vector<64x128xf32>
    %73 = arith.negf %72 : vector<64x128xf32>
    %74 = math.exp %73 : vector<64x128xf32>
    %cst_30 = arith.constant 1.000000e+00 : f32
    %75 = vector.broadcast %cst_30 : f32 to vector<64x128xf32>
    %76 = arith.addf %75, %74 : vector<64x128xf32>
    %77 = arith.divf %75, %76 : vector<64x128xf32>
    %78 = vector.extract_strided_slice %77 {offsets = [0, 0], sizes = [32, 128], strides = [1, 1]} : vector<64x128xf32> to vector<32x128xf32>
    %79 = vector.extract_strided_slice %77 {offsets = [32, 0], sizes = [32, 128], strides = [1, 1]} : vector<64x128xf32> to vector<32x128xf32>
    %80 = vector.extract_strided_slice %68 {offsets = [64, 0], sizes = [32, 128], strides = [1, 1]} : vector<96x128xf32> to vector<32x128xf32>
    %81 = vector.extract_strided_slice %69 {offsets = [64, 0], sizes = [32, 128], strides = [1, 1]} : vector<96x128xf32> to vector<32x128xf32>
    %82 = vector.broadcast %3 : vector<32x1xf32> to vector<32x128xf32>
    %83 = arith.addf %81, %82 : vector<32x128xf32>
    %84 = arith.mulf %78, %83 : vector<32x128xf32>
    %85 = arith.addf %80, %84 : vector<32x128xf32>
    %86 = math.tanh %85 : vector<32x128xf32>
    %cst_31 = arith.constant 1.000000e+00 : f32
    %87 = vector.broadcast %cst_31 : f32 to vector<32x128xf32>
    %88 = arith.subf %87, %79 : vector<32x128xf32>
    %89 = arith.mulf %88, %86 : vector<32x128xf32>
    %90 = arith.mulf %79, %63 : vector<32x128xf32>
    %91 = arith.addf %89, %90 : vector<32x128xf32>
    %c3 = arith.constant 3 : index
    %c0_32 = arith.constant 0 : index
    %c0_33 = arith.constant 0 : index
    %92 = vector.load %arg2[%c3, %c0_32, %c0_33] : memref<8x32x256xf32, #tpu.memory_space<vmem>>, vector<1x32x128xf32>
    %93 = vector.shape_cast %92 : vector<1x32x128xf32> to vector<32x128xf32>
    %cst_34 = arith.constant dense<0.000000e+00> : vector<96x128xf32>
    %94 = tpu.matmul %0, %93, %cst_34 {dimension_numbers = #tpu.dot_dimension_numbers<[1], [0], [0], [1], [0, 0, 1, 1], [], []>} : vector<96x32xf32>, vector<32x128xf32>, vector<96x128xf32> -> vector<96x128xf32>
    %95 = vector.broadcast %2 : vector<96x1xf32> to vector<96x128xf32>
    %96 = arith.addf %94, %95 : vector<96x128xf32>
    %cst_35 = arith.constant dense<0.000000e+00> : vector<96x128xf32>
    %97 = tpu.matmul %1, %91, %cst_35 {dimension_numbers = #tpu.dot_dimension_numbers<[1], [0], [0], [1], [0, 0, 1, 1], [], []>} : vector<96x32xf32>, vector<32x128xf32>, vector<96x128xf32> -> vector<96x128xf32>
    %98 = vector.extract_strided_slice %96 {offsets = [0, 0], sizes = [64, 128], strides = [1, 1]} : vector<96x128xf32> to vector<64x128xf32>
    %99 = vector.extract_strided_slice %97 {offsets = [0, 0], sizes = [64, 128], strides = [1, 1]} : vector<96x128xf32> to vector<64x128xf32>
    %100 = arith.addf %98, %99 : vector<64x128xf32>
    %101 = arith.negf %100 : vector<64x128xf32>
    %102 = math.exp %101 : vector<64x128xf32>
    %cst_36 = arith.constant 1.000000e+00 : f32
    %103 = vector.broadcast %cst_36 : f32 to vector<64x128xf32>
    %104 = arith.addf %103, %102 : vector<64x128xf32>
    %105 = arith.divf %103, %104 : vector<64x128xf32>
    %106 = vector.extract_strided_slice %105 {offsets = [0, 0], sizes = [32, 128], strides = [1, 1]} : vector<64x128xf32> to vector<32x128xf32>
    %107 = vector.extract_strided_slice %105 {offsets = [32, 0], sizes = [32, 128], strides = [1, 1]} : vector<64x128xf32> to vector<32x128xf32>
    %108 = vector.extract_strided_slice %96 {offsets = [64, 0], sizes = [32, 128], strides = [1, 1]} : vector<96x128xf32> to vector<32x128xf32>
    %109 = vector.extract_strided_slice %97 {offsets = [64, 0], sizes = [32, 128], strides = [1, 1]} : vector<96x128xf32> to vector<32x128xf32>
    %110 = vector.broadcast %3 : vector<32x1xf32> to vector<32x128xf32>
    %111 = arith.addf %109, %110 : vector<32x128xf32>
    %112 = arith.mulf %106, %111 : vector<32x128xf32>
    %113 = arith.addf %108, %112 : vector<32x128xf32>
    %114 = math.tanh %113 : vector<32x128xf32>
    %cst_37 = arith.constant 1.000000e+00 : f32
    %115 = vector.broadcast %cst_37 : f32 to vector<32x128xf32>
    %116 = arith.subf %115, %107 : vector<32x128xf32>
    %117 = arith.mulf %116, %114 : vector<32x128xf32>
    %118 = arith.mulf %107, %91 : vector<32x128xf32>
    %119 = arith.addf %117, %118 : vector<32x128xf32>
    %c4 = arith.constant 4 : index
    %c0_38 = arith.constant 0 : index
    %c0_39 = arith.constant 0 : index
    %120 = vector.load %arg2[%c4, %c0_38, %c0_39] : memref<8x32x256xf32, #tpu.memory_space<vmem>>, vector<1x32x128xf32>
    %121 = vector.shape_cast %120 : vector<1x32x128xf32> to vector<32x128xf32>
    %cst_40 = arith.constant dense<0.000000e+00> : vector<96x128xf32>
    %122 = tpu.matmul %0, %121, %cst_40 {dimension_numbers = #tpu.dot_dimension_numbers<[1], [0], [0], [1], [0, 0, 1, 1], [], []>} : vector<96x32xf32>, vector<32x128xf32>, vector<96x128xf32> -> vector<96x128xf32>
    %123 = vector.broadcast %2 : vector<96x1xf32> to vector<96x128xf32>
    %124 = arith.addf %122, %123 : vector<96x128xf32>
    %cst_41 = arith.constant dense<0.000000e+00> : vector<96x128xf32>
    %125 = tpu.matmul %1, %119, %cst_41 {dimension_numbers = #tpu.dot_dimension_numbers<[1], [0], [0], [1], [0, 0, 1, 1], [], []>} : vector<96x32xf32>, vector<32x128xf32>, vector<96x128xf32> -> vector<96x128xf32>
    %126 = vector.extract_strided_slice %124 {offsets = [0, 0], sizes = [64, 128], strides = [1, 1]} : vector<96x128xf32> to vector<64x128xf32>
    %127 = vector.extract_strided_slice %125 {offsets = [0, 0], sizes = [64, 128], strides = [1, 1]} : vector<96x128xf32> to vector<64x128xf32>
    %128 = arith.addf %126, %127 : vector<64x128xf32>
    %129 = arith.negf %128 : vector<64x128xf32>
    %130 = math.exp %129 : vector<64x128xf32>
    %cst_42 = arith.constant 1.000000e+00 : f32
    %131 = vector.broadcast %cst_42 : f32 to vector<64x128xf32>
    %132 = arith.addf %131, %130 : vector<64x128xf32>
    %133 = arith.divf %131, %132 : vector<64x128xf32>
    %134 = vector.extract_strided_slice %133 {offsets = [0, 0], sizes = [32, 128], strides = [1, 1]} : vector<64x128xf32> to vector<32x128xf32>
    %135 = vector.extract_strided_slice %133 {offsets = [32, 0], sizes = [32, 128], strides = [1, 1]} : vector<64x128xf32> to vector<32x128xf32>
    %136 = vector.extract_strided_slice %124 {offsets = [64, 0], sizes = [32, 128], strides = [1, 1]} : vector<96x128xf32> to vector<32x128xf32>
    %137 = vector.extract_strided_slice %125 {offsets = [64, 0], sizes = [32, 128], strides = [1, 1]} : vector<96x128xf32> to vector<32x128xf32>
    %138 = vector.broadcast %3 : vector<32x1xf32> to vector<32x128xf32>
    %139 = arith.addf %137, %138 : vector<32x128xf32>
    %140 = arith.mulf %134, %139 : vector<32x128xf32>
    %141 = arith.addf %136, %140 : vector<32x128xf32>
    %142 = math.tanh %141 : vector<32x128xf32>
    %cst_43 = arith.constant 1.000000e+00 : f32
    %143 = vector.broadcast %cst_43 : f32 to vector<32x128xf32>
    %144 = arith.subf %143, %135 : vector<32x128xf32>
    %145 = arith.mulf %144, %142 : vector<32x128xf32>
    %146 = arith.mulf %135, %119 : vector<32x128xf32>
    %147 = arith.addf %145, %146 : vector<32x128xf32>
    %c5 = arith.constant 5 : index
    %c0_44 = arith.constant 0 : index
    %c0_45 = arith.constant 0 : index
    %148 = vector.load %arg2[%c5, %c0_44, %c0_45] : memref<8x32x256xf32, #tpu.memory_space<vmem>>, vector<1x32x128xf32>
    %149 = vector.shape_cast %148 : vector<1x32x128xf32> to vector<32x128xf32>
    %cst_46 = arith.constant dense<0.000000e+00> : vector<96x128xf32>
    %150 = tpu.matmul %0, %149, %cst_46 {dimension_numbers = #tpu.dot_dimension_numbers<[1], [0], [0], [1], [0, 0, 1, 1], [], []>} : vector<96x32xf32>, vector<32x128xf32>, vector<96x128xf32> -> vector<96x128xf32>
    %151 = vector.broadcast %2 : vector<96x1xf32> to vector<96x128xf32>
    %152 = arith.addf %150, %151 : vector<96x128xf32>
    %cst_47 = arith.constant dense<0.000000e+00> : vector<96x128xf32>
    %153 = tpu.matmul %1, %147, %cst_47 {dimension_numbers = #tpu.dot_dimension_numbers<[1], [0], [0], [1], [0, 0, 1, 1], [], []>} : vector<96x32xf32>, vector<32x128xf32>, vector<96x128xf32> -> vector<96x128xf32>
    %154 = vector.extract_strided_slice %152 {offsets = [0, 0], sizes = [64, 128], strides = [1, 1]} : vector<96x128xf32> to vector<64x128xf32>
    %155 = vector.extract_strided_slice %153 {offsets = [0, 0], sizes = [64, 128], strides = [1, 1]} : vector<96x128xf32> to vector<64x128xf32>
    %156 = arith.addf %154, %155 : vector<64x128xf32>
    %157 = arith.negf %156 : vector<64x128xf32>
    %158 = math.exp %157 : vector<64x128xf32>
    %cst_48 = arith.constant 1.000000e+00 : f32
    %159 = vector.broadcast %cst_48 : f32 to vector<64x128xf32>
    %160 = arith.addf %159, %158 : vector<64x128xf32>
    %161 = arith.divf %159, %160 : vector<64x128xf32>
    %162 = vector.extract_strided_slice %161 {offsets = [0, 0], sizes = [32, 128], strides = [1, 1]} : vector<64x128xf32> to vector<32x128xf32>
    %163 = vector.extract_strided_slice %161 {offsets = [32, 0], sizes = [32, 128], strides = [1, 1]} : vector<64x128xf32> to vector<32x128xf32>
    %164 = vector.extract_strided_slice %152 {offsets = [64, 0], sizes = [32, 128], strides = [1, 1]} : vector<96x128xf32> to vector<32x128xf32>
    %165 = vector.extract_strided_slice %153 {offsets = [64, 0], sizes = [32, 128], strides = [1, 1]} : vector<96x128xf32> to vector<32x128xf32>
    %166 = vector.broadcast %3 : vector<32x1xf32> to vector<32x128xf32>
    %167 = arith.addf %165, %166 : vector<32x128xf32>
    %168 = arith.mulf %162, %167 : vector<32x128xf32>
    %169 = arith.addf %164, %168 : vector<32x128xf32>
    %170 = math.tanh %169 : vector<32x128xf32>
    %cst_49 = arith.constant 1.000000e+00 : f32
    %171 = vector.broadcast %cst_49 : f32 to vector<32x128xf32>
    %172 = arith.subf %171, %163 : vector<32x128xf32>
    %173 = arith.mulf %172, %170 : vector<32x128xf32>
    %174 = arith.mulf %163, %147 : vector<32x128xf32>
    %175 = arith.addf %173, %174 : vector<32x128xf32>
    %c6 = arith.constant 6 : index
    %c0_50 = arith.constant 0 : index
    %c0_51 = arith.constant 0 : index
    %176 = vector.load %arg2[%c6, %c0_50, %c0_51] : memref<8x32x256xf32, #tpu.memory_space<vmem>>, vector<1x32x128xf32>
    %177 = vector.shape_cast %176 : vector<1x32x128xf32> to vector<32x128xf32>
    %cst_52 = arith.constant dense<0.000000e+00> : vector<96x128xf32>
    %178 = tpu.matmul %0, %177, %cst_52 {dimension_numbers = #tpu.dot_dimension_numbers<[1], [0], [0], [1], [0, 0, 1, 1], [], []>} : vector<96x32xf32>, vector<32x128xf32>, vector<96x128xf32> -> vector<96x128xf32>
    %179 = vector.broadcast %2 : vector<96x1xf32> to vector<96x128xf32>
    %180 = arith.addf %178, %179 : vector<96x128xf32>
    %cst_53 = arith.constant dense<0.000000e+00> : vector<96x128xf32>
    %181 = tpu.matmul %1, %175, %cst_53 {dimension_numbers = #tpu.dot_dimension_numbers<[1], [0], [0], [1], [0, 0, 1, 1], [], []>} : vector<96x32xf32>, vector<32x128xf32>, vector<96x128xf32> -> vector<96x128xf32>
    %182 = vector.extract_strided_slice %180 {offsets = [0, 0], sizes = [64, 128], strides = [1, 1]} : vector<96x128xf32> to vector<64x128xf32>
    %183 = vector.extract_strided_slice %181 {offsets = [0, 0], sizes = [64, 128], strides = [1, 1]} : vector<96x128xf32> to vector<64x128xf32>
    %184 = arith.addf %182, %183 : vector<64x128xf32>
    %185 = arith.negf %184 : vector<64x128xf32>
    %186 = math.exp %185 : vector<64x128xf32>
    %cst_54 = arith.constant 1.000000e+00 : f32
    %187 = vector.broadcast %cst_54 : f32 to vector<64x128xf32>
    %188 = arith.addf %187, %186 : vector<64x128xf32>
    %189 = arith.divf %187, %188 : vector<64x128xf32>
    %190 = vector.extract_strided_slice %189 {offsets = [0, 0], sizes = [32, 128], strides = [1, 1]} : vector<64x128xf32> to vector<32x128xf32>
    %191 = vector.extract_strided_slice %189 {offsets = [32, 0], sizes = [32, 128], strides = [1, 1]} : vector<64x128xf32> to vector<32x128xf32>
    %192 = vector.extract_strided_slice %180 {offsets = [64, 0], sizes = [32, 128], strides = [1, 1]} : vector<96x128xf32> to vector<32x128xf32>
    %193 = vector.extract_strided_slice %181 {offsets = [64, 0], sizes = [32, 128], strides = [1, 1]} : vector<96x128xf32> to vector<32x128xf32>
    %194 = vector.broadcast %3 : vector<32x1xf32> to vector<32x128xf32>
    %195 = arith.addf %193, %194 : vector<32x128xf32>
    %196 = arith.mulf %190, %195 : vector<32x128xf32>
    %197 = arith.addf %192, %196 : vector<32x128xf32>
    %198 = math.tanh %197 : vector<32x128xf32>
    %cst_55 = arith.constant 1.000000e+00 : f32
    %199 = vector.broadcast %cst_55 : f32 to vector<32x128xf32>
    %200 = arith.subf %199, %191 : vector<32x128xf32>
    %201 = arith.mulf %200, %198 : vector<32x128xf32>
    %202 = arith.mulf %191, %175 : vector<32x128xf32>
    %203 = arith.addf %201, %202 : vector<32x128xf32>
    %c7 = arith.constant 7 : index
    %c0_56 = arith.constant 0 : index
    %c0_57 = arith.constant 0 : index
    %204 = vector.load %arg2[%c7, %c0_56, %c0_57] : memref<8x32x256xf32, #tpu.memory_space<vmem>>, vector<1x32x128xf32>
    %205 = vector.shape_cast %204 : vector<1x32x128xf32> to vector<32x128xf32>
    %cst_58 = arith.constant dense<0.000000e+00> : vector<96x128xf32>
    %206 = tpu.matmul %0, %205, %cst_58 {dimension_numbers = #tpu.dot_dimension_numbers<[1], [0], [0], [1], [0, 0, 1, 1], [], []>} : vector<96x32xf32>, vector<32x128xf32>, vector<96x128xf32> -> vector<96x128xf32>
    %207 = vector.broadcast %2 : vector<96x1xf32> to vector<96x128xf32>
    %208 = arith.addf %206, %207 : vector<96x128xf32>
    %cst_59 = arith.constant dense<0.000000e+00> : vector<96x128xf32>
    %209 = tpu.matmul %1, %203, %cst_59 {dimension_numbers = #tpu.dot_dimension_numbers<[1], [0], [0], [1], [0, 0, 1, 1], [], []>} : vector<96x32xf32>, vector<32x128xf32>, vector<96x128xf32> -> vector<96x128xf32>
    %210 = vector.extract_strided_slice %208 {offsets = [0, 0], sizes = [64, 128], strides = [1, 1]} : vector<96x128xf32> to vector<64x128xf32>
    %211 = vector.extract_strided_slice %209 {offsets = [0, 0], sizes = [64, 128], strides = [1, 1]} : vector<96x128xf32> to vector<64x128xf32>
    %212 = arith.addf %210, %211 : vector<64x128xf32>
    %213 = arith.negf %212 : vector<64x128xf32>
    %214 = math.exp %213 : vector<64x128xf32>
    %cst_60 = arith.constant 1.000000e+00 : f32
    %215 = vector.broadcast %cst_60 : f32 to vector<64x128xf32>
    %216 = arith.addf %215, %214 : vector<64x128xf32>
    %217 = arith.divf %215, %216 : vector<64x128xf32>
    %218 = vector.extract_strided_slice %217 {offsets = [0, 0], sizes = [32, 128], strides = [1, 1]} : vector<64x128xf32> to vector<32x128xf32>
    %219 = vector.extract_strided_slice %217 {offsets = [32, 0], sizes = [32, 128], strides = [1, 1]} : vector<64x128xf32> to vector<32x128xf32>
    %220 = vector.extract_strided_slice %208 {offsets = [64, 0], sizes = [32, 128], strides = [1, 1]} : vector<96x128xf32> to vector<32x128xf32>
    %221 = vector.extract_strided_slice %209 {offsets = [64, 0], sizes = [32, 128], strides = [1, 1]} : vector<96x128xf32> to vector<32x128xf32>
    %222 = vector.broadcast %3 : vector<32x1xf32> to vector<32x128xf32>
    %223 = arith.addf %221, %222 : vector<32x128xf32>
    %224 = arith.mulf %218, %223 : vector<32x128xf32>
    %225 = arith.addf %220, %224 : vector<32x128xf32>
    %226 = math.tanh %225 : vector<32x128xf32>
    %cst_61 = arith.constant 1.000000e+00 : f32
    %227 = vector.broadcast %cst_61 : f32 to vector<32x128xf32>
    %228 = arith.subf %227, %219 : vector<32x128xf32>
    %229 = arith.mulf %228, %226 : vector<32x128xf32>
    %230 = arith.mulf %219, %203 : vector<32x128xf32>
    %231 = arith.addf %229, %230 : vector<32x128xf32>
    %c0_62 = arith.constant 0 : index
    %c0_63 = arith.constant 0 : index
    %232 = vector.load %arg1[%c0_62, %c0_63] : memref<32x256xf32, #tpu.memory_space<vmem>>, vector<32x128xf32>
    %cst_64 = arith.constant dense<0.000000e+00> : vector<64x128xf32>
    %233 = tpu.matmul %4, %232, %cst_64 {dimension_numbers = #tpu.dot_dimension_numbers<[1], [0], [0], [1], [0, 0, 1, 1], [], []>} : vector<64x32xf32>, vector<32x128xf32>, vector<64x128xf32> -> vector<64x128xf32>
    %cst_65 = arith.constant dense<0.000000e+00> : vector<64x128xf32>
    %234 = tpu.matmul %5, %231, %cst_65 {dimension_numbers = #tpu.dot_dimension_numbers<[1], [0], [0], [1], [0, 0, 1, 1], [], []>} : vector<64x32xf32>, vector<32x128xf32>, vector<64x128xf32> -> vector<64x128xf32>
    %235 = arith.addf %233, %234 : vector<64x128xf32>
    %cst_66 = arith.constant 0.000000e+00 : f32
    %236 = vector.broadcast %cst_66 : f32 to vector<64x128xf32>
    %237 = arith.cmpf oge, %235, %236 : vector<64x128xf32>
    %238 = vector.broadcast %6 : vector<64x1xf32> to vector<64x128xf32>
    %239 = arith.mulf %238, %235 : vector<64x128xf32>
    %240 = arith.select %237, %235, %239 : vector<64x128xi1>, vector<64x128xf32>
    %c0_67 = arith.constant 0 : index
    %c0_68 = arith.constant 0 : index
    %241 = vector.load %arg10[%c0_67, %c0_68] : memref<64x256xf32, #tpu.memory_space<vmem>>, vector<64x128xf32>
    tpu.vector_store %arg10[%c0_67, %c0_68], %240 {strides = array<i32>} : memref<64x256xf32, #tpu.memory_space<vmem>>, vector<64x128xf32>,
    %cst_69 = arith.constant 0.000000e+00 : f32
    %242 = vector.broadcast %cst_69 : f32 to vector<32x128xf32>
    %c0_70 = arith.constant 0 : index
    %c0_71 = arith.constant 0 : index
    %c128 = arith.constant 128 : index
    %243 = vector.load %arg2[%c0_70, %c0_71, %c128] : memref<8x32x256xf32, #tpu.memory_space<vmem>>, vector<1x32x128xf32>
    %244 = vector.shape_cast %243 : vector<1x32x128xf32> to vector<32x128xf32>
    %cst_72 = arith.constant dense<0.000000e+00> : vector<96x128xf32>
    %245 = tpu.matmul %0, %244, %cst_72 {dimension_numbers = #tpu.dot_dimension_numbers<[1], [0], [0], [1], [0, 0, 1, 1], [], []>} : vector<96x32xf32>, vector<32x128xf32>, vector<96x128xf32> -> vector<96x128xf32>
    %246 = vector.broadcast %2 : vector<96x1xf32> to vector<96x128xf32>
    %247 = arith.addf %245, %246 : vector<96x128xf32>
    %cst_73 = arith.constant dense<0.000000e+00> : vector<96x128xf32>
    %248 = tpu.matmul %1, %242, %cst_73 {dimension_numbers = #tpu.dot_dimension_numbers<[1], [0], [0], [1], [0, 0, 1, 1], [], []>} : vector<96x32xf32>, vector<32x128xf32>, vector<96x128xf32> -> vector<96x128xf32>
    %249 = vector.extract_strided_slice %247 {offsets = [0, 0], sizes = [64, 128], strides = [1, 1]} : vector<96x128xf32> to vector<64x128xf32>
    %250 = vector.extract_strided_slice %248 {offsets = [0, 0], sizes = [64, 128], strides = [1, 1]} : vector<96x128xf32> to vector<64x128xf32>
    %251 = arith.addf %249, %250 : vector<64x128xf32>
    %252 = arith.negf %251 : vector<64x128xf32>
    %253 = math.exp %252 : vector<64x128xf32>
    %cst_74 = arith.constant 1.000000e+00 : f32
    %254 = vector.broadcast %cst_74 : f32 to vector<64x128xf32>
    %255 = arith.addf %254, %253 : vector<64x128xf32>
    %256 = arith.divf %254, %255 : vector<64x128xf32>
    %257 = vector.extract_strided_slice %256 {offsets = [0, 0], sizes = [32, 128], strides = [1, 1]} : vector<64x128xf32> to vector<32x128xf32>
    %258 = vector.extract_strided_slice %256 {offsets = [32, 0], sizes = [32, 128], strides = [1, 1]} : vector<64x128xf32> to vector<32x128xf32>
    %259 = vector.extract_strided_slice %247 {offsets = [64, 0], sizes = [32, 128], strides = [1, 1]} : vector<96x128xf32> to vector<32x128xf32>
    %260 = vector.extract_strided_slice %248 {offsets = [64, 0], sizes = [32, 128], strides = [1, 1]} : vector<96x128xf32> to vector<32x128xf32>
    %261 = vector.broadcast %3 : vector<32x1xf32> to vector<32x128xf32>
    %262 = arith.addf %260, %261 : vector<32x128xf32>
    %263 = arith.mulf %257, %262 : vector<32x128xf32>
    %264 = arith.addf %259, %263 : vector<32x128xf32>
    %265 = math.tanh %264 : vector<32x128xf32>
    %cst_75 = arith.constant 1.000000e+00 : f32
    %266 = vector.broadcast %cst_75 : f32 to vector<32x128xf32>
    %267 = arith.subf %266, %258 : vector<32x128xf32>
    %268 = arith.mulf %267, %265 : vector<32x128xf32>
    %269 = arith.mulf %258, %242 : vector<32x128xf32>
    %270 = arith.addf %268, %269 : vector<32x128xf32>
    %c1_76 = arith.constant 1 : index
    %c0_77 = arith.constant 0 : index
    %c128_78 = arith.constant 128 : index
    %271 = vector.load %arg2[%c1_76, %c0_77, %c128_78] : memref<8x32x256xf32, #tpu.memory_space<vmem>>, vector<1x32x128xf32>
    %272 = vector.shape_cast %271 : vector<1x32x128xf32> to vector<32x128xf32>
    %cst_79 = arith.constant dense<0.000000e+00> : vector<96x128xf32>
    %273 = tpu.matmul %0, %272, %cst_79 {dimension_numbers = #tpu.dot_dimension_numbers<[1], [0], [0], [1], [0, 0, 1, 1], [], []>} : vector<96x32xf32>, vector<32x128xf32>, vector<96x128xf32> -> vector<96x128xf32>
    %274 = vector.broadcast %2 : vector<96x1xf32> to vector<96x128xf32>
    %275 = arith.addf %273, %274 : vector<96x128xf32>
    %cst_80 = arith.constant dense<0.000000e+00> : vector<96x128xf32>
    %276 = tpu.matmul %1, %270, %cst_80 {dimension_numbers = #tpu.dot_dimension_numbers<[1], [0], [0], [1], [0, 0, 1, 1], [], []>} : vector<96x32xf32>, vector<32x128xf32>, vector<96x128xf32> -> vector<96x128xf32>
    %277 = vector.extract_strided_slice %275 {offsets = [0, 0], sizes = [64, 128], strides = [1, 1]} : vector<96x128xf32> to vector<64x128xf32>
    %278 = vector.extract_strided_slice %276 {offsets = [0, 0], sizes = [64, 128], strides = [1, 1]} : vector<96x128xf32> to vector<64x128xf32>
    %279 = arith.addf %277, %278 : vector<64x128xf32>
    %280 = arith.negf %279 : vector<64x128xf32>
    %281 = math.exp %280 : vector<64x128xf32>
    %cst_81 = arith.constant 1.000000e+00 : f32
    %282 = vector.broadcast %cst_81 : f32 to vector<64x128xf32>
    %283 = arith.addf %282, %281 : vector<64x128xf32>
    %284 = arith.divf %282, %283 : vector<64x128xf32>
    %285 = vector.extract_strided_slice %284 {offsets = [0, 0], sizes = [32, 128], strides = [1, 1]} : vector<64x128xf32> to vector<32x128xf32>
    %286 = vector.extract_strided_slice %284 {offsets = [32, 0], sizes = [32, 128], strides = [1, 1]} : vector<64x128xf32> to vector<32x128xf32>
    %287 = vector.extract_strided_slice %275 {offsets = [64, 0], sizes = [32, 128], strides = [1, 1]} : vector<96x128xf32> to vector<32x128xf32>
    %288 = vector.extract_strided_slice %276 {offsets = [64, 0], sizes = [32, 128], strides = [1, 1]} : vector<96x128xf32> to vector<32x128xf32>
    %289 = vector.broadcast %3 : vector<32x1xf32> to vector<32x128xf32>
    %290 = arith.addf %288, %289 : vector<32x128xf32>
    %291 = arith.mulf %285, %290 : vector<32x128xf32>
    %292 = arith.addf %287, %291 : vector<32x128xf32>
    %293 = math.tanh %292 : vector<32x128xf32>
    %cst_82 = arith.constant 1.000000e+00 : f32
    %294 = vector.broadcast %cst_82 : f32 to vector<32x128xf32>
    %295 = arith.subf %294, %286 : vector<32x128xf32>
    %296 = arith.mulf %295, %293 : vector<32x128xf32>
    %297 = arith.mulf %286, %270 : vector<32x128xf32>
    %298 = arith.addf %296, %297 : vector<32x128xf32>
    %c2_83 = arith.constant 2 : index
    %c0_84 = arith.constant 0 : index
    %c128_85 = arith.constant 128 : index
    %299 = vector.load %arg2[%c2_83, %c0_84, %c128_85] : memref<8x32x256xf32, #tpu.memory_space<vmem>>, vector<1x32x128xf32>
    %300 = vector.shape_cast %299 : vector<1x32x128xf32> to vector<32x128xf32>
    %cst_86 = arith.constant dense<0.000000e+00> : vector<96x128xf32>
    %301 = tpu.matmul %0, %300, %cst_86 {dimension_numbers = #tpu.dot_dimension_numbers<[1], [0], [0], [1], [0, 0, 1, 1], [], []>} : vector<96x32xf32>, vector<32x128xf32>, vector<96x128xf32> -> vector<96x128xf32>
    %302 = vector.broadcast %2 : vector<96x1xf32> to vector<96x128xf32>
    %303 = arith.addf %301, %302 : vector<96x128xf32>
    %cst_87 = arith.constant dense<0.000000e+00> : vector<96x128xf32>
    %304 = tpu.matmul %1, %298, %cst_87 {dimension_numbers = #tpu.dot_dimension_numbers<[1], [0], [0], [1], [0, 0, 1, 1], [], []>} : vector<96x32xf32>, vector<32x128xf32>, vector<96x128xf32> -> vector<96x128xf32>
    %305 = vector.extract_strided_slice %303 {offsets = [0, 0], sizes = [64, 128], strides = [1, 1]} : vector<96x128xf32> to vector<64x128xf32>
    %306 = vector.extract_strided_slice %304 {offsets = [0, 0], sizes = [64, 128], strides = [1, 1]} : vector<96x128xf32> to vector<64x128xf32>
    %307 = arith.addf %305, %306 : vector<64x128xf32>
    %308 = arith.negf %307 : vector<64x128xf32>
    %309 = math.exp %308 : vector<64x128xf32>
    %cst_88 = arith.constant 1.000000e+00 : f32
    %310 = vector.broadcast %cst_88 : f32 to vector<64x128xf32>
    %311 = arith.addf %310, %309 : vector<64x128xf32>
    %312 = arith.divf %310, %311 : vector<64x128xf32>
    %313 = vector.extract_strided_slice %312 {offsets = [0, 0], sizes = [32, 128], strides = [1, 1]} : vector<64x128xf32> to vector<32x128xf32>
    %314 = vector.extract_strided_slice %312 {offsets = [32, 0], sizes = [32, 128], strides = [1, 1]} : vector<64x128xf32> to vector<32x128xf32>
    %315 = vector.extract_strided_slice %303 {offsets = [64, 0], sizes = [32, 128], strides = [1, 1]} : vector<96x128xf32> to vector<32x128xf32>
    %316 = vector.extract_strided_slice %304 {offsets = [64, 0], sizes = [32, 128], strides = [1, 1]} : vector<96x128xf32> to vector<32x128xf32>
    %317 = vector.broadcast %3 : vector<32x1xf32> to vector<32x128xf32>
    %318 = arith.addf %316, %317 : vector<32x128xf32>
    %319 = arith.mulf %313, %318 : vector<32x128xf32>
    %320 = arith.addf %315, %319 : vector<32x128xf32>
    %321 = math.tanh %320 : vector<32x128xf32>
    %cst_89 = arith.constant 1.000000e+00 : f32
    %322 = vector.broadcast %cst_89 : f32 to vector<32x128xf32>
    %323 = arith.subf %322, %314 : vector<32x128xf32>
    %324 = arith.mulf %323, %321 : vector<32x128xf32>
    %325 = arith.mulf %314, %298 : vector<32x128xf32>
    %326 = arith.addf %324, %325 : vector<32x128xf32>
    %c3_90 = arith.constant 3 : index
    %c0_91 = arith.constant 0 : index
    %c128_92 = arith.constant 128 : index
    %327 = vector.load %arg2[%c3_90, %c0_91, %c128_92] : memref<8x32x256xf32, #tpu.memory_space<vmem>>, vector<1x32x128xf32>
    %328 = vector.shape_cast %327 : vector<1x32x128xf32> to vector<32x128xf32>
    %cst_93 = arith.constant dense<0.000000e+00> : vector<96x128xf32>
    %329 = tpu.matmul %0, %328, %cst_93 {dimension_numbers = #tpu.dot_dimension_numbers<[1], [0], [0], [1], [0, 0, 1, 1], [], []>} : vector<96x32xf32>, vector<32x128xf32>, vector<96x128xf32> -> vector<96x128xf32>
    %330 = vector.broadcast %2 : vector<96x1xf32> to vector<96x128xf32>
    %331 = arith.addf %329, %330 : vector<96x128xf32>
    %cst_94 = arith.constant dense<0.000000e+00> : vector<96x128xf32>
    %332 = tpu.matmul %1, %326, %cst_94 {dimension_numbers = #tpu.dot_dimension_numbers<[1], [0], [0], [1], [0, 0, 1, 1], [], []>} : vector<96x32xf32>, vector<32x128xf32>, vector<96x128xf32> -> vector<96x128xf32>
    %333 = vector.extract_strided_slice %331 {offsets = [0, 0], sizes = [64, 128], strides = [1, 1]} : vector<96x128xf32> to vector<64x128xf32>
    %334 = vector.extract_strided_slice %332 {offsets = [0, 0], sizes = [64, 128], strides = [1, 1]} : vector<96x128xf32> to vector<64x128xf32>
    %335 = arith.addf %333, %334 : vector<64x128xf32>
    %336 = arith.negf %335 : vector<64x128xf32>
    %337 = math.exp %336 : vector<64x128xf32>
    %cst_95 = arith.constant 1.000000e+00 : f32
    %338 = vector.broadcast %cst_95 : f32 to vector<64x128xf32>
    %339 = arith.addf %338, %337 : vector<64x128xf32>
    %340 = arith.divf %338, %339 : vector<64x128xf32>
    %341 = vector.extract_strided_slice %340 {offsets = [0, 0], sizes = [32, 128], strides = [1, 1]} : vector<64x128xf32> to vector<32x128xf32>
    %342 = vector.extract_strided_slice %340 {offsets = [32, 0], sizes = [32, 128], strides = [1, 1]} : vector<64x128xf32> to vector<32x128xf32>
    %343 = vector.extract_strided_slice %331 {offsets = [64, 0], sizes = [32, 128], strides = [1, 1]} : vector<96x128xf32> to vector<32x128xf32>
    %344 = vector.extract_strided_slice %332 {offsets = [64, 0], sizes = [32, 128], strides = [1, 1]} : vector<96x128xf32> to vector<32x128xf32>
    %345 = vector.broadcast %3 : vector<32x1xf32> to vector<32x128xf32>
    %346 = arith.addf %344, %345 : vector<32x128xf32>
    %347 = arith.mulf %341, %346 : vector<32x128xf32>
    %348 = arith.addf %343, %347 : vector<32x128xf32>
    %349 = math.tanh %348 : vector<32x128xf32>
    %cst_96 = arith.constant 1.000000e+00 : f32
    %350 = vector.broadcast %cst_96 : f32 to vector<32x128xf32>
    %351 = arith.subf %350, %342 : vector<32x128xf32>
    %352 = arith.mulf %351, %349 : vector<32x128xf32>
    %353 = arith.mulf %342, %326 : vector<32x128xf32>
    %354 = arith.addf %352, %353 : vector<32x128xf32>
    %c4_97 = arith.constant 4 : index
    %c0_98 = arith.constant 0 : index
    %c128_99 = arith.constant 128 : index
    %355 = vector.load %arg2[%c4_97, %c0_98, %c128_99] : memref<8x32x256xf32, #tpu.memory_space<vmem>>, vector<1x32x128xf32>
    %356 = vector.shape_cast %355 : vector<1x32x128xf32> to vector<32x128xf32>
    %cst_100 = arith.constant dense<0.000000e+00> : vector<96x128xf32>
    %357 = tpu.matmul %0, %356, %cst_100 {dimension_numbers = #tpu.dot_dimension_numbers<[1], [0], [0], [1], [0, 0, 1, 1], [], []>} : vector<96x32xf32>, vector<32x128xf32>, vector<96x128xf32> -> vector<96x128xf32>
    %358 = vector.broadcast %2 : vector<96x1xf32> to vector<96x128xf32>
    %359 = arith.addf %357, %358 : vector<96x128xf32>
    %cst_101 = arith.constant dense<0.000000e+00> : vector<96x128xf32>
    %360 = tpu.matmul %1, %354, %cst_101 {dimension_numbers = #tpu.dot_dimension_numbers<[1], [0], [0], [1], [0, 0, 1, 1], [], []>} : vector<96x32xf32>, vector<32x128xf32>, vector<96x128xf32> -> vector<96x128xf32>
    %361 = vector.extract_strided_slice %359 {offsets = [0, 0], sizes = [64, 128], strides = [1, 1]} : vector<96x128xf32> to vector<64x128xf32>
    %362 = vector.extract_strided_slice %360 {offsets = [0, 0], sizes = [64, 128], strides = [1, 1]} : vector<96x128xf32> to vector<64x128xf32>
    %363 = arith.addf %361, %362 : vector<64x128xf32>
    %364 = arith.negf %363 : vector<64x128xf32>
    %365 = math.exp %364 : vector<64x128xf32>
    %cst_102 = arith.constant 1.000000e+00 : f32
    %366 = vector.broadcast %cst_102 : f32 to vector<64x128xf32>
    %367 = arith.addf %366, %365 : vector<64x128xf32>
    %368 = arith.divf %366, %367 : vector<64x128xf32>
    %369 = vector.extract_strided_slice %368 {offsets = [0, 0], sizes = [32, 128], strides = [1, 1]} : vector<64x128xf32> to vector<32x128xf32>
    %370 = vector.extract_strided_slice %368 {offsets = [32, 0], sizes = [32, 128], strides = [1, 1]} : vector<64x128xf32> to vector<32x128xf32>
    %371 = vector.extract_strided_slice %359 {offsets = [64, 0], sizes = [32, 128], strides = [1, 1]} : vector<96x128xf32> to vector<32x128xf32>
    %372 = vector.extract_strided_slice %360 {offsets = [64, 0], sizes = [32, 128], strides = [1, 1]} : vector<96x128xf32> to vector<32x128xf32>
    %373 = vector.broadcast %3 : vector<32x1xf32> to vector<32x128xf32>
    %374 = arith.addf %372, %373 : vector<32x128xf32>
    %375 = arith.mulf %369, %374 : vector<32x128xf32>
    %376 = arith.addf %371, %375 : vector<32x128xf32>
    %377 = math.tanh %376 : vector<32x128xf32>
    %cst_103 = arith.constant 1.000000e+00 : f32
    %378 = vector.broadcast %cst_103 : f32 to vector<32x128xf32>
    %379 = arith.subf %378, %370 : vector<32x128xf32>
    %380 = arith.mulf %379, %377 : vector<32x128xf32>
    %381 = arith.mulf %370, %354 : vector<32x128xf32>
    %382 = arith.addf %380, %381 : vector<32x128xf32>
    %c5_104 = arith.constant 5 : index
    %c0_105 = arith.constant 0 : index
    %c128_106 = arith.constant 128 : index
    %383 = vector.load %arg2[%c5_104, %c0_105, %c128_106] : memref<8x32x256xf32, #tpu.memory_space<vmem>>, vector<1x32x128xf32>
    %384 = vector.shape_cast %383 : vector<1x32x128xf32> to vector<32x128xf32>
    %cst_107 = arith.constant dense<0.000000e+00> : vector<96x128xf32>
    %385 = tpu.matmul %0, %384, %cst_107 {dimension_numbers = #tpu.dot_dimension_numbers<[1], [0], [0], [1], [0, 0, 1, 1], [], []>} : vector<96x32xf32>, vector<32x128xf32>, vector<96x128xf32> -> vector<96x128xf32>
    %386 = vector.broadcast %2 : vector<96x1xf32> to vector<96x128xf32>
    %387 = arith.addf %385, %386 : vector<96x128xf32>
    %cst_108 = arith.constant dense<0.000000e+00> : vector<96x128xf32>
    %388 = tpu.matmul %1, %382, %cst_108 {dimension_numbers = #tpu.dot_dimension_numbers<[1], [0], [0], [1], [0, 0, 1, 1], [], []>} : vector<96x32xf32>, vector<32x128xf32>, vector<96x128xf32> -> vector<96x128xf32>
    %389 = vector.extract_strided_slice %387 {offsets = [0, 0], sizes = [64, 128], strides = [1, 1]} : vector<96x128xf32> to vector<64x128xf32>
    %390 = vector.extract_strided_slice %388 {offsets = [0, 0], sizes = [64, 128], strides = [1, 1]} : vector<96x128xf32> to vector<64x128xf32>
    %391 = arith.addf %389, %390 : vector<64x128xf32>
    %392 = arith.negf %391 : vector<64x128xf32>
    %393 = math.exp %392 : vector<64x128xf32>
    %cst_109 = arith.constant 1.000000e+00 : f32
    %394 = vector.broadcast %cst_109 : f32 to vector<64x128xf32>
    %395 = arith.addf %394, %393 : vector<64x128xf32>
    %396 = arith.divf %394, %395 : vector<64x128xf32>
    %397 = vector.extract_strided_slice %396 {offsets = [0, 0], sizes = [32, 128], strides = [1, 1]} : vector<64x128xf32> to vector<32x128xf32>
    %398 = vector.extract_strided_slice %396 {offsets = [32, 0], sizes = [32, 128], strides = [1, 1]} : vector<64x128xf32> to vector<32x128xf32>
    %399 = vector.extract_strided_slice %387 {offsets = [64, 0], sizes = [32, 128], strides = [1, 1]} : vector<96x128xf32> to vector<32x128xf32>
    %400 = vector.extract_strided_slice %388 {offsets = [64, 0], sizes = [32, 128], strides = [1, 1]} : vector<96x128xf32> to vector<32x128xf32>
    %401 = vector.broadcast %3 : vector<32x1xf32> to vector<32x128xf32>
    %402 = arith.addf %400, %401 : vector<32x128xf32>
    %403 = arith.mulf %397, %402 : vector<32x128xf32>
    %404 = arith.addf %399, %403 : vector<32x128xf32>
    %405 = math.tanh %404 : vector<32x128xf32>
    %cst_110 = arith.constant 1.000000e+00 : f32
    %406 = vector.broadcast %cst_110 : f32 to vector<32x128xf32>
    %407 = arith.subf %406, %398 : vector<32x128xf32>
    %408 = arith.mulf %407, %405 : vector<32x128xf32>
    %409 = arith.mulf %398, %382 : vector<32x128xf32>
    %410 = arith.addf %408, %409 : vector<32x128xf32>
    %c6_111 = arith.constant 6 : index
    %c0_112 = arith.constant 0 : index
    %c128_113 = arith.constant 128 : index
    %411 = vector.load %arg2[%c6_111, %c0_112, %c128_113] : memref<8x32x256xf32, #tpu.memory_space<vmem>>, vector<1x32x128xf32>
    %412 = vector.shape_cast %411 : vector<1x32x128xf32> to vector<32x128xf32>
    %cst_114 = arith.constant dense<0.000000e+00> : vector<96x128xf32>
    %413 = tpu.matmul %0, %412, %cst_114 {dimension_numbers = #tpu.dot_dimension_numbers<[1], [0], [0], [1], [0, 0, 1, 1], [], []>} : vector<96x32xf32>, vector<32x128xf32>, vector<96x128xf32> -> vector<96x128xf32>
    %414 = vector.broadcast %2 : vector<96x1xf32> to vector<96x128xf32>
    %415 = arith.addf %413, %414 : vector<96x128xf32>
    %cst_115 = arith.constant dense<0.000000e+00> : vector<96x128xf32>
    %416 = tpu.matmul %1, %410, %cst_115 {dimension_numbers = #tpu.dot_dimension_numbers<[1], [0], [0], [1], [0, 0, 1, 1], [], []>} : vector<96x32xf32>, vector<32x128xf32>, vector<96x128xf32> -> vector<96x128xf32>
    %417 = vector.extract_strided_slice %415 {offsets = [0, 0], sizes = [64, 128], strides = [1, 1]} : vector<96x128xf32> to vector<64x128xf32>
    %418 = vector.extract_strided_slice %416 {offsets = [0, 0], sizes = [64, 128], strides = [1, 1]} : vector<96x128xf32> to vector<64x128xf32>
    %419 = arith.addf %417, %418 : vector<64x128xf32>
    %420 = arith.negf %419 : vector<64x128xf32>
    %421 = math.exp %420 : vector<64x128xf32>
    %cst_116 = arith.constant 1.000000e+00 : f32
    %422 = vector.broadcast %cst_116 : f32 to vector<64x128xf32>
    %423 = arith.addf %422, %421 : vector<64x128xf32>
    %424 = arith.divf %422, %423 : vector<64x128xf32>
    %425 = vector.extract_strided_slice %424 {offsets = [0, 0], sizes = [32, 128], strides = [1, 1]} : vector<64x128xf32> to vector<32x128xf32>
    %426 = vector.extract_strided_slice %424 {offsets = [32, 0], sizes = [32, 128], strides = [1, 1]} : vector<64x128xf32> to vector<32x128xf32>
    %427 = vector.extract_strided_slice %415 {offsets = [64, 0], sizes = [32, 128], strides = [1, 1]} : vector<96x128xf32> to vector<32x128xf32>
    %428 = vector.extract_strided_slice %416 {offsets = [64, 0], sizes = [32, 128], strides = [1, 1]} : vector<96x128xf32> to vector<32x128xf32>
    %429 = vector.broadcast %3 : vector<32x1xf32> to vector<32x128xf32>
    %430 = arith.addf %428, %429 : vector<32x128xf32>
    %431 = arith.mulf %425, %430 : vector<32x128xf32>
    %432 = arith.addf %427, %431 : vector<32x128xf32>
    %433 = math.tanh %432 : vector<32x128xf32>
    %cst_117 = arith.constant 1.000000e+00 : f32
    %434 = vector.broadcast %cst_117 : f32 to vector<32x128xf32>
    %435 = arith.subf %434, %426 : vector<32x128xf32>
    %436 = arith.mulf %435, %433 : vector<32x128xf32>
    %437 = arith.mulf %426, %410 : vector<32x128xf32>
    %438 = arith.addf %436, %437 : vector<32x128xf32>
    %c7_118 = arith.constant 7 : index
    %c0_119 = arith.constant 0 : index
    %c128_120 = arith.constant 128 : index
    %439 = vector.load %arg2[%c7_118, %c0_119, %c128_120] : memref<8x32x256xf32, #tpu.memory_space<vmem>>, vector<1x32x128xf32>
    %440 = vector.shape_cast %439 : vector<1x32x128xf32> to vector<32x128xf32>
    %cst_121 = arith.constant dense<0.000000e+00> : vector<96x128xf32>
    %441 = tpu.matmul %0, %440, %cst_121 {dimension_numbers = #tpu.dot_dimension_numbers<[1], [0], [0], [1], [0, 0, 1, 1], [], []>} : vector<96x32xf32>, vector<32x128xf32>, vector<96x128xf32> -> vector<96x128xf32>
    %442 = vector.broadcast %2 : vector<96x1xf32> to vector<96x128xf32>
    %443 = arith.addf %441, %442 : vector<96x128xf32>
    %cst_122 = arith.constant dense<0.000000e+00> : vector<96x128xf32>
    %444 = tpu.matmul %1, %438, %cst_122 {dimension_numbers = #tpu.dot_dimension_numbers<[1], [0], [0], [1], [0, 0, 1, 1], [], []>} : vector<96x32xf32>, vector<32x128xf32>, vector<96x128xf32> -> vector<96x128xf32>
    %445 = vector.extract_strided_slice %443 {offsets = [0, 0], sizes = [64, 128], strides = [1, 1]} : vector<96x128xf32> to vector<64x128xf32>
    %446 = vector.extract_strided_slice %444 {offsets = [0, 0], sizes = [64, 128], strides = [1, 1]} : vector<96x128xf32> to vector<64x128xf32>
    %447 = arith.addf %445, %446 : vector<64x128xf32>
    %448 = arith.negf %447 : vector<64x128xf32>
    %449 = math.exp %448 : vector<64x128xf32>
    %cst_123 = arith.constant 1.000000e+00 : f32
    %450 = vector.broadcast %cst_123 : f32 to vector<64x128xf32>
    %451 = arith.addf %450, %449 : vector<64x128xf32>
    %452 = arith.divf %450, %451 : vector<64x128xf32>
    %453 = vector.extract_strided_slice %452 {offsets = [0, 0], sizes = [32, 128], strides = [1, 1]} : vector<64x128xf32> to vector<32x128xf32>
    %454 = vector.extract_strided_slice %452 {offsets = [32, 0], sizes = [32, 128], strides = [1, 1]} : vector<64x128xf32> to vector<32x128xf32>
    %455 = vector.extract_strided_slice %443 {offsets = [64, 0], sizes = [32, 128], strides = [1, 1]} : vector<96x128xf32> to vector<32x128xf32>
    %456 = vector.extract_strided_slice %444 {offsets = [64, 0], sizes = [32, 128], strides = [1, 1]} : vector<96x128xf32> to vector<32x128xf32>
    %457 = vector.broadcast %3 : vector<32x1xf32> to vector<32x128xf32>
    %458 = arith.addf %456, %457 : vector<32x128xf32>
    %459 = arith.mulf %453, %458 : vector<32x128xf32>
    %460 = arith.addf %455, %459 : vector<32x128xf32>
    %461 = math.tanh %460 : vector<32x128xf32>
    %cst_124 = arith.constant 1.000000e+00 : f32
    %462 = vector.broadcast %cst_124 : f32 to vector<32x128xf32>
    %463 = arith.subf %462, %454 : vector<32x128xf32>
    %464 = arith.mulf %463, %461 : vector<32x128xf32>
    %465 = arith.mulf %454, %438 : vector<32x128xf32>
    %466 = arith.addf %464, %465 : vector<32x128xf32>
    %c0_125 = arith.constant 0 : index
    %c128_126 = arith.constant 128 : index
    %467 = vector.load %arg1[%c0_125, %c128_126] : memref<32x256xf32, #tpu.memory_space<vmem>>, vector<32x128xf32>
    %cst_127 = arith.constant dense<0.000000e+00> : vector<64x128xf32>
    %468 = tpu.matmul %4, %467, %cst_127 {dimension_numbers = #tpu.dot_dimension_numbers<[1], [0], [0], [1], [0, 0, 1, 1], [], []>} : vector<64x32xf32>, vector<32x128xf32>, vector<64x128xf32> -> vector<64x128xf32>
    %cst_128 = arith.constant dense<0.000000e+00> : vector<64x128xf32>
    %469 = tpu.matmul %5, %466, %cst_128 {dimension_numbers = #tpu.dot_dimension_numbers<[1], [0], [0], [1], [0, 0, 1, 1], [], []>} : vector<64x32xf32>, vector<32x128xf32>, vector<64x128xf32> -> vector<64x128xf32>
    %470 = arith.addf %468, %469 : vector<64x128xf32>
    %cst_129 = arith.constant 0.000000e+00 : f32
    %471 = vector.broadcast %cst_129 : f32 to vector<64x128xf32>
    %472 = arith.cmpf oge, %470, %471 : vector<64x128xf32>
    %473 = vector.broadcast %6 : vector<64x1xf32> to vector<64x128xf32>
    %474 = arith.mulf %473, %470 : vector<64x128xf32>
    %475 = arith.select %472, %470, %474 : vector<64x128xi1>, vector<64x128xf32>
    %c0_130 = arith.constant 0 : index
    %c128_131 = arith.constant 128 : index
    %476 = vector.load %arg10[%c0_130, %c128_131] : memref<64x256xf32, #tpu.memory_space<vmem>>, vector<64x128xf32>
    tpu.vector_store %arg10[%c0_130, %c128_131], %475 {strides = array<i32>} : memref<64x256xf32, #tpu.memory_space<vmem>>, vector<64x128xf32>,
    return
  }
  func.func @transform_0(%arg0: i32) -> (i32, i32) {
    %c0_i32 = arith.constant 0 : i32
    %c0_i32_0 = arith.constant 0 : i32
    return %c0_i32, %arg0 : i32, i32
  }
  func.func @transform_1(%arg0: i32) -> (i32, i32, i32) {
    %c0_i32 = arith.constant 0 : i32
    %c0_i32_0 = arith.constant 0 : i32
    %c0_i32_1 = arith.constant 0 : i32
    return %c0_i32, %c0_i32_0, %arg0 : i32, i32, i32
  }
  func.func @transform_2(%arg0: i32) -> (i32, i32) {
    %c0_i32 = arith.constant 0 : i32
    %c0_i32_0 = arith.constant 0 : i32
    %c0_i32_1 = arith.constant 0 : i32
    return %c0_i32, %c0_i32_0 : i32, i32
  }
  func.func @transform_3(%arg0: i32) -> (i32, i32) {
    %c0_i32 = arith.constant 0 : i32
    %c0_i32_0 = arith.constant 0 : i32
    %c0_i32_1 = arith.constant 0 : i32
    return %c0_i32, %c0_i32_0 : i32, i32
  }
  func.func @transform_4(%arg0: i32) -> (i32, i32) {
    %c0_i32 = arith.constant 0 : i32
    %c0_i32_0 = arith.constant 0 : i32
    %c0_i32_1 = arith.constant 0 : i32
    return %c0_i32, %c0_i32_0 : i32, i32
  }
  func.func @transform_5(%arg0: i32) -> (i32, i32) {
    %c0_i32 = arith.constant 0 : i32
    %c0_i32_0 = arith.constant 0 : i32
    %c0_i32_1 = arith.constant 0 : i32
    return %c0_i32, %c0_i32_0 : i32, i32
  }
  func.func @transform_6(%arg0: i32) -> (i32, i32) {
    %c0_i32 = arith.constant 0 : i32
    %c0_i32_0 = arith.constant 0 : i32
    %c0_i32_1 = arith.constant 0 : i32
    return %c0_i32, %c0_i32_0 : i32, i32
  }
  func.func @transform_7(%arg0: i32) -> (i32, i32) {
    %c0_i32 = arith.constant 0 : i32
    %c0_i32_0 = arith.constant 0 : i32
    %c0_i32_1 = arith.constant 0 : i32
    return %c0_i32, %c0_i32_0 : i32, i32
  }
  func.func @transform_8(%arg0: i32) -> (i32, i32) {
    %c0_i32 = arith.constant 0 : i32
    %c0_i32_0 = arith.constant 0 : i32
    %c0_i32_1 = arith.constant 0 : i32
    return %c0_i32, %c0_i32_0 : i32, i32
  }
  func.func @transform_9(%arg0: i32) -> (i32, i32) {
    %c0_i32 = arith.constant 0 : i32
    %c0_i32_0 = arith.constant 0 : i32
    return %c0_i32, %arg0 : i32, i32
  }
}

</mosaic_0001>

<bundles_post_ra>
// kernel: tpu_custom_call.1
= control target key start
LH: loop header
LB: loop body
LE: loop exit
PB: predicated region body
PF: predicated region fallthrough
CT: control target
= control target key end

     0   :  { %s11898_s0 = inlined_call_operand.vmem [shape: f32[32,1024], index: 0, kind: input, shape index: {}]   ;;  %s11899_s1 = inlined_call_operand.hbm [shape: f32[8,32,1024], index: 1, kind: input, shape index: {}]   ;;  %s11900_s2 = inlined_call_operand.vmem [shape: f32[96,32], index: 2, kind: input, shape index: {}]   ;;  %s11901_s3 = inlined_call_operand.vmem [shape: f32[96,32], index: 3, kind: input, shape index: {}]   ;;  %s11902_s4 = inlined_call_operand.vmem [shape: f32[96,1], index: 4, kind: input, shape index: {}]   ;;  %s11903_s5 = inlined_call_operand.vmem [shape: f32[32,1], index: 5, kind: input, shape index: {}]   ;;  %s11904_s6 = inlined_call_operand.vmem [shape: f32[64,32], index: 6, kind: input, shape index: {}]   ;;  %s11905_s7 = inlined_call_operand.vmem [shape: f32[64,32], index: 7, kind: input, shape index: {}]   ;;  %s11906_s8 = inlined_call_operand.vmem [shape: f32[64,1], index: 8, kind: input, shape index: {}]   ;;  %s11907_s9 = inlined_call_operand.hbm [shape: f32[64,1024], index: 9, kind: output, shape index: {}]  }
   0x1   :  { %11924 = sst [smem:[#allocation22_spill]] %s11898_s0 }
   0x2   :  { %14 = vsyncpa [#allocation4], 0 }
   0x3   :  { %16 = vsyncpa [#allocation4 + $0x1], 0 }
   0x4   :  { %17 = vsyncpa [#allocation5], 0 }
   0x5   :  { %19 = vsyncpa [#allocation5 + $0x1], 0  ;;  %s9616_s30 = smov 0   ;;  %s9618_s10 = smov 0  }
   0x6   :  { %s9620_s11 = smov 0   ;;  %s9622_s12 = smov 0  }
   0x7 LB: > { %s9637_s13 = sadd.s32 4294967295, %s9554_s12   ;;  %s6660_s14 = sadd.s32 4294967294, %s9554_s12   ;;  %s9554_s12 = sphi %s9622_s12, %s11961_s12   ;;  %s9550_s11 = sphi %s9620_s11, %s11960_s11   ;;  %s9546_s10 = sphi %s9618_s10, %s11959_s10   ;;  %s9542_s30 = sphi %s9616_s30, %s11958_s30  }
   0x8   : > { %s9641_s15 = sadd.s32 1, %s9554_s12   ;;  %s32_s16 = sadd.s32 1, %s9550_s11 }
   0x9   : > { %s29_s17 = ssub.s32 %s9554_s12, %s9641_s15  ;;  %p39_p0 = scmp.ne.s32.totalorder %s9550_s11, %s9546_s10 }
   0xa   : > { %p30_p1 = scmp.eq.s32.totalorder %s29_s17, 0  ;;  %p40_p2 = scmp.eq.s32.totalorder %s9554_s12, 0 }
   0xb   : > { %p71_p3 = scmp.ne.s32.totalorder %s9546_s10, %s9542_s30  ;;  %p72_p4 = scmp.eq.s32.totalorder %s9637_s13, 0 }
   0xc   : > { %s9653_s18 = scalar_select %p30_p1, %s9550_s11, %s32_s16  }
   0xd   : > { %p9655_p5 = por %p40_p2, %p39_p0  ;;  %p9659_p6 = por %p72_p4, %p71_p3 }
   0xe   : > { %11925 = sst [smem:[#allocation9_spill]] %s9653_s18  ;;  %p242_p7 = scmp.eq.s32.totalorder %s9637_s13, 3 }
   0xf   : > { %p248_p8 = scmp.eq.s32.totalorder %s6660_s14, 3  ;;  %p6662_p11 = scmp.ge.s32.totalorder %s9554_s12, 4 }
  0x10   : > { %p9664_p9 = por %p242_p7, %p39_p0 }
  0x11   : > { %p9668_p10 = por %p248_p8, %p71_p3  ;;  %285 = sbr.rel (%p6662_p11) target bundleno = 62 (0x3e), region = 44 }
  0x12   : > { %s11928_s21 = scalar_select %p9664_p9, 1, 0 }
  0x13   : > { %s11929_s22 = scalar_select %p9668_p10, 1, 0 }
  0x16   : > { %288 = sbr.rel (!%p9655_p5) target bundleno = 36 (0x24), region = 48  ;;  %s290_s23 = sand.u32 (%p9655_p5), 1, %s9550_s11  }
  0x17   : > { %s7266_s24 = sshll.u32 (%p9655_p5), %s9554_s12, 4  ;;  %s6663_s25 = sshll.u32 (%p9655_p5), %s290_s23, 6 }
  0x18   : > { %s11930_s0 = sld [smem:[#allocation22_spill]] (%p9655_p5)  ;;  %s292_s29 = scalar_lea.vmem (%p9655_p5), [#allocation2], %s6663_s25 }
  0x1e   : > { %s295_s28 = scalar_lea.vmem %s11930_s0, %s7266_s24 }
  0x1f   : > { %v308_v0 = vld [vmem:[%s295_s28] sm:$0xff]  ;;  %v310_v1 = vld [vmem:[%s295_s28 + $0x8] sm:$0xff] }
  0x20   : > { %v312_v2 = vld [vmem:[%s295_s28 + $0x40] sm:$0xff]  ;;  %309 = vst [vmem:[%s292_s29] sm:$0xff] %v308_v0  ;;  %311 = vst [vmem:[%s292_s29 + $0x8] sm:$0xff] %v310_v1  ;;  %v314_v3 = vld [vmem:[%s295_s28 + $0x48] sm:$0xff] }
  0x21   : > { %313 = vst [vmem:[%s292_s29 + $0x10] sm:$0xff] %v312_v2  ;;  %v316_v4 = vld [vmem:[%s295_s28 + $0x80] sm:$0xff]  ;;  %v318_v5 = vld [vmem:[%s295_s28 + $0x88] sm:$0xff]  ;;  %315 = vst [vmem:[%s292_s29 + $0x18] sm:$0xff] %v314_v3 }
  0x22   : > { %317 = vst [vmem:[%s292_s29 + $0x20] sm:$0xff] %v316_v4  ;;  %319 = vst [vmem:[%s292_s29 + $0x28] sm:$0xff] %v318_v5  ;;  %v320_v6 = vld [vmem:[%s295_s28 + $0xc0] sm:$0xff]  ;;  %v322_v7 = vld [vmem:[%s295_s28 + $0xc8] sm:$0xff] }
  0x23   : > { %321 = vst [vmem:[%s292_s29 + $0x30] sm:$0xff] %v320_v6  ;;  %323 = vst [vmem:[%s292_s29 + $0x38] sm:$0xff] %v322_v7 }
  0x24 PF: > { %s330_s14 = sand.u32 1, %s9550_s11   ;;  %s7267_s16 = sshll.u32 %s9554_s12, 8 }
  0x25   : > { %s6666_s17 = sshll.u32 %s330_s14, 9  ;;  %s9685_s25 = scalar_lea.hbm %s11899_s1, %s7267_s16 }
  0x26   : > { %s334_s26 = scalar_lea.vmem [#allocation3], %s6666_s17  ;;  %s9689_s28 = scalar_lea.sflag [#allocation4], %s330_s14 }
  0x27   : > { %s341_s27 = sshll.u32 %s334_s26, 4  ;;  %s9464_s29 = scalar_lea.hbm %s9685_s25, 8192  ;;  %s9687_s27 = int_to_ptr.vmem [resolvable:$true] %s341_s27 }
  0x28   : > { %p9465_p12 = scmp.ne.s32.totalorder %s9685_s25, %s9464_s29  ;;  %s9468_s23 = scalar_lea.hbm %s11899_s1, 32768 }
  0x29   : > { %p9469_p1 = scmp.lt.s32.totalorder %s9685_s25, %s11899_s1  ;;  %p9470_p2 = scmp.lt.s32.totalorder %s9468_s23, %s9464_s29 }
  0x2a   : > { %p9466_p13 = pnand %p9465_p12, %p9655_p5 }
  0x2b   : > { %p9471_p3 = por %p9470_p2, %p9469_p1 }
  0x2c   : > { %p9467_p0 = pneg %p9466_p13 }
  0x2e   : > { %p9472_p4 = pnand %p9471_p3, %p9467_p0 }
  0x30   : > { %9475 = shalt.err (!%p9472_p4)
}
  0x31   : > { %s9476_s14 = scalar_lea.vmem %s9687_s27, 8192  ;;  %s9556_s17 = smov [#allocation3]  }
  0x32   : > { %p9477_p7 = scmp.ne.s32.totalorder %s9687_s27, %s9476_s14  ;;  %s9480_s0 = sshll.u32 %s9556_s17, 4  ;;  %s9481_s0 = int_to_ptr.vmem [resolvable:$false] %s9480_s0 }
  0x33   : > { %s9482_s18 = scalar_lea.vmem %s9481_s0, 16384  ;;  %p9483_p12 = scmp.lt.s32.totalorder %s9687_s27, %s9481_s0 }
  0x34   : > { %p9478_p8 = pnand %p9477_p7, %p9655_p5  ;;  %p9484_p13 = scmp.lt.s32.totalorder %s9482_s18, %s9476_s14 }
  0x36   : > { %p9479_p11 = pneg %p9478_p8  ;;  %p9485_p10 = por %p9484_p13, %p9483_p12 }
  0x38   : > { %p9486_p9 = pnand %p9485_p10, %p9479_p11 }
  0x3a   : > { %9489 = shalt.err (!%p9486_p9)
}
  0x3b   : > { %s9557_s26 = smov 1024   ;;  %s9558_s29 = smov 256  }
  0x3c   : > { %s9559_s23 = smov 16  }
  0x3d   : > { %8698 = dma.hbm_to_vmem [thread:$0]  (%p9655_p5), %s9685_s25, 8192, %s9687_s27, %s9689_s28, %s9557_s26, %s9558_s29, %s9559_s23  }
  0x3e PF: > { %p6669_p0 = scmp.ge.s32.totalorder %s9554_s12, 1  ;;  %p349_p1 = scmp.lt.s32.totalorder %s9554_s12, 5 }
  0x40   : > { %p350_p2 = pnand %p6669_p0, %p349_p1 }
  0x42   : > { %353 = sbr.rel (%p350_p2) target bundleno = 4534 (0x11b6), region = 75 }
  0x47   : > { %s9715_s16 = sand.u32 1, %s9546_s10  }
  0x48   : > { %s6670_s24 = sshll.u32 %s9715_s16, 6  ;;  %s6671_s14 = sshll.u32 %s9715_s16, 9 }
  0x49   : > { %s9719_s17 = scalar_lea.vmem [#allocation2], %s6670_s24  ;;  %s363_s19 = scalar_lea.sflag [#allocation4], %s9715_s16 }
  0x4a   : > { %s9722_s25 = scalar_lea.vmem [#allocation3], %s6671_s14 }
  0x4b   : > { %9533 = dma.done.wait (%p9659_p6), %s363_s19, 8192  }
  0x4c   : > { %9535 = vsyncadd (%p9659_p6), %s363_s19, 4294959104  ;;  %v9560_v8 = vmov 0.0   ;;  %v9561_v9 = vmov 0   ;;  %vm536_vm0 = vcmask 261120   ;;  %v475_v10 = vld [vmem:[%s9722_s25 + $0x30] sm:$0xff]  ;;  %v9732_v11 = vld [vmem:[%s11901_s3] sm:$0xff] }
  0x4d   : > { %7836 = vmatprep.subr.mxu1 %v9560_v8  ;;  %8747 = vset.pattern.permute.xlu0 %v9561_v9  ;;  %v9737_v12 = vld [vmem:[%s11901_s3 + $0x8] sm:$0xff]  ;;  %v474_v13 = vld [vmem:[%s9722_s25 + $0x20] sm:$0xff]  ;;  %v9745_v14 = vld [vmem:[%s11901_s3 + $0x10] sm:$0xff]  ;;  %s6672_s20 = sshll.u32 %s9715_s16, 7  ;;  %p11955_p6 = scmp.ne.s32.totalorder %s11928_s21, 0 }
  0x4e   : > { %7837 = vmatpush3.msra.mxu1 %v9560_v8  ;;  %8748 = vset.pattern.permute.xlu1 %v9561_v9  ;;  %v473_v15 = vld [vmem:[%s9722_s25 + $0x10] sm:$0xff]  ;;  %v9753_v16 = vld [vmem:[%s11900_s2] sm:$0xff]  ;;  %v9760_v17 = vld [vmem:[%s11901_s3 + $0x18] sm:$0xff]  ;;  %s11186_s18 = scalar_lea.vmem [#allocation6], %s6672_s20  ;;  %s9562_s23 = smov [#allocation6]  }
  0x4f   : > { %7810 = vmatprep.subr.mxu0 %v475_v10  ;;  %7838 = vmatprep.mubr.msk.f32.mxu1 %vm536_vm0, %v9732_v11  ;;  %v472_v18 = vld [vmem:[%s9722_s25] sm:$0xff]  ;;  %v9775_v20 = vld [vmem:[%s11900_s2 + $0x8] sm:$0xff]  ;;  %v6708_v21 = vld [vmem:[%s9722_s25 + $0x70] sm:$0xff]  ;;  %s6569_s0 = sshll.u32 %s11186_s18, 4  ;;  %s9494_s24 = sshll.u32 %s9562_s23, 4  ;;  %s11854_s0 = int_to_ptr.vmem [resolvable:$true] %s6569_s0  ;;  %s9495_s24 = int_to_ptr.vmem [resolvable:$false] %s9494_s24 }
  0x50   : > { %7811 = vmatpush3.msra.mxu0 %v475_v10  ;;  %7839 = vmatmul.mubr.msk.f32.vlgmr.msra.gmra.mxu1 %vm536_vm0, %v9737_v12  ;;  %v9768_v19 = vld [vmem:[%s11901_s3 + $0x20] sm:$0xff]  ;;  %v9783_v22 = vld [vmem:[%s11901_s3 + $0x28] sm:$0xff]  ;;  %v9788_v23 = vld [vmem:[%s11900_s2 + $0x10] sm:$0xff]  ;;  %s9490_s29 = scalar_lea.vmem %s11854_s0, 2048  ;;  %s9496_s14 = scalar_lea.vmem %s9495_s24, 4096 }
  0x51   : > { %7812 = vmatprep.subr.mxu0 %v474_v13  ;;  %7841 = vmatprep.mubr.msk.f32.mxu1 %vm536_vm0, %v9745_v14  ;;  %v9793_v24 = vld [vmem:[%s11901_s3 + $0x30] sm:$0xff]  ;;  %v6707_v25 = vld [vmem:[%s9722_s25 + $0x60] sm:$0xff]  ;;  %v9805_v26 = vld [vmem:[%s11900_s2 + $0x18] sm:$0xff]  ;;  %p9491_p5 = scmp.ne.s32.totalorder %s11854_s0, %s9490_s29  ;;  %p9497_p3 = scmp.lt.s32.totalorder %s11854_s0, %s9495_s24 }
  0x52   : > { %7813 = vmatpush3.msra.mxu0 %v474_v13  ;;  %7818 = vmatprep.mubr.msk.f32.mxu0 %vm536_vm0, %v9753_v16  ;;  %v6706_v27 = vld [vmem:[%s9722_s25 + $0x50] sm:$0xff]  ;;  %v435_v28 = vld [vmem:[%s11902_s4 + $0x18] sm:$0xff]  ;;  %v9821_v30 = vld [vmem:[%s11900_s2 + $0x20] sm:$0xff]  ;;  %p9498_p4 = scmp.lt.s32.totalorder %s9496_s14, %s9490_s29 }
  0x53   : > { %7814 = vmatprep.subr.mxu0 %v473_v15  ;;  %7856 = vmatprep.subr.mxu1 %v6708_v21  ;;  %v9816_v29 = vld [vmem:[%s11901_s3 + $0x38] sm:$0xff]  ;;  %v9826_v31 = vld [vmem:[%s11901_s3 + $0x40] sm:$0xff]  ;;  %v434_v33 = vld [vmem:[%s11902_s4 + $0x10] sm:$0xff]  ;;  %p9492_p9 = pnand %p9491_p5, %p11955_p6 }
  0x54   : > { %7815 = vmatpush3.msra.mxu0 %v473_v15  ;;  %7842 = vmatmul.mubr.msk.f32.gmra.mxu1 %vm536_vm0, %v9760_v17  ;;  %v6705_v32 = vld [vmem:[%s9722_s25 + $0x40] sm:$0xff]  ;;  %v9841_v34 = vld [vmem:[%s11900_s2 + $0x28] sm:$0xff]  ;;  %v9853_v36 = vld [vmem:[%s11900_s2 + $0x30] sm:$0xff]  ;;  %p9499_p7 = por %p9498_p4, %p9497_p3 }
  0x55   : > { %7816 = vmatprep.subr.mxu0 %v472_v18  ;;  %7844 = vmatprep.mubr.msk.f32.mxu1 %vm536_vm0, %v9768_v19  ;;  %v9848_v35 = vld [vmem:[%s11901_s3 + $0x48] sm:$0xff]  ;;  %v9858_v37 = vld [vmem:[%s11901_s3 + $0x50] sm:$0xff]  ;;  %v439_v40 = vld [vmem:[%s11902_s4 + $0x38] sm:$0xff]  ;;  %p9493_p10 = pneg %p9492_p9 }
  0x56   : > { %7817 = vmatpush3.msra.mxu0 %v472_v18  ;;  %7857 = vmatpush3.msra.mxu1 %v6708_v21  ;;  %v433_v38 = vld [vmem:[%s11902_s4 + $0x8] sm:$0xff]  ;;  %v6744_v39 = vld [vmem:[%s9722_s25 + $0xb0] sm:$0xff]  ;;  %v9876_v41 = vld [vmem:[%s11900_s2 + $0x38] sm:$0xff] }
  0x57   : > { %7819 = vmatmul.mubr.msk.f32.vlgmr.msra.gmra.mxu0 %vm536_vm0, %v9775_v20  ;;  %7858 = vmatprep.subr.mxu1 %v6707_v25  ;;  %v9883_v42 = vld [vmem:[%s11901_s3 + $0x58] sm:$0xff]  ;;  %v9888_v43 = vld [vmem:[%s11900_s2 + $0x40] sm:$0xff]  ;;  %v437_v45 = vld [vmem:[%s11902_s4 + $0x28] sm:$0xff]  ;;  %p9500_p8 = pnand %p9499_p7, %p9493_p10 }
  0x58   : > { %7845 = vmatmul.mubr.msk.f32.gmra.mxu1 %vm536_vm0, %v9783_v22  ;;  %7821 = vmatprep.mubr.msk.f32.mxu0 %vm536_vm0, %v9788_v23  ;;  %v432_v44 = vld [vmem:[%s11902_s4] sm:$0xff]  ;;  %v9905_v46 = vld [vmem:[%s11900_s2 + $0x48] sm:$0xff]  ;;  %v9912_v47 = vld [vmem:[%s11900_s2 + $0x50] sm:$0xff] }
  0x59   : > { %7847 = vmatprep.mubr.msk.f32.mxu1 %vm536_vm0, %v9793_v24  ;;  %7859 = vmatpush3.msra.mxu1 %v6707_v25  ;;  %v6743_v48 = vld [vmem:[%s9722_s25 + $0xa0] sm:$0xff]  ;;  %v438_v49 = vld [vmem:[%s11902_s4 + $0x30] sm:$0xff]  ;;  %v9927_v50 = vld [vmem:[%s11900_s2 + $0x58] sm:$0xff] }
  0x5a   : > { %493 = vperm.xlu0 %8747, %v435_v28   ;;  %7860 = vmatprep.subr.mxu1 %v6706_v27  ;;  %v6742_v51 = vld [vmem:[%s9722_s25 + $0x90] sm:$0xff]  ;;  %v6741_v52 = vld [vmem:[%s9722_s25 + $0x80] sm:$0xff]  ;;  %v447_v53 = vld [vmem:[%s11903_s5 + $0x18] sm:$0xff] }
  0x5b   : > { %7822 = vmatmul.mubr.msk.f32.gmra.mxu0 %vm536_vm0, %v9805_v26  ;;  %7861 = vmatpush3.msra.mxu1 %v6706_v27  ;;  %v436_v54 = vld [vmem:[%s11902_s4 + $0x20] sm:$0xff]  ;;  %v6780_v55 = vld [vmem:[%s9722_s25 + $0xf0] sm:$0xff]  ;;  %v443_v57 = vld [vmem:[%s11902_s4 + $0x58] sm:$0xff] }
  0x5c   : > { %7848 = vmatmul.mubr.msk.f32.gmra.mxu1 %vm536_vm0, %v9816_v29  ;;  %7824 = vmatprep.mubr.msk.f32.mxu0 %vm536_vm0, %v9821_v30  ;;  %v446_v56 = vld [vmem:[%s11903_s5 + $0x10] sm:$0xff]  ;;  %v445_v58 = vld [vmem:[%s11903_s5 + $0x8] sm:$0xff]  ;;  %v444_v60 = vld [vmem:[%s11903_s5] sm:$0xff] }
  0x5d   : > { %7850 = vmatprep.mubr.msk.f32.mxu1 %vm536_vm0, %v9826_v31  ;;  %7862 = vmatprep.subr.mxu1 %v6705_v32  ;;  %v442_v59 = vld [vmem:[%s11902_s4 + $0x50] sm:$0xff]  ;;  %v441_v61 = vld [vmem:[%s11902_s4 + $0x48] sm:$0xff]  ;;  %v464_v62 = vld [vmem:[%s11906_s8] sm:$0xff] }
  0x5e   : > { %488 = vperm.xlu0 %8747, %v434_v33   ;;  %7863 = vmatpush3.msra.mxu1 %v6705_v32  ;;  %v440_v63 = vld [vmem:[%s11902_s4 + $0x40] sm:$0xff]  ;;  %v466_v1 = vld [vmem:[%s11906_s8 + $0x10] sm:$0xff]  ;;  %v465_v2 = vld [vmem:[%s11906_s8 + $0x8] sm:$0xff] }
  0x5f   : > { %7825 = vmatmul.mubr.msk.f32.gmra.mxu0 %vm536_vm0, %v9841_v34  ;;  %483 = vperm.xlu1 %8748, %v433_v38   ;;  %v6779_v0 = vld [vmem:[%s9722_s25 + $0xe0] sm:$0xff]  ;;  %v6778_v3 = vld [vmem:[%s9722_s25 + $0xd0] sm:$0xff]  ;;  %v467_v6 = vld [vmem:[%s11906_s8 + $0x18] sm:$0xff] }
  0x60   : > { %7851 = vmatmul.mubr.msk.f32.gmra.mxu1 %vm536_vm0, %v9848_v35  ;;  %7827 = vmatprep.mubr.msk.f32.mxu0 %vm536_vm0, %v9853_v36  ;;  %v6777_v4 = vld [vmem:[%s9722_s25 + $0xc0] sm:$0xff]  ;;  %v6816_v7 = vld [vmem:[%s9722_s25 + $0x130] sm:$0xff]  ;;  %v469_v9 = vld [vmem:[%s11906_s8 + $0x28] sm:$0xff] }
  0x61   : > { %7853 = vmatprep.mubr.msk.f32.mxu1 %vm536_vm0, %v9858_v37  ;;  %7908 = vmatprep.subr.mxu1 %v6744_v39  ;;  %v468_v5 = vld [vmem:[%s11906_s8 + $0x20] sm:$0xff]  ;;  %v470_v8 = vld [vmem:[%s11906_s8 + $0x30] sm:$0xff]  ;;  %v471_v10 = vld [vmem:[%s11906_s8 + $0x38] sm:$0xff] }
  0x62   : > { %513 = vperm.xlu0 %8747, %v439_v40   ;;  %v6815_v13 = vld [vmem:[%s9722_s25 + $0x120] sm:$0xff]  ;;  %v6814_v15 = vld [vmem:[%s9722_s25 + $0x110] sm:$0xff] }
  0x63   : > { %7828 = vmatmul.mubr.msk.f32.gmra.mxu0 %vm536_vm0, %v9876_v41  ;;  %478 = vperm.xlu1 %8748, %v432_v44   ;;  %v6813_v18 = vld [vmem:[%s9722_s25 + $0x100] sm:$0xff]  ;;  %v6852_v21 = vld [vmem:[%s9722_s25 + $0x170] sm:$0xff] }
  0x64   : > { %7854 = vmatmul.mubr.msk.f32.gmra.mxu1 %vm536_vm0, %v9883_v42  ;;  %7830 = vmatprep.mubr.msk.f32.mxu0 %vm536_vm0, %v9888_v43  ;;  %v6851_v25 = vld [vmem:[%s9722_s25 + $0x160] sm:$0xff]  ;;  %v6850_v27 = vld [vmem:[%s9722_s25 + $0x150] sm:$0xff] }
  0x65   : > { %7864 = vmatprep.mubr.msk.f32.mxu1 %vm536_vm0, %v9753_v16  ;;  %v6849_v28 = vld [vmem:[%s9722_s25 + $0x140] sm:$0xff]  ;;  %v6888_v32 = vld [vmem:[%s9722_s25 + $0x1b0] sm:$0xff] }
  0x66   : > { %503 = vperm.xlu0 %8747, %v437_v45   ;;  %v6887_v33 = vld [vmem:[%s9722_s25 + $0x1a0] sm:$0xff]  ;;  %v6886_v38 = vld [vmem:[%s9722_s25 + $0x190] sm:$0xff] }
  0x67   : > { %7831 = vmatmul.mubr.msk.f32.gmra.mxu0 %vm536_vm0, %v9905_v46  ;;  %508 = vperm.xlu1 %8748, %v438_v49   ;;  %v6924_v40 = vld [vmem:[%s9722_s25 + $0x1f0] sm:$0xff]  ;;  %v6923_v44 = vld [vmem:[%s9722_s25 + $0x1e0] sm:$0xff] }
  0x68   : > { %7865 = vmatmul.mubr.msk.f32.vlgmr.msra.gmra.mxu1 %vm536_vm0, %v9775_v20  ;;  %7833 = vmatprep.mubr.msk.f32.mxu0 %vm536_vm0, %v9912_v47  ;;  %v6922_v45 = vld [vmem:[%s9722_s25 + $0x1d0] sm:$0xff] }
  0x69   : > { %7867 = vmatprep.mubr.msk.f32.mxu1 %vm536_vm0, %v9788_v23  ;;  %7909 = vmatpush3.msra.mxu1 %v6744_v39  ;;  %v6885_v39 = vld [vmem:[%s9722_s25 + $0x180] sm:$0xff] }
  0x6a   : > { %7910 = vmatprep.subr.mxu1 %v6743_v48  ;;  %932 = vperm.xlu0 %8747, %v447_v53  }
  0x6b   : > { %7834 = vmatmul.mubr.msk.f32.gmra.mxu0 %vm536_vm0, %v9927_v50  ;;  %7911 = vmatpush3.msra.mxu1 %v6743_v48  ;;  %v6921_v48 = vld [vmem:[%s9722_s25 + $0x1c0] sm:$0xff] }
  0x6c   : > { %7868 = vmatmul.mubr.msk.f32.gmra.mxu1 %vm536_vm0, %v9805_v26  ;;  %7912 = vmatprep.subr.mxu1 %v6742_v51 }
  0x6d   : > { %7870 = vmatprep.mubr.msk.f32.mxu1 %vm536_vm0, %v9821_v30  ;;  %7913 = vmatpush3.msra.mxu1 %v6742_v51 }
  0x6e   : > { %7914 = vmatprep.subr.mxu1 %v6741_v52  ;;  %498 = vperm.xlu1 %8748, %v436_v54  }
  0x6f   : > { %7915 = vmatpush3.msra.mxu1 %v6741_v52  ;;  %7890 = vmatprep.mubr.msk.f32.mxu0 %vm536_vm0, %v9732_v11 }
  0x70   : > { %7871 = vmatmul.mubr.msk.f32.gmra.mxu1 %vm536_vm0, %v9841_v34  ;;  %7960 = vmatprep.subr.mxu1 %v6780_v55 }
  0x71   : > { %7873 = vmatprep.mubr.msk.f32.mxu1 %vm536_vm0, %v9853_v36  ;;  %927 = vperm.xlu0 %8747, %v446_v56  }
  0x72   : > { %533 = vperm.xlu1 %8748, %v443_v57  }
  0x74   : > { %7874 = vmatmul.mubr.msk.f32.gmra.mxu1 %vm536_vm0, %v9876_v41 }
  0x75   : > { %7876 = vmatprep.mubr.msk.f32.mxu1 %vm536_vm0, %v9888_v43  ;;  %922 = vperm.xlu0 %8747, %v445_v58  }
  0x76   : > { %528 = vperm.xlu1 %8748, %v442_v59  }
  0x78   : > { %7877 = vmatmul.mubr.msk.f32.gmra.mxu1 %vm536_vm0, %v9905_v46 }
  0x79   : > { %7879 = vmatprep.mubr.msk.f32.mxu1 %vm536_vm0, %v9912_v47  ;;  %917 = vperm.xlu0 %8747, %v444_v60  }
  0x7a   : > { %523 = vperm.xlu1 %8748, %v441_v61  }
  0x7c   : > { %7880 = vmatmul.mubr.msk.f32.gmra.mxu1 %vm536_vm0, %v9927_v50 }
  0x7d   : > { %7916 = vmatprep.mubr.msk.f32.mxu1 %vm536_vm0, %v9753_v16  ;;  %3640 = vperm.xlu0 %8747, %v464_v62  }
  0x7e   : > { %518 = vperm.xlu1 %8748, %v440_v63  }
  0x80   : > { %7917 = vmatmul.mubr.msk.f32.vlgmr.msra.gmra.mxu1 %vm536_vm0, %v9775_v20 }
  0x81   : > { %7919 = vmatprep.mubr.msk.f32.mxu1 %vm536_vm0, %v9788_v23  ;;  %7961 = vmatpush3.msra.mxu1 %v6780_v55 }
  0x82   : > { %7962 = vmatprep.subr.mxu1 %v6779_v0  ;;  %3650 = vperm.xlu0 %8747, %v466_v1  }
  0x83   : > { %7963 = vmatpush3.msra.mxu1 %v6779_v0  ;;  %3645 = vperm.xlu1 %8748, %v465_v2  }
  0x84   : > { %7920 = vmatmul.mubr.msk.f32.gmra.mxu1 %vm536_vm0, %v9805_v26  ;;  %7964 = vmatprep.subr.mxu1 %v6778_v3 }
  0x85   : > { %7922 = vmatprep.mubr.msk.f32.mxu1 %vm536_vm0, %v9821_v30  ;;  %7965 = vmatpush3.msra.mxu1 %v6778_v3 }
  0x86   : > { %7966 = vmatprep.subr.mxu1 %v6777_v4  ;;  %3660 = vperm.xlu0 %8747, %v468_v5  }
  0x87   : > { %7967 = vmatpush3.msra.mxu1 %v6777_v4  ;;  %3655 = vperm.xlu1 %8748, %v467_v6  }
  0x88   : > { %7923 = vmatmul.mubr.msk.f32.gmra.mxu1 %vm536_vm0, %v9841_v34  ;;  %8012 = vmatprep.subr.mxu1 %v6816_v7 }
  0x89   : > { %7925 = vmatprep.mubr.msk.f32.mxu1 %vm536_vm0, %v9853_v36 }
  0x8a   : > { %3670 = vperm.xlu0 %8747, %v470_v8  }
  0x8b   : > { %3665 = vperm.xlu1 %8748, %v469_v9  }
  0x8c   : > { %7926 = vmatmul.mubr.msk.f32.gmra.mxu1 %vm536_vm0, %v9876_v41 }
  0x8d   : > { %7928 = vmatprep.mubr.msk.f32.mxu1 %vm536_vm0, %v9888_v43 }
  0x8f   : > { %3675 = vperm.xlu1 %8748, %v471_v10  }
  0x90   : > { %7929 = vmatmul.mubr.msk.f32.gmra.mxu1 %vm536_vm0, %v9905_v46 }
  0x91   : > { %7931 = vmatprep.mubr.msk.f32.mxu1 %vm536_vm0, %v9912_v47 }
  0x94   : > { %7932 = vmatmul.mubr.msk.f32.gmra.mxu1 %vm536_vm0, %v9927_v50 }
  0x95   : > { %7968 = vmatprep.mubr.msk.f32.mxu1 %vm536_vm0, %v9753_v16 }
  0x98   : > { %7969 = vmatmul.mubr.msk.f32.vlgmr.msra.gmra.mxu1 %vm536_vm0, %v9775_v20 }
  0x99   : > { %7971 = vmatprep.mubr.msk.f32.mxu1 %vm536_vm0, %v9788_v23  ;;  %8013 = vmatpush3.msra.mxu1 %v6816_v7 }
  0x9a   : > { %8014 = vmatprep.subr.mxu1 %v6815_v13 }
  0x9b   : > { %8015 = vmatpush3.msra.mxu1 %v6815_v13 }
  0x9c   : > { %7972 = vmatmul.mubr.msk.f32.gmra.mxu1 %vm536_vm0, %v9805_v26  ;;  %8016 = vmatprep.subr.mxu1 %v6814_v15 }
  0x9d   : > { %7974 = vmatprep.mubr.msk.f32.mxu1 %vm536_vm0, %v9821_v30  ;;  %8017 = vmatpush3.msra.mxu1 %v6814_v15 }
  0x9e   : > { %8018 = vmatprep.subr.mxu1 %v6813_v18 }
  0x9f   : > { %8019 = vmatpush3.msra.mxu1 %v6813_v18 }
  0xa0   : > { %7975 = vmatmul.mubr.msk.f32.gmra.mxu1 %vm536_vm0, %v9841_v34  ;;  %8064 = vmatprep.subr.mxu1 %v6852_v21 }
  0xa1   : > { %7977 = vmatprep.mubr.msk.f32.mxu1 %vm536_vm0, %v9853_v36 }
  0xa4   : > { %7978 = vmatmul.mubr.msk.f32.gmra.mxu1 %vm536_vm0, %v9876_v41 }
  0xa5   : > { %7980 = vmatprep.mubr.msk.f32.mxu1 %vm536_vm0, %v9888_v43 }
  0xa8   : > { %7981 = vmatmul.mubr.msk.f32.gmra.mxu1 %vm536_vm0, %v9905_v46 }
  0xa9   : > { %7983 = vmatprep.mubr.msk.f32.mxu1 %vm536_vm0, %v9912_v47 }
  0xac   : > { %7984 = vmatmul.mubr.msk.f32.gmra.mxu1 %vm536_vm0, %v9927_v50 }
  0xad   : > { %8020 = vmatprep.mubr.msk.f32.mxu1 %vm536_vm0, %v9753_v16 }
  0xb0   : > { %8021 = vmatmul.mubr.msk.f32.vlgmr.msra.gmra.mxu1 %vm536_vm0, %v9775_v20 }
  0xb1   : > { %8023 = vmatprep.mubr.msk.f32.mxu1 %vm536_vm0, %v9788_v23  ;;  %8065 = vmatpush3.msra.mxu1 %v6852_v21 }
  0xb2   : > { %8066 = vmatprep.subr.mxu1 %v6851_v25 }
  0xb3   : > { %8067 = vmatpush3.msra.mxu1 %v6851_v25 }
  0xb4   : > { %8024 = vmatmul.mubr.msk.f32.gmra.mxu1 %vm536_vm0, %v9805_v26  ;;  %8068 = vmatprep.subr.mxu1 %v6850_v27 }
  0xb5   : > { %8026 = vmatprep.mubr.msk.f32.mxu1 %vm536_vm0, %v9821_v30  ;;  %8069 = vmatpush3.msra.mxu1 %v6850_v27 }
  0xb6   : > { %8070 = vmatprep.subr.mxu1 %v6849_v28 }
  0xb7   : > { %8071 = vmatpush3.msra.mxu1 %v6849_v28 }
  0xb8   : > { %8027 = vmatmul.mubr.msk.f32.gmra.mxu1 %vm536_vm0, %v9841_v34  ;;  %8116 = vmatprep.subr.mxu1 %v6888_v32 }
  0xb9   : > { %8029 = vmatprep.mubr.msk.f32.mxu1 %vm536_vm0, %v9853_v36 }
  0xbc   : > { %8030 = vmatmul.mubr.msk.f32.gmra.mxu1 %vm536_vm0, %v9876_v41 }
  0xbd   : > { %8032 = vmatprep.mubr.msk.f32.mxu1 %vm536_vm0, %v9888_v43 }
  0xc0   : > { %8033 = vmatmul.mubr.msk.f32.gmra.mxu1 %vm536_vm0, %v9905_v46 }
  0xc1   : > { %8035 = vmatprep.mubr.msk.f32.mxu1 %vm536_vm0, %v9912_v47 }
  0xc4   : > { %8036 = vmatmul.mubr.msk.f32.gmra.mxu1 %vm536_vm0, %v9927_v50 }
  0xc5   : > { %8072 = vmatprep.mubr.msk.f32.mxu1 %vm536_vm0, %v9753_v16 }
  0xc8   : > { %8073 = vmatmul.mubr.msk.f32.vlgmr.msra.gmra.mxu1 %vm536_vm0, %v9775_v20 }
  0xc9   : > { %8075 = vmatprep.mubr.msk.f32.mxu1 %vm536_vm0, %v9788_v23  ;;  %8117 = vmatpush3.msra.mxu1 %v6888_v32 }
  0xca   : > { %8118 = vmatprep.subr.mxu1 %v6887_v33 }
  0xcb   : > { %8119 = vmatpush3.msra.mxu1 %v6887_v33 }
  0xcc   : > { %8076 = vmatmul.mubr.msk.f32.gmra.mxu1 %vm536_vm0, %v9805_v26  ;;  %8120 = vmatprep.subr.mxu1 %v6886_v38 }
  0xcd   : > { %8078 = vmatprep.mubr.msk.f32.mxu1 %vm536_vm0, %v9821_v30  ;;  %8121 = vmatpush3.msra.mxu1 %v6886_v38 }
  0xce   : > { %8122 = vmatprep.subr.mxu1 %v6885_v39 }
  0xcf   : > { %8123 = vmatpush3.msra.mxu1 %v6885_v39 }
  0xd0   : > { %8079 = vmatmul.mubr.msk.f32.gmra.mxu1 %vm536_vm0, %v9841_v34  ;;  %8168 = vmatprep.subr.mxu1 %v6924_v40 }
  0xd1   : > { %8081 = vmatprep.mubr.msk.f32.mxu1 %vm536_vm0, %v9853_v36 }
  0xd4   : > { %8082 = vmatmul.mubr.msk.f32.gmra.mxu1 %vm536_vm0, %v9876_v41 }
  0xd5   : > { %8084 = vmatprep.mubr.msk.f32.mxu1 %vm536_vm0, %v9888_v43 }
  0xd8   : > { %8085 = vmatmul.mubr.msk.f32.gmra.mxu1 %vm536_vm0, %v9905_v46 }
  0xd9   : > { %8087 = vmatprep.mubr.msk.f32.mxu1 %vm536_vm0, %v9912_v47 }
  0xdc   : > { %8088 = vmatmul.mubr.msk.f32.gmra.mxu1 %vm536_vm0, %v9927_v50 }
  0xdd   : > { %8124 = vmatprep.mubr.msk.f32.mxu1 %vm536_vm0, %v9753_v16 }
  0xe0   : > { %8125 = vmatmul.mubr.msk.f32.vlgmr.msra.gmra.mxu1 %vm536_vm0, %v9775_v20 }
  0xe1   : > { %8127 = vmatprep.mubr.msk.f32.mxu1 %vm536_vm0, %v9788_v23  ;;  %8169 = vmatpush3.msra.mxu1 %v6924_v40 }
  0xe2   : > { %8170 = vmatprep.subr.mxu1 %v6923_v44 }
  0xe3   : > { %8171 = vmatpush3.msra.mxu1 %v6923_v44 }
  0xe4   : > { %8128 = vmatmul.mubr.msk.f32.gmra.mxu1 %vm536_vm0, %v9805_v26  ;;  %8172 = vmatprep.subr.mxu1 %v6922_v45 }
  0xe5   : > { %8130 = vmatprep.mubr.msk.f32.mxu1 %vm536_vm0, %v9821_v30  ;;  %8173 = vmatpush3.msra.mxu1 %v6922_v45 }
  0xe6   : > { %8174 = vmatprep.subr.mxu1 %v6921_v48 }
  0xe7   : > { %8175 = vmatpush3.msra.mxu1 %v6921_v48 }
  0xe8   : > { %8131 = vmatmul.mubr.msk.f32.gmra.mxu1 %vm536_vm0, %v9841_v34 }
  0xe9   : > { %8133 = vmatprep.mubr.msk.f32.mxu1 %vm536_vm0, %v9853_v36 }
  0xec   : > { %8134 = vmatmul.mubr.msk.f32.gmra.mxu1 %vm536_vm0, %v9876_v41 }
  0xed   : > { %8136 = vmatprep.mubr.msk.f32.mxu1 %vm536_vm0, %v9888_v43 }
  0xf0   : > { %8137 = vmatmul.mubr.msk.f32.gmra.mxu1 %vm536_vm0, %v9905_v46 }
  0xf1   : > { %8139 = vmatprep.mubr.msk.f32.mxu1 %vm536_vm0, %v9912_v47 }
  0xf4   : > { %8140 = vmatmul.mubr.msk.f32.gmra.mxu1 %vm536_vm0, %v9927_v50 }
  0xf5   : > { %8176 = vmatprep.mubr.msk.f32.mxu1 %vm536_vm0, %v9753_v16  ;;  %v10168_v16 = vpop.permute.xlu0 %493 }
  0xf8   : > { %8177 = vmatmul.mubr.msk.f32.vlgmr.msra.gmra.mxu1 %vm536_vm0, %v9775_v20  ;;  %v10172_v20 = vpop.permute.xlu1 %483 }
  0xf9   : > { %8179 = vmatprep.mubr.msk.f32.mxu1 %vm536_vm0, %v9788_v23 }
  0xfc   : > { %8180 = vmatmul.mubr.msk.f32.gmra.mxu1 %vm536_vm0, %v9805_v26  ;;  %v10176_v26 = vpop.permute.xlu0 %488 }
  0xfd   : > { %8182 = vmatprep.mubr.msk.f32.mxu1 %vm536_vm0, %v9821_v30 }
 0x100   : > { %8183 = vmatmul.mubr.msk.f32.gmra.mxu1 %vm536_vm0, %v9841_v34  ;;  %v10180_v34 = vpop.permute.xlu1 %478 }
 0x101   : > { %8185 = vmatprep.mubr.msk.f32.mxu1 %vm536_vm0, %v9853_v36 }
 0x104   : > { %8186 = vmatmul.mubr.msk.f32.gmra.mxu1 %vm536_vm0, %v9876_v41 }
 0x105   : > { %8188 = vmatprep.mubr.msk.f32.mxu1 %vm536_vm0, %v9888_v43 }
 0x108   : > { %8189 = vmatmul.mubr.msk.f32.gmra.mxu1 %vm536_vm0, %v9905_v46  ;;  %v10186_v46 = vpop.permute.xlu0 %513 }
 0x109   : > { %8191 = vmatprep.mubr.msk.f32.mxu1 %vm536_vm0, %v9912_v47  ;;  %11931 = vst [vmem:[#allocation10_spill] sm:$0xff] %v10186_v46 }
 0x10c   : > { %8192 = vmatmul.mubr.msk.f32.gmra.mxu1 %vm536_vm0, %v9927_v50  ;;  %v10189_v50 = vpop.permute.xlu1 %508  ;;  %v10197_v59 = vpop.permute.xlu0 %503 }
 0x10d   : > { %11932 = vst [vmem:[#allocation11_spill] sm:$0xff] %v10189_v50 }
 0x110   : > { %v10174_v23 = vpop.f32.mrf.mxu1  ;;  %v10205_v4 = vpop.permute.xlu1 %498 }
 0x111   : > { %v10218_v39 = vpop.permute.xlu0 %932 }
 0x112   : > { %v10178_v30 = vpop.f32.mrf.mxu1 }
 0x114   : > { %v10182_v36 = vpop.f32.mrf.mxu1  ;;  %v10220_v45 = vpop.permute.xlu1 %533 }
 0x116   : > { %v10184_v41 = vpop.f32.mrf.mxu1 }
 0x117   : > { %v7820_v43 = vpop.f32.mrf.mxu0 }
 0x118   : > { %v645_v47 = vadd.f32 %v7820_v43, %v10172_v20  ;;  %v10193_v53 = vpop.f32.mrf.mxu1 }
 0x119   : > { %v639_v49 = vpop.f32.mrf.mxu0 }
 0x11a   : > { %v860_v51 = vadd.f32 %v10174_v23, %v645_v47  ;;  %v640_v52 = vadd.f32 %v639_v49, %v10180_v34  ;;  %v10201_v63 = vpop.f32.mrf.mxu1 }
 0x11b   : > { %v7823_v54 = vpop.f32.mrf.mxu0  ;;  %11933 = vst [vmem:[#allocation12_spill] sm:$0xff] %v10201_v63 }
 0x11c   : > { %v6698_v55 = vmul.f32 -1.442695, %v860_v51  ;;  %v859_v56 = vadd.f32 %v10178_v30, %v640_v52  ;;  %v655_v57 = vadd.f32 %v7823_v54, %v10168_v16  ;;  %v10209_v9 = vpop.f32.mrf.mxu1  ;;  %v10222_v51 = vpop.permute.xlu0 %927 }
 0x11d   : > { %v649_v58 = vpop.f32.mrf.mxu0  ;;  %11934 = vst [vmem:[#allocation13_spill] sm:$0xff] %v10209_v9 }
 0x11e   : > { %8749 = vpow2.f32 %v6698_v55  ;;  %v6697_v60 = vmul.f32 -1.442695, %v859_v56  ;;  %v862_v61 = vadd.f32 %v10182_v36, %v655_v57  ;;  %v650_v62 = vadd.f32 %v649_v58, %v10176_v26  ;;  %v10215_v28 = vpop.f32.mrf.mxu1  ;;  %v10224_v56 = vpop.permute.xlu1 %528 }
 0x11f   : > { %v7826_v0 = vpop.f32.mrf.mxu0  ;;  %11935 = vst [vmem:[#allocation14_spill] sm:$0xff] %v10215_v28 }
 0x120   : > { %8751 = vpow2.f32 %v6697_v60  ;;  %v6700_v1 = vmul.f32 -1.442695, %v862_v61  ;;  %v861_v2 = vadd.f32 %v10184_v41, %v650_v62  ;;  %v665_v3 = vadd.f32 %v7826_v0, %v10197_v59  ;;  %v7852_v55 = vpop.f32.mrf.mxu1  ;;  %v10226_v60 = vpop.permute.xlu0 %922 }
 0x121   : > { %v659_v5 = vpop.f32.mrf.mxu0  ;;  %11936 = vst [vmem:[#allocation15_spill] sm:$0xff] %v10226_v60 }
 0x122   : > { %8753 = vpow2.f32 %v6700_v1  ;;  %v6699_v6 = vmul.f32 -1.442695, %v861_v2  ;;  %v864_v7 = vadd.f32 %v10193_v53, %v665_v3  ;;  %v660_v8 = vadd.f32 %v659_v5, %v10205_v4  ;;  %v840_v61 = vpop.f32.mrf.mxu1  ;;  %v10228_v2 = vpop.permute.xlu1 %523 }
 0x123   : > { %v7829_v10 = vpop.f32.mrf.mxu0 }
 0x124   : > { %8755 = vpow2.f32 %v6699_v6  ;;  %v863_v13 = vadd.f32 %v10201_v63, %v660_v8  ;;  %v675_v15 = vadd.f32 %v7829_v10, %v10186_v46  ;;  %v6702_v21 = vmul.f32 -1.442695, %v864_v7  ;;  %v7855_v5 = vpop.f32.mrf.mxu1  ;;  %v10233_v10 = vpop.permute.xlu0 %917 }
 0x125   : > { %v669_v18 = vpop.f32.mrf.mxu0  ;;  %v10231_v7 = vadd.f32 %v7852_v55, %v10226_v60 }
 0x126   : > { %v866_v25 = vadd.f32 %v10209_v9, %v675_v15  ;;  %v670_v27 = vadd.f32 %v669_v18, %v10189_v50  ;;  %v6701_v32 = vmul.f32 -1.442695, %v863_v13  ;;  %8757 = vpow2.f32 %v6702_v21 }
 0x127   : > { %v7832_v58 = vpop.f32.mrf.mxu0  ;;  %11937 = vst [vmem:[#allocation16_spill] sm:$0xff] %v10231_v7  ;;  %v10237_v21 = vadd.f32 %v10233_v10, %v840_v61 }
 0x128   : > { %v6704_v33 = vmul.f32 -1.442695, %v866_v25  ;;  %v865_v38 = vadd.f32 %v10215_v28, %v670_v27  ;;  %8759 = vpow2.f32 %v6701_v32 }
 0x129   : > { %v679_v0 = vpop.f32.mrf.mxu0  ;;  %11938 = vst [vmem:[#allocation17_spill] sm:$0xff] %v10237_v21 }
 0x12a   : > { %v6703_v40 = vmul.f32 -1.442695, %v865_v38  ;;  %8761 = vpow2.f32 %v6704_v33  ;;  %v850_v33 = vpop.f32.mrf.mxu1  ;;  %v685_v38 = vadd.f32 %v7832_v58, %v10228_v2 }
 0x12b   : > { %v8750_v44 = vpop.eup %8749  ;;  %v7835_v15 = vpop.f32.mrf.mxu0 }
 0x12c   : > { %v892_v48 = vadd.f32 1.0, %v8750_v44  ;;  %8763 = vpow2.f32 %v6703_v40  ;;  %v10240_v40 = vpop.permute.xlu1 %518  ;;  %v695_v58 = vadd.f32 %v7835_v15, %v10220_v45 }
 0x12d   : > { %v8752_v43 = vpop.eup %8751 }
 0x12e   : > { %8765 = vrcp.f32 %v892_v48  ;;  %v891_v47 = vadd.f32 1.0, %v8752_v43  ;;  %v10244_v48 = vadd.f32 %v7855_v5, %v10218_v39 }
 0x12f   : > { %v8754_v49 = vpop.eup %8753 }
 0x130   : > { %8767 = vrcp.f32 %v891_v47  ;;  %v894_v52 = vadd.f32 1.0, %v8754_v49  ;;  %11939 = vst [vmem:[#allocation18_spill] sm:$0xff] %v10244_v48 }
 0x131   : > { %v8756_v54 = vpop.eup %8755 }
 0x132   : > { %8769 = vrcp.f32 %v894_v52  ;;  %v893_v57 = vadd.f32 1.0, %v8756_v54  ;;  %v680_v52 = vadd.f32 %v679_v0, %v10240_v40  ;;  %v689_v54 = vpop.f32.mrf.mxu0 }
 0x133   : > { %v8758_v62 = vpop.eup %8757  ;;  %v690_v5 = vadd.f32 %v689_v54, %v10224_v56 }
 0x134   : > { %8771 = vrcp.f32 %v893_v57  ;;  %v896_v13 = vadd.f32 1.0, %v8758_v62  ;;  %v10249_v57 = vadd.f32 %v10222_v51, %v850_v33 }
 0x135   : > { %v8760_v1 = vpop.eup %8759 }
 0x136   : > { %v895_v32 = vadd.f32 1.0, %v8760_v1  ;;  %8773 = vrcp.f32 %v896_v13  ;;  %11940 = vst [vmem:[#allocation19_spill] sm:$0xff] %v10249_v57 }
 0x137   : > { %v8762_v3 = vpop.eup %8761 }
 0x138   : > { %v898_v25 = vadd.f32 1.0, %v8762_v3 }
 0x139   : > { %v8764_v6 = vpop.eup %8763 }
 0x13a   : > { %v897_v43 = vadd.f32 1.0, %v8764_v6  ;;  %8775 = vrcp.f32 %v898_v25 }
 0x13b   : > { %v8766_v8 = vpop.eup %8765  ;;  %8777 = vrcp.f32 %v895_v32 }
 0x13c   : > { %v940_v18 = vmul.f32 %v8766_v8, %v10231_v7  ;;  %8779 = vrcp.f32 %v897_v43 }
 0x13d   : > { %v8768_v27 = vpop.eup %8767 }
 0x13e   : > { %v939_v44 = vmul.f32 %v8768_v27, %v10237_v21  ;;  %v944_v49 = vadd.f32 %v940_v18, %v685_v38 }
 0x13f   : > { %v8770_v47 = vpop.eup %8769 }
 0x140   : > { %v942_v55 = vmul.f32 %v8770_v47, %v10244_v48  ;;  %v943_v62 = vadd.f32 %v939_v44, %v680_v52  ;;  %8781 = vtanh.f32 %v944_v49 }
 0x141   : > { %v8772_v61 = vpop.eup %8771 }
 0x142   : > { %v941_v1 = vmul.f32 %v8772_v61, %v10249_v57  ;;  %v946_v3 = vadd.f32 %v942_v55, %v695_v58 }
 0x143   : > { %v8774_v6 = vpop.eup %8773 }
 0x144   : > { %8783 = vtanh.f32 %v946_v3  ;;  %v945_v0 = vadd.f32 %v941_v1, %v690_v5  ;;  %v952_v43 = vsub.f32 1.0, %v8774_v6 }
 0x145   : > { %8785 = vtanh.f32 %v943_v62  ;;  %v960_v62 = vmul.f32 0.0, %v8774_v6 }
 0x146   : > { %8787 = vtanh.f32 %v945_v0 }
 0x147   : > { %v8776_v8 = vpop.eup %8775 }
 0x148   : > { %v8778_v13 = vpop.eup %8777  ;;  %v954_v15 = vsub.f32 1.0, %v8776_v8  ;;  %v962_v38 = vmul.f32 0.0, %v8776_v8 }
 0x149   : > { %v8780_v18 = vpop.eup %8779  ;;  %v951_v52 = vsub.f32 1.0, %v8778_v13  ;;  %v959_v5 = vmul.f32 0.0, %v8778_v13 }
 0x14a   : > { %v953_v44 = vsub.f32 1.0, %v8780_v18  ;;  %v961_v55 = vmul.f32 0.0, %v8780_v18 }
 0x14d   : > { %v8782_v25 = vpop.eup %8781 }
 0x14e   : > { %v956_v58 = vmul.f32 %v8782_v25, %v952_v43 }
 0x150   : > { %v10261_v3 = vadd.f32 %v960_v62, %v956_v58 }
 0x151   : > { %v8784_v27 = vpop.eup %8783 }
 0x152   : > { %v8786_v32 = vpop.eup %8785  ;;  %v958_v33 = vmul.f32 %v8784_v27, %v954_v15 }
 0x153   : > { %v8788_v47 = vpop.eup %8787  ;;  %v955_v1 = vmul.f32 %v8786_v32, %v951_v52 }
 0x154   : > { %v10254_v54 = vadd.f32 %v962_v38, %v958_v33  ;;  %v957_v49 = vmul.f32 %v8788_v47, %v953_v44 }
 0x155   : > { %v10265_v0 = vadd.f32 %v959_v5, %v955_v1 }
 0x156   : > { %7882 = vmatprep.subr.mxu0 %v10254_v54  ;;  %v10257_v61 = vadd.f32 %v961_v55, %v957_v49 }
 0x157   : > { %7883 = vmatpush3.msra.mxu0 %v10254_v54 }
 0x158   : > { %7884 = vmatprep.subr.mxu0 %v10257_v61 }
 0x159   : > { %7885 = vmatpush3.msra.mxu0 %v10257_v61 }
 0x15a   : > { %7886 = vmatprep.subr.mxu0 %v10261_v3 }
 0x15b   : > { %7887 = vmatpush3.msra.mxu0 %v10261_v3 }
 0x15c   : > { %7888 = vmatprep.subr.mxu0 %v10265_v0 }
 0x15d   : > { %7889 = vmatpush3.msra.mxu0 %v10265_v0 }
 0x15e   : > { %7891 = vmatmul.mubr.msk.f32.vlgmr.msra.gmra.mxu0 %vm536_vm0, %v9737_v12  ;;  %v7866_v12 = vpop.f32.mrf.mxu1 }
 0x15f   : > { %7893 = vmatprep.mubr.msk.f32.mxu0 %vm536_vm0, %v9745_v14 }
 0x160   : > { %v1038_v14 = vpop.f32.mrf.mxu1 }
 0x162   : > { %7894 = vmatmul.mubr.msk.f32.gmra.mxu0 %vm536_vm0, %v9760_v17  ;;  %v7869_v17 = vpop.f32.mrf.mxu1 }
 0x163   : > { %7896 = vmatprep.mubr.msk.f32.mxu0 %vm536_vm0, %v9768_v19 }
 0x164   : > { %v1048_v19 = vpop.f32.mrf.mxu1 }
 0x166   : > { %7897 = vmatmul.mubr.msk.f32.gmra.mxu0 %vm536_vm0, %v9783_v22  ;;  %v7872_v22 = vpop.f32.mrf.mxu1 }
 0x167   : > { %7899 = vmatprep.mubr.msk.f32.mxu0 %vm536_vm0, %v9793_v24  ;;  %v1044_v24 = vadd.f32 %v7866_v12, %v10172_v20  ;;  %v1064_v33 = vadd.f32 %v7872_v22, %v10197_v59 }
 0x168   : > { %v1058_v6 = vpop.f32.mrf.mxu1 }
 0x169   : > { %v1059_v47 = vadd.f32 %v1058_v6, %v10205_v4 }
 0x16a   : > { %7900 = vmatmul.mubr.msk.f32.gmra.mxu0 %vm536_vm0, %v9816_v29  ;;  %v7875_v27 = vpop.f32.mrf.mxu1 }
 0x16b   : > { %7902 = vmatprep.mubr.msk.f32.mxu0 %vm536_vm0, %v9826_v31  ;;  %v1039_v31 = vadd.f32 %v1038_v14, %v10180_v34  ;;  %v1074_v62 = vadd.f32 %v7875_v27, %v10186_v46 }
 0x16c   : > { %v1068_v55 = vpop.f32.mrf.mxu1 }
 0x16d   : > { %v1069_v12 = vadd.f32 %v1068_v55, %v10189_v50 }
 0x16e   : > { %7903 = vmatmul.mubr.msk.f32.gmra.mxu0 %vm536_vm0, %v9848_v35 }
 0x16f   : > { %7905 = vmatprep.mubr.msk.f32.mxu0 %vm536_vm0, %v9858_v37  ;;  %v1054_v37 = vadd.f32 %v7869_v17, %v10168_v16 }
 0x172   : > { %7906 = vmatmul.mubr.msk.f32.gmra.mxu0 %vm536_vm0, %v9883_v42 }
 0x173   : > { %7942 = vmatprep.mubr.msk.f32.mxu0 %vm536_vm0, %v9732_v11  ;;  %v1049_v11 = vadd.f32 %v1048_v19, %v10176_v26 }
 0x21e   : > { %v7892_v29 = vpop.f32.mrf.mxu0 }
 0x21f   : > { %v1223_v35 = vadd.f32 %v7892_v29, %v1044_v24 }
 0x220   : > { %v1163_v8 = vpop.f32.mrf.mxu0 }
 0x221   : > { %v6734_v13 = vmul.f32 -1.442695, %v1223_v35  ;;  %v1222_v42 = vadd.f32 %v1163_v8, %v1039_v31 }
 0x222   : > { %v7895_v18 = vpop.f32.mrf.mxu0 }
 0x223   : > { %8789 = vpow2.f32 %v6734_v13  ;;  %v6733_v25 = vmul.f32 -1.442695, %v1222_v42  ;;  %v1225_v15 = vadd.f32 %v7895_v18, %v1054_v37 }
 0x224   : > { %v1173_v32 = vpop.f32.mrf.mxu0 }
 0x225   : > { %8791 = vpow2.f32 %v6733_v25  ;;  %v6736_v38 = vmul.f32 -1.442695, %v1225_v15  ;;  %v1224_v44 = vadd.f32 %v1173_v32, %v1049_v11  ;;  %v7878_v15 = vpop.f32.mrf.mxu1 }
 0x226   : > { %v7898_v43 = vpop.f32.mrf.mxu0 }
 0x227   : > { %8793 = vpow2.f32 %v6736_v38  ;;  %v6735_v52 = vmul.f32 -1.442695, %v1224_v44  ;;  %v1227_v49 = vadd.f32 %v7898_v43, %v1064_v33  ;;  %v1078_v33 = vpop.f32.mrf.mxu1 }
 0x228   : > { %v1183_v58 = vpop.f32.mrf.mxu0 }
 0x229   : > { %8795 = vpow2.f32 %v6735_v52  ;;  %v1226_v1 = vadd.f32 %v1183_v58, %v1059_v47  ;;  %v6738_v14 = vmul.f32 -1.442695, %v1227_v49  ;;  %v7881_v55 = vpop.f32.mrf.mxu1 }
 0x22a   : > { %v7901_v5 = vpop.f32.mrf.mxu0 }
 0x22b   : > { %v1229_v17 = vadd.f32 %v7901_v5, %v1074_v62  ;;  %v6737_v19 = vmul.f32 -1.442695, %v1226_v1  ;;  %8797 = vpow2.f32 %v6738_v14  ;;  %v1084_v14 = vadd.f32 %v7878_v15, %v10228_v2 }
 0x22c   : > { %v1193_v22 = vpop.f32.mrf.mxu0 }
 0x22d   : > { %v6740_v24 = vmul.f32 -1.442695, %v1229_v17  ;;  %v1228_v29 = vadd.f32 %v1193_v22, %v1069_v12  ;;  %8799 = vpow2.f32 %v6737_v19 }
 0x22e   : > { %v7904_v11 = vpop.f32.mrf.mxu0 }
 0x22f   : > { %v6739_v31 = vmul.f32 -1.442695, %v1228_v29  ;;  %8801 = vpow2.f32 %v6740_v24  ;;  %v1279_v52 = vadd.f32 %v7904_v11, %v10226_v60 }
 0x230   : > { %v8790_v35 = vpop.eup %8789  ;;  %v1203_v27 = vpop.f32.mrf.mxu0 }
 0x231   : > { %v1255_v6 = vadd.f32 1.0, %v8790_v35  ;;  %8803 = vpow2.f32 %v6739_v31  ;;  %v1278_v5 = vadd.f32 %v1203_v27, %v10233_v10  ;;  %v1079_v35 = vadd.f32 %v1078_v33, %v10240_v40 }
 0x232   : > { %v8792_v8 = vpop.eup %8791  ;;  %v7907_v43 = vpop.f32.mrf.mxu0 }
 0x233   : > { %8805 = vrcp.f32 %v1255_v6  ;;  %v1254_v37 = vadd.f32 1.0, %v8792_v8  ;;  %v1281_v29 = vadd.f32 %v7907_v43, %v10218_v39  ;;  %v1088_v6 = vpop.f32.mrf.mxu1 }
 0x234   : > { %v8794_v13 = vpop.eup %8793  ;;  %v1213_v19 = vpop.f32.mrf.mxu0 }
 0x235   : > { %8807 = vrcp.f32 %v1254_v37  ;;  %v1257_v42 = vadd.f32 1.0, %v8794_v13  ;;  %v1094_v37 = vadd.f32 %v7881_v55, %v10220_v45 }
 0x236   : > { %v8796_v18 = vpop.eup %8795 }
 0x237   : > { %8809 = vrcp.f32 %v1257_v42  ;;  %v1256_v25 = vadd.f32 1.0, %v8796_v18  ;;  %v1280_v42 = vadd.f32 %v1213_v19, %v10222_v51 }
 0x238   : > { %v8798_v32 = vpop.eup %8797 }
 0x239   : > { %8811 = vrcp.f32 %v1256_v25  ;;  %v1259_v58 = vadd.f32 1.0, %v8798_v32  ;;  %v1089_v25 = vadd.f32 %v1088_v6, %v10224_v56 }
 0x23a   : > { %v8800_v38 = vpop.eup %8799 }
 0x23b   : > { %v1258_v17 = vadd.f32 1.0, %v8800_v38  ;;  %8813 = vrcp.f32 %v1259_v58 }
 0x23c   : > { %v8802_v44 = vpop.eup %8801 }
 0x23d   : > { %v1261_v62 = vadd.f32 1.0, %v8802_v44 }
 0x23e   : > { %v8804_v47 = vpop.eup %8803 }
 0x23f   : > { %v1260_v22 = vadd.f32 1.0, %v8804_v47  ;;  %8815 = vrcp.f32 %v1261_v62 }
 0x240   : > { %v8806_v49 = vpop.eup %8805  ;;  %8817 = vrcp.f32 %v1258_v17 }
 0x241   : > { %v1283_v1 = vmul.f32 %v8806_v49, %v1279_v52  ;;  %8819 = vrcp.f32 %v1260_v22 }
 0x242   : > { %v8808_v12 = vpop.eup %8807 }
 0x243   : > { %v1282_v24 = vmul.f32 %v8808_v12, %v1278_v5  ;;  %v1287_v8 = vadd.f32 %v1283_v1, %v1084_v14 }
 0x244   : > { %v8810_v31 = vpop.eup %8809 }
 0x245   : > { %v1285_v13 = vmul.f32 %v8810_v31, %v1281_v29  ;;  %v1286_v11 = vadd.f32 %v1282_v24, %v1079_v35  ;;  %8821 = vtanh.f32 %v1287_v8  ;;  %v10347_v8 = vld [vmem:[%s11901_s3 + $0x18] sm:$0xff] }
 0x246   : > { %v8812_v18 = vpop.eup %8811 }
 0x247   : > { %v1289_v15 = vadd.f32 %v1285_v13, %v1094_v37  ;;  %v1284_v27 = vmul.f32 %v8812_v18, %v1280_v42  ;;  %v10354_v37 = vld [vmem:[%s11901_s3 + $0x20] sm:$0xff]  ;;  %v10361_v13 = vld [vmem:[%s11901_s3 + $0x28] sm:$0xff]  ;;  %v10368_v42 = vld [vmem:[%s11901_s3 + $0x30] sm:$0xff] }
 0x248   : > { %v8814_v33 = vpop.eup %8813  ;;  %v10375_v18 = vld [vmem:[%s11901_s3 + $0x38] sm:$0xff] }
 0x249   : > { %8823 = vtanh.f32 %v1289_v15  ;;  %v1288_v32 = vadd.f32 %v1284_v27, %v1089_v25  ;;  %v1295_v5 = vsub.f32 1.0, %v8814_v33  ;;  %v1303_v31 = vmul.f32 %v8814_v33, %v10261_v3  ;;  %v10333_v3 = vld [vmem:[%s11901_s3 + $0x8] sm:$0xff]  ;;  %v10396_v15 = vld [vmem:[%s11901_s3 + $0x50] sm:$0xff]  ;;  %v10403_v27 = vld [vmem:[%s11901_s3 + $0x58] sm:$0xff]  ;;  %v7918_v33 = vpop.f32.mrf.mxu1 }
 0x24a   : > { %8825 = vtanh.f32 %v1286_v11  ;;  %v10382_v11 = vld [vmem:[%s11901_s3 + $0x40] sm:$0xff]  ;;  %v10389_v25 = vld [vmem:[%s11901_s3 + $0x48] sm:$0xff] }
 0x24b   : > { %8827 = vtanh.f32 %v1288_v32  ;;  %v10410_v32 = vld [vmem:[%s11901_s3] sm:$0xff] }
 0x24c   : > { %v8816_v38 = vpop.eup %8815 }
 0x24d   : > { %v8818_v44 = vpop.eup %8817  ;;  %v1297_v52 = vsub.f32 1.0, %v8816_v38  ;;  %v1305_v62 = vmul.f32 %v8816_v38, %v10254_v54  ;;  %v1381_v38 = vpop.f32.mrf.mxu1 }
 0x24e   : > { %v8820_v43 = vpop.eup %8819  ;;  %v1294_v14 = vsub.f32 1.0, %v8818_v44  ;;  %v1302_v6 = vmul.f32 %v8818_v44, %v10265_v0  ;;  %v10340_v0 = vld [vmem:[%s11901_s3 + $0x10] sm:$0xff] }
 0x24f   : > { %v1296_v1 = vsub.f32 1.0, %v8820_v43  ;;  %v1304_v22 = vmul.f32 %v8820_v43, %v10257_v61  ;;  %v7921_v44 = vpop.f32.mrf.mxu1 }
 0x251   : > { %v1391_v43 = vpop.f32.mrf.mxu1 }
 0x252   : > { %v8822_v47 = vpop.eup %8821 }
 0x253   : > { %v1299_v24 = vmul.f32 %v8822_v47, %v1295_v5  ;;  %v7924_v47 = vpop.f32.mrf.mxu1  ;;  %v1397_v5 = vadd.f32 %v7921_v44, %v10168_v16 }
 0x255   : > { %v10320_v54 = vadd.f32 %v1303_v31, %v1299_v24 }
 0x256   : > { %v8824_v49 = vpop.eup %8823 }
 0x257   : > { %v8826_v55 = vpop.eup %8825  ;;  %v1301_v58 = vmul.f32 %v8824_v49, %v1297_v52  ;;  %v1387_v52 = vadd.f32 %v7918_v33, %v10172_v20  ;;  %v1407_v33 = vadd.f32 %v7924_v47, %v10197_v59 }
 0x258   : > { %v8828_v12 = vpop.eup %8827  ;;  %v1298_v35 = vmul.f32 %v8826_v55, %v1294_v14  ;;  %v1382_v55 = vadd.f32 %v1381_v38, %v10180_v34 }
 0x259   : > { %v10311_v17 = vadd.f32 %v1305_v62, %v1301_v58  ;;  %v1300_v19 = vmul.f32 %v8828_v12, %v1296_v1  ;;  %v1401_v62 = vpop.f32.mrf.mxu1 }
 0x25a   : > { %v10325_v61 = vadd.f32 %v1302_v6, %v1298_v35 }
 0x25b   : > { %7934 = vmatprep.subr.mxu0 %v10311_v17  ;;  %v10315_v29 = vadd.f32 %v1304_v22, %v1300_v19  ;;  %v1392_v22 = vadd.f32 %v1391_v43, %v10176_v26  ;;  %v7927_v35 = vpop.f32.mrf.mxu1 }
 0x25c   : > { %7935 = vmatpush3.msra.mxu0 %v10311_v17  ;;  %v1417_v43 = vadd.f32 %v7927_v35, %v10186_v46 }
 0x25d   : > { %7936 = vmatprep.subr.mxu0 %v10315_v29 }
 0x25e   : > { %7937 = vmatpush3.msra.mxu0 %v10315_v29 }
 0x25f   : > { %7938 = vmatprep.subr.mxu0 %v10320_v54 }
 0x260   : > { %7939 = vmatpush3.msra.mxu0 %v10320_v54 }
 0x261   : > { %7940 = vmatprep.subr.mxu0 %v10325_v61 }
 0x262   : > { %7941 = vmatpush3.msra.mxu0 %v10325_v61 }
 0x263   : > { %7943 = vmatmul.mubr.msk.f32.vlgmr.msra.gmra.mxu0 %vm536_vm0, %v10333_v3 }
 0x264   : > { %7945 = vmatprep.mubr.msk.f32.mxu0 %vm536_vm0, %v10340_v0 }
 0x267   : > { %7946 = vmatmul.mubr.msk.f32.gmra.mxu0 %vm536_vm0, %v10347_v8 }
 0x268   : > { %7948 = vmatprep.mubr.msk.f32.mxu0 %vm536_vm0, %v10354_v37 }
 0x26b   : > { %7949 = vmatmul.mubr.msk.f32.gmra.mxu0 %vm536_vm0, %v10361_v13 }
 0x26c   : > { %7951 = vmatprep.mubr.msk.f32.mxu0 %vm536_vm0, %v10368_v42 }
 0x26f   : > { %7952 = vmatmul.mubr.msk.f32.gmra.mxu0 %vm536_vm0, %v10375_v18 }
 0x270   : > { %7954 = vmatprep.mubr.msk.f32.mxu0 %vm536_vm0, %v10382_v11 }
 0x273   : > { %7955 = vmatmul.mubr.msk.f32.gmra.mxu0 %vm536_vm0, %v10389_v25 }
 0x274   : > { %7957 = vmatprep.mubr.msk.f32.mxu0 %vm536_vm0, %v10396_v15 }
 0x277   : > { %7958 = vmatmul.mubr.msk.f32.gmra.mxu0 %vm536_vm0, %v10403_v27 }
 0x278   : > { %7994 = vmatprep.mubr.msk.f32.mxu0 %vm536_vm0, %v10410_v32 }
 0x323   : > { %v7944_v49 = vpop.f32.mrf.mxu0 }
 0x324   : > { %v1566_v58 = vadd.f32 %v7944_v49, %v1387_v52  ;;  %v1402_v49 = vadd.f32 %v1401_v62, %v10205_v4 }
 0x325   : > { %v1506_v1 = vpop.f32.mrf.mxu0 }
 0x326   : > { %v6770_v12 = vmul.f32 -1.442695, %v1566_v58  ;;  %v1565_v14 = vadd.f32 %v1506_v1, %v1382_v55  ;;  %v1411_v55 = vpop.f32.mrf.mxu1 }
 0x327   : > { %v7947_v19 = vpop.f32.mrf.mxu0 }
 0x328   : > { %8829 = vpow2.f32 %v6770_v12  ;;  %v6769_v24 = vmul.f32 -1.442695, %v1565_v14  ;;  %v1568_v31 = vadd.f32 %v7947_v19, %v1397_v5  ;;  %v1412_v14 = vadd.f32 %v1411_v55, %v10189_v50 }
 0x329   : > { %v1516_v6 = vpop.f32.mrf.mxu0 }
 0x32a   : > { %8831 = vpow2.f32 %v6769_v24  ;;  %v6772_v57 = vmul.f32 -1.442695, %v1568_v31  ;;  %v1567_v38 = vadd.f32 %v1516_v6, %v1392_v22 }
 0x32b   : > { %v7950_v52 = vpop.f32.mrf.mxu0 }
 0x32c   : > { %8833 = vpow2.f32 %v6772_v57  ;;  %v6771_v44 = vmul.f32 -1.442695, %v1567_v38  ;;  %v1570_v58 = vadd.f32 %v7950_v52, %v1407_v33 }
 0x32d   : > { %v1526_v1 = vpop.f32.mrf.mxu0 }
 0x32e   : > { %8835 = vpow2.f32 %v6771_v44  ;;  %v1569_v12 = vadd.f32 %v1526_v1, %v1402_v49  ;;  %v6774_v19 = vmul.f32 -1.442695, %v1570_v58  ;;  %v7930_v1 = vpop.f32.mrf.mxu1 }
 0x32f   : > { %v7953_v5 = vpop.f32.mrf.mxu0 }
 0x330   : > { %v1572_v47 = vadd.f32 %v7953_v5, %v1417_v43  ;;  %v6773_v24 = vmul.f32 -1.442695, %v1569_v12  ;;  %8837 = vpow2.f32 %v6774_v19  ;;  %v1421_v5 = vpop.f32.mrf.mxu1 }
 0x331   : > { %v1536_v31 = vpop.f32.mrf.mxu0  ;;  %v1422_v28 = vadd.f32 %v1421_v5, %v10240_v40 }
 0x332   : > { %v6776_v22 = vmul.f32 -1.442695, %v1572_v47  ;;  %v1571_v6 = vadd.f32 %v1536_v31, %v1412_v14  ;;  %8839 = vpow2.f32 %v6773_v24 }
 0x333   : > { %v7956_v58 = vpop.f32.mrf.mxu0 }
 0x334   : > { %v6775_v62 = vmul.f32 -1.442695, %v1571_v6  ;;  %8841 = vpow2.f32 %v6776_v22  ;;  %v1622_v31 = vadd.f32 %v7956_v58, %v10226_v60  ;;  %v7933_v6 = vpop.f32.mrf.mxu1 }
 0x335   : > { %v8830_v57 = vpop.eup %8829  ;;  %v1546_v43 = vpop.f32.mrf.mxu0 }
 0x336   : > { %v1598_v33 = vadd.f32 1.0, %v8830_v57  ;;  %8843 = vpow2.f32 %v6775_v62  ;;  %v1431_v58 = vpop.f32.mrf.mxu1 }
 0x337   : > { %v8832_v38 = vpop.eup %8831  ;;  %v7959_v47 = vpop.f32.mrf.mxu0 }
 0x338   : > { %8845 = vrcp.f32 %v1598_v33  ;;  %v1597_v35 = vadd.f32 1.0, %v8832_v38  ;;  %v1621_v38 = vadd.f32 %v1546_v43, %v10233_v10  ;;  %v1624_v21 = vadd.f32 %v7959_v47, %v10218_v39 }
 0x339   : > { %v8834_v52 = vpop.eup %8833 }
 0x33a   : > { %8847 = vrcp.f32 %v1597_v35  ;;  %v1600_v49 = vadd.f32 1.0, %v8834_v52  ;;  %v1427_v52 = vadd.f32 %v7930_v1, %v10228_v2 }
 0x33b   : > { %v8836_v44 = vpop.eup %8835 }
 0x33c   : > { %8849 = vrcp.f32 %v1600_v49  ;;  %v1599_v55 = vadd.f32 1.0, %v8836_v44  ;;  %v1556_v44 = vpop.f32.mrf.mxu0 }
 0x33d   : > { %v8838_v12 = vpop.eup %8837  ;;  %v1623_v43 = vadd.f32 %v1556_v44, %v10222_v51 }
 0x33e   : > { %8851 = vrcp.f32 %v1599_v55  ;;  %v1602_v62 = vadd.f32 1.0, %v8838_v12  ;;  %v1437_v12 = vadd.f32 %v7933_v6, %v10220_v45 }
 0x33f   : > { %v8840_v14 = vpop.eup %8839 }
 0x340   : > { %v1601_v49 = vadd.f32 1.0, %v8840_v14  ;;  %8853 = vrcp.f32 %v1602_v62  ;;  %v1432_v14 = vadd.f32 %v1431_v58, %v10224_v56 }
 0x341   : > { %v8842_v19 = vpop.eup %8841 }
 0x342   : > { %v1604_v57 = vadd.f32 1.0, %v8842_v19 }
 0x343   : > { %v8844_v24 = vpop.eup %8843 }
 0x344   : > { %v1603_v55 = vadd.f32 1.0, %v8844_v24  ;;  %8855 = vrcp.f32 %v1604_v57 }
 0x345   : > { %v8846_v22 = vpop.eup %8845  ;;  %8857 = vrcp.f32 %v1601_v49 }
 0x346   : > { %v1626_v33 = vmul.f32 %v8846_v22, %v1622_v31  ;;  %8859 = vrcp.f32 %v1603_v55 }
 0x347   : > { %v8848_v35 = vpop.eup %8847 }
 0x348   : > { %v1625_v48 = vmul.f32 %v8848_v35, %v1621_v38  ;;  %v1630_v9 = vadd.f32 %v1626_v33, %v1427_v52 }
 0x349   : > { %v8850_v7 = vpop.eup %8849 }
 0x34a   : > { %v1628_v19 = vmul.f32 %v8850_v7, %v1624_v21  ;;  %v1629_v1 = vadd.f32 %v1625_v48, %v1422_v28  ;;  %8861 = vtanh.f32 %v1630_v9 }
 0x34b   : > { %v8852_v31 = vpop.eup %8851 }
 0x34c   : > { %v1632_v24 = vadd.f32 %v1628_v19, %v1437_v12  ;;  %v1627_v47 = vmul.f32 %v8852_v31, %v1623_v43 }
 0x34d   : > { %v8854_v22 = vpop.eup %8853 }
 0x34e   : > { %8863 = vtanh.f32 %v1632_v24  ;;  %v1631_v5 = vadd.f32 %v1627_v47, %v1432_v14  ;;  %v1638_v52 = vsub.f32 1.0, %v8854_v22  ;;  %v1646_v43 = vmul.f32 %v8854_v22, %v10320_v54  ;;  %v7970_v54 = vpop.f32.mrf.mxu1 }
 0x34f   : > { %8865 = vtanh.f32 %v1629_v1 }
 0x350   : > { %8867 = vtanh.f32 %v1631_v5  ;;  %v1730_v5 = vadd.f32 %v7970_v54, %v10172_v20 }
 0x351   : > { %v8856_v62 = vpop.eup %8855 }
 0x352   : > { %v8858_v6 = vpop.eup %8857  ;;  %v1640_v21 = vsub.f32 1.0, %v8856_v62  ;;  %v1648_v28 = vmul.f32 %v8856_v62, %v10311_v17 }
 0x353   : > { %v8860_v57 = vpop.eup %8859  ;;  %v1637_v44 = vsub.f32 1.0, %v8858_v6  ;;  %v1645_v1 = vmul.f32 %v8858_v6, %v10325_v61  ;;  %v1724_v61 = vpop.f32.mrf.mxu1 }
 0x354   : > { %v1639_v48 = vsub.f32 1.0, %v8860_v57  ;;  %v1647_v58 = vmul.f32 %v8860_v57, %v10315_v29  ;;  %v1725_v62 = vadd.f32 %v1724_v61, %v10180_v34 }
 0x355   : > { %v7973_v14 = vpop.f32.mrf.mxu1 }
 0x357   : > { %v8862_v7 = vpop.eup %8861  ;;  %v1734_v24 = vpop.f32.mrf.mxu1 }
 0x358   : > { %v1642_v12 = vmul.f32 %v8862_v7, %v1638_v52 }
 0x359   : > { %v7976_v47 = vpop.f32.mrf.mxu1 }
 0x35a   : > { %v10440_v17 = vadd.f32 %v1646_v43, %v1642_v12 }
 0x35b   : > { %v8864_v33 = vpop.eup %8863  ;;  %v1744_v57 = vpop.f32.mrf.mxu1 }
 0x35c   : > { %v8866_v38 = vpop.eup %8865  ;;  %v1644_v35 = vmul.f32 %v8864_v33, %v1640_v21  ;;  %v1740_v21 = vadd.f32 %v7973_v14, %v10168_v16 }
 0x35d   : > { %v8868_v49 = vpop.eup %8867  ;;  %v1641_v31 = vmul.f32 %v8866_v38, %v1637_v44 }
 0x35e   : > { %v10431_v9 = vadd.f32 %v1648_v28, %v1644_v35  ;;  %v1643_v55 = vmul.f32 %v8868_v49, %v1639_v48  ;;  %v1735_v28 = vadd.f32 %v1734_v24, %v10176_v26  ;;  %v7979_v49 = vpop.f32.mrf.mxu1 }
 0x35f   : > { %v10445_v29 = vadd.f32 %v1645_v1, %v1641_v31  ;;  %v1745_v31 = vadd.f32 %v1744_v57, %v10205_v4  ;;  %v1760_v24 = vadd.f32 %v7979_v49, %v10186_v46 }
 0x360   : > { %7986 = vmatprep.subr.mxu0 %v10431_v9  ;;  %v10435_v19 = vadd.f32 %v1647_v58, %v1643_v55  ;;  %v1750_v55 = vadd.f32 %v7976_v47, %v10197_v59  ;;  %v1754_v61 = vpop.f32.mrf.mxu1 }
 0x361   : > { %7987 = vmatpush3.msra.mxu0 %v10431_v9 }
 0x362   : > { %7988 = vmatprep.subr.mxu0 %v10435_v19 }
 0x363   : > { %7989 = vmatpush3.msra.mxu0 %v10435_v19 }
 0x364   : > { %7990 = vmatprep.subr.mxu0 %v10440_v17 }
 0x365   : > { %7991 = vmatpush3.msra.mxu0 %v10440_v17 }
 0x366   : > { %7992 = vmatprep.subr.mxu0 %v10445_v29 }
 0x367   : > { %7993 = vmatpush3.msra.mxu0 %v10445_v29 }
 0x368   : > { %7995 = vmatmul.mubr.msk.f32.vlgmr.msra.gmra.mxu0 %vm536_vm0, %v10333_v3 }
 0x369   : > { %7997 = vmatprep.mubr.msk.f32.mxu0 %vm536_vm0, %v10340_v0 }
 0x36c   : > { %7998 = vmatmul.mubr.msk.f32.gmra.mxu0 %vm536_vm0, %v10347_v8 }
 0x36d   : > { %8000 = vmatprep.mubr.msk.f32.mxu0 %vm536_vm0, %v10354_v37 }
 0x370   : > { %8001 = vmatmul.mubr.msk.f32.gmra.mxu0 %vm536_vm0, %v10361_v13 }
 0x371   : > { %8003 = vmatprep.mubr.msk.f32.mxu0 %vm536_vm0, %v10368_v42 }
 0x374   : > { %8004 = vmatmul.mubr.msk.f32.gmra.mxu0 %vm536_vm0, %v10375_v18 }
 0x375   : > { %8006 = vmatprep.mubr.msk.f32.mxu0 %vm536_vm0, %v10382_v11 }
 0x378   : > { %8007 = vmatmul.mubr.msk.f32.gmra.mxu0 %vm536_vm0, %v10389_v25 }
 0x379   : > { %8009 = vmatprep.mubr.msk.f32.mxu0 %vm536_vm0, %v10396_v15 }
 0x37c   : > { %8010 = vmatmul.mubr.msk.f32.gmra.mxu0 %vm536_vm0, %v10403_v27 }
 0x37d   : > { %8046 = vmatprep.mubr.msk.f32.mxu0 %vm536_vm0, %v10410_v32 }
 0x428   : > { %v7996_v22 = vpop.f32.mrf.mxu0 }
 0x429   : > { %v1909_v6 = vadd.f32 %v7996_v22, %v1730_v5 }
 0x42a   : > { %v1849_v7 = vpop.f32.mrf.mxu0 }
 0x42b   : > { %v6806_v33 = vmul.f32 -1.442695, %v1909_v6  ;;  %v1908_v38 = vadd.f32 %v1849_v7, %v1725_v62  ;;  %v1755_v62 = vadd.f32 %v1754_v61, %v10189_v50 }
 0x42c   : > { %v7999_v35 = vpop.f32.mrf.mxu0 }
 0x42d   : > { %8869 = vpow2.f32 %v6806_v33  ;;  %v6805_v48 = vmul.f32 -1.442695, %v1908_v38  ;;  %v1911_v52 = vadd.f32 %v7999_v35, %v1740_v21 }
 0x42e   : > { %v1859_v44 = vpop.f32.mrf.mxu0 }
 0x42f   : > { %8871 = vpow2.f32 %v6805_v48  ;;  %v6808_v58 = vmul.f32 -1.442695, %v1911_v52  ;;  %v1910_v12 = vadd.f32 %v1859_v44, %v1735_v28 }
 0x430   : > { %v8002_v43 = vpop.f32.mrf.mxu0 }
 0x431   : > { %8873 = vpow2.f32 %v6808_v58  ;;  %v6807_v1 = vmul.f32 -1.442695, %v1910_v12  ;;  %v1913_v54 = vadd.f32 %v8002_v43, %v1750_v55  ;;  %v7982_v43 = vpop.f32.mrf.mxu1 }
 0x432   : > { %v1869_v14 = vpop.f32.mrf.mxu0 }
 0x433   : > { %8875 = vpow2.f32 %v6807_v1  ;;  %v1912_v5 = vadd.f32 %v1869_v14, %v1745_v31  ;;  %v6810_v6 = vmul.f32 -1.442695, %v1913_v54  ;;  %v1764_v54 = vpop.f32.mrf.mxu1 }
 0x434   : > { %v8005_v22 = vpop.f32.mrf.mxu0 }
 0x435   : > { %v1915_v47 = vadd.f32 %v8005_v22, %v1760_v24  ;;  %v6809_v7 = vmul.f32 -1.442695, %v1912_v5  ;;  %8877 = vpow2.f32 %v6810_v6  ;;  %v7985_v6 = vpop.f32.mrf.mxu1 }
 0x436   : > { %v1879_v21 = vpop.f32.mrf.mxu0 }
 0x437   : > { %v6812_v33 = vmul.f32 -1.442695, %v1915_v47  ;;  %v1914_v38 = vadd.f32 %v1879_v21, %v1755_v62  ;;  %8879 = vpow2.f32 %v6809_v7 }
 0x438   : > { %v8008_v58 = vpop.f32.mrf.mxu0 }
 0x439   : > { %v6811_v57 = vmul.f32 -1.442695, %v1914_v38  ;;  %8881 = vpow2.f32 %v6812_v33  ;;  %v1965_v22 = vadd.f32 %v8008_v58, %v10226_v60  ;;  %v1774_v58 = vpop.f32.mrf.mxu1 }
 0x43a   : > { %v8870_v35 = vpop.eup %8869  ;;  %v1889_v31 = vpop.f32.mrf.mxu0 }
 0x43b   : > { %v1941_v28 = vadd.f32 1.0, %v8870_v35  ;;  %8883 = vpow2.f32 %v6811_v57  ;;  %v1964_v33 = vadd.f32 %v1889_v31, %v10233_v10  ;;  %v1770_v57 = vadd.f32 %v7982_v43, %v10228_v2 }
 0x43c   : > { %v8872_v48 = vpop.eup %8871  ;;  %v8011_v24 = vpop.f32.mrf.mxu0 }
 0x43d   : > { %8885 = vrcp.f32 %v1941_v28  ;;  %v1940_v52 = vadd.f32 1.0, %v8872_v48 }
 0x43e   : > { %v8874_v49 = vpop.eup %8873  ;;  %v1899_v28 = vpop.f32.mrf.mxu0 }
 0x43f   : > { %8887 = vrcp.f32 %v1940_v52  ;;  %v1943_v44 = vadd.f32 1.0, %v8874_v49  ;;  %v1967_v49 = vadd.f32 %v8011_v24, %v10218_v39  ;;  %v1966_v31 = vadd.f32 %v1899_v28, %v10222_v51 }
 0x440   : > { %v8876_v55 = vpop.eup %8875 }
 0x441   : > { %8889 = vrcp.f32 %v1943_v44  ;;  %v1942_v12 = vadd.f32 1.0, %v8876_v55  ;;  %v1765_v55 = vadd.f32 %v1764_v54, %v10240_v40 }
 0x442   : > { %v8878_v1 = vpop.eup %8877 }
 0x443   : > { %8891 = vrcp.f32 %v1942_v12  ;;  %v1945_v47 = vadd.f32 1.0, %v8878_v1  ;;  %v1780_v1 = vadd.f32 %v7985_v6, %v10220_v45 }
 0x444   : > { %v8880_v61 = vpop.eup %8879 }
 0x445   : > { %v1944_v35 = vadd.f32 1.0, %v8880_v61  ;;  %8893 = vrcp.f32 %v1945_v47  ;;  %v1775_v61 = vadd.f32 %v1774_v58, %v10224_v56 }
 0x446   : > { %v8882_v14 = vpop.eup %8881 }
 0x447   : > { %v1947_v7 = vadd.f32 1.0, %v8882_v14 }
 0x448   : > { %v8884_v5 = vpop.eup %8883 }
 0x449   : > { %v1946_v48 = vadd.f32 1.0, %v8884_v5  ;;  %8895 = vrcp.f32 %v1947_v7 }
 0x44a   : > { %v8886_v62 = vpop.eup %8885  ;;  %8897 = vrcp.f32 %v1944_v35 }
 0x44b   : > { %v1969_v21 = vmul.f32 %v8886_v62, %v1965_v22  ;;  %8899 = vrcp.f32 %v1946_v48 }
 0x44c   : > { %v8888_v38 = vpop.eup %8887 }
 0x44d   : > { %v1968_v52 = vmul.f32 %v8888_v38, %v1964_v33  ;;  %v1973_v12 = vadd.f32 %v1969_v21, %v1770_v57 }
 0x44e   : > { %v8890_v44 = vpop.eup %8889 }
 0x44f   : > { %v1971_v14 = vmul.f32 %v8890_v44, %v1967_v49  ;;  %v1972_v43 = vadd.f32 %v1968_v52, %v1765_v55  ;;  %8901 = vtanh.f32 %v1973_v12 }
 0x450   : > { %v8892_v22 = vpop.eup %8891 }
 0x451   : > { %v1975_v5 = vadd.f32 %v1971_v14, %v1780_v1  ;;  %v1970_v24 = vmul.f32 %v8892_v22, %v1966_v31 }
 0x452   : > { %v8894_v62 = vpop.eup %8893 }
 0x453   : > { %8903 = vtanh.f32 %v1975_v5  ;;  %v1974_v54 = vadd.f32 %v1970_v24, %v1775_v61  ;;  %v1981_v48 = vsub.f32 1.0, %v8894_v62  ;;  %v1989_v31 = vmul.f32 %v8894_v62, %v10440_v17  ;;  %v8022_v17 = vpop.f32.mrf.mxu1 }
 0x454   : > { %8905 = vtanh.f32 %v1972_v43 }
 0x455   : > { %8907 = vtanh.f32 %v1974_v54  ;;  %v2073_v54 = vadd.f32 %v8022_v17, %v10172_v20 }
 0x456   : > { %v8896_v47 = vpop.eup %8895 }
 0x457   : > { %v8898_v6 = vpop.eup %8897  ;;  %v1983_v33 = vsub.f32 1.0, %v8896_v47  ;;  %v1991_v28 = vmul.f32 %v8896_v47, %v10431_v9 }
 0x458   : > { %v8900_v7 = vpop.eup %8899  ;;  %v1980_v44 = vsub.f32 1.0, %v8898_v6  ;;  %v1988_v43 = vmul.f32 %v8898_v6, %v10445_v29  ;;  %v2067_v29 = vpop.f32.mrf.mxu1 }
 0x459   : > { %v1982_v52 = vsub.f32 1.0, %v8900_v7  ;;  %v1990_v12 = vmul.f32 %v8900_v7, %v10435_v19  ;;  %v2068_v47 = vadd.f32 %v2067_v29, %v10180_v34 }
 0x45a   : > { %v8025_v61 = vpop.f32.mrf.mxu1 }
 0x45c   : > { %v8902_v21 = vpop.eup %8901  ;;  %v2077_v5 = vpop.f32.mrf.mxu1 }
 0x45d   : > { %v1985_v1 = vmul.f32 %v8902_v21, %v1981_v48 }
 0x45e   : > { %v8028_v24 = vpop.f32.mrf.mxu1 }
 0x45f   : > { %v10500_v9 = vadd.f32 %v1989_v31, %v1985_v1 }
 0x460   : > { %v8904_v38 = vpop.eup %8903  ;;  %v2087_v7 = vpop.f32.mrf.mxu1 }
 0x461   : > { %v8906_v57 = vpop.eup %8905  ;;  %v1987_v35 = vmul.f32 %v8904_v38, %v1983_v33  ;;  %v2083_v33 = vadd.f32 %v8025_v61, %v10168_v16 }
 0x462   : > { %v8908_v49 = vpop.eup %8907  ;;  %v1984_v22 = vmul.f32 %v8906_v57, %v1980_v44 }
 0x463   : > { %v10491_v55 = vadd.f32 %v1991_v28, %v1987_v35  ;;  %v1986_v58 = vmul.f32 %v8908_v49, %v1982_v52  ;;  %v2078_v28 = vadd.f32 %v2077_v5, %v10176_v26  ;;  %v8031_v49 = vpop.f32.mrf.mxu1 }
 0x464   : > { %v10505_v19 = vadd.f32 %v1988_v43, %v1984_v22  ;;  %v2088_v22 = vadd.f32 %v2087_v7, %v10205_v4  ;;  %v2103_v5 = vadd.f32 %v8031_v49, %v10186_v46 }
 0x465   : > { %8038 = vmatprep.subr.mxu0 %v10491_v55  ;;  %v10495_v14 = vadd.f32 %v1990_v12, %v1986_v58  ;;  %v2093_v58 = vadd.f32 %v8028_v24, %v10197_v59  ;;  %v2097_v29 = vpop.f32.mrf.mxu1 }
 0x466   : > { %8039 = vmatpush3.msra.mxu0 %v10491_v55 }
 0x467   : > { %8040 = vmatprep.subr.mxu0 %v10495_v14 }
 0x468   : > { %8041 = vmatpush3.msra.mxu0 %v10495_v14 }
 0x469   : > { %8042 = vmatprep.subr.mxu0 %v10500_v9 }
 0x46a   : > { %8043 = vmatpush3.msra.mxu0 %v10500_v9 }
 0x46b   : > { %8044 = vmatprep.subr.mxu0 %v10505_v19 }
 0x46c   : > { %8045 = vmatpush3.msra.mxu0 %v10505_v19 }
 0x46d   : > { %8047 = vmatmul.mubr.msk.f32.vlgmr.msra.gmra.mxu0 %vm536_vm0, %v10333_v3 }
 0x46e   : > { %8049 = vmatprep.mubr.msk.f32.mxu0 %vm536_vm0, %v10340_v0 }
 0x471   : > { %8050 = vmatmul.mubr.msk.f32.gmra.mxu0 %vm536_vm0, %v10347_v8 }
 0x472   : > { %8052 = vmatprep.mubr.msk.f32.mxu0 %vm536_vm0, %v10354_v37 }
 0x475   : > { %8053 = vmatmul.mubr.msk.f32.gmra.mxu0 %vm536_vm0, %v10361_v13 }
 0x476   : > { %8055 = vmatprep.mubr.msk.f32.mxu0 %vm536_vm0, %v10368_v42 }
 0x479   : > { %8056 = vmatmul.mubr.msk.f32.gmra.mxu0 %vm536_vm0, %v10375_v18 }
 0x47a   : > { %8058 = vmatprep.mubr.msk.f32.mxu0 %vm536_vm0, %v10382_v11 }
 0x47d   : > { %8059 = vmatmul.mubr.msk.f32.gmra.mxu0 %vm536_vm0, %v10389_v25 }
 0x47e   : > { %8061 = vmatprep.mubr.msk.f32.mxu0 %vm536_vm0, %v10396_v15 }
 0x481   : > { %8062 = vmatmul.mubr.msk.f32.gmra.mxu0 %vm536_vm0, %v10403_v27 }
 0x482   : > { %8098 = vmatprep.mubr.msk.f32.mxu0 %vm536_vm0, %v10410_v32 }
 0x52d   : > { %v8048_v62 = vpop.f32.mrf.mxu0 }
 0x52e   : > { %v2252_v6 = vadd.f32 %v8048_v62, %v2073_v54 }
 0x52f   : > { %v2192_v21 = vpop.f32.mrf.mxu0 }
 0x530   : > { %v6842_v38 = vmul.f32 -1.442695, %v2252_v6  ;;  %v2251_v57 = vadd.f32 %v2192_v21, %v2068_v47  ;;  %v2098_v47 = vadd.f32 %v2097_v29, %v10189_v50 }
 0x531   : > { %v8051_v35 = vpop.f32.mrf.mxu0 }
 0x532   : > { %8909 = vpow2.f32 %v6842_v38  ;;  %v6841_v52 = vmul.f32 -1.442695, %v2251_v57  ;;  %v2254_v48 = vadd.f32 %v8051_v35, %v2083_v33 }
 0x533   : > { %v2202_v44 = vpop.f32.mrf.mxu0 }
 0x534   : > { %8911 = vpow2.f32 %v6841_v52  ;;  %v6844_v12 = vmul.f32 -1.442695, %v2254_v48  ;;  %v2253_v1 = vadd.f32 %v2202_v44, %v2078_v28 }
 0x535   : > { %v8054_v31 = vpop.f32.mrf.mxu0 }
 0x536   : > { %8913 = vpow2.f32 %v6844_v12  ;;  %v6843_v43 = vmul.f32 -1.442695, %v2253_v1  ;;  %v2256_v17 = vadd.f32 %v8054_v31, %v2093_v58  ;;  %v8034_v31 = vpop.f32.mrf.mxu1 }
 0x537   : > { %v2212_v61 = vpop.f32.mrf.mxu0 }
 0x538   : > { %8915 = vpow2.f32 %v6843_v43  ;;  %v2255_v54 = vadd.f32 %v2212_v61, %v2088_v22  ;;  %v6846_v6 = vmul.f32 -1.442695, %v2256_v17  ;;  %v2107_v17 = vpop.f32.mrf.mxu1 }
 0x539   : > { %v8057_v62 = vpop.f32.mrf.mxu0 }
 0x53a   : > { %v2258_v24 = vadd.f32 %v8057_v62, %v2103_v5  ;;  %v6845_v21 = vmul.f32 -1.442695, %v2255_v54  ;;  %8917 = vpow2.f32 %v6846_v6  ;;  %v8037_v6 = vpop.f32.mrf.mxu1 }
 0x53b   : > { %v2222_v33 = vpop.f32.mrf.mxu0 }
 0x53c   : > { %v6848_v38 = vmul.f32 -1.442695, %v2258_v24  ;;  %v2257_v57 = vadd.f32 %v2222_v33, %v2098_v47  ;;  %8919 = vpow2.f32 %v6845_v21 }
 0x53d   : > { %v8060_v12 = vpop.f32.mrf.mxu0 }
 0x53e   : > { %v6847_v7 = vmul.f32 -1.442695, %v2257_v57  ;;  %8921 = vpow2.f32 %v6848_v38  ;;  %v2308_v62 = vadd.f32 %v8060_v12, %v10226_v60  ;;  %v2117_v12 = vpop.f32.mrf.mxu1 }
 0x53f   : > { %v8910_v35 = vpop.eup %8909  ;;  %v2232_v22 = vpop.f32.mrf.mxu0 }
 0x540   : > { %v2284_v28 = vadd.f32 1.0, %v8910_v35  ;;  %8923 = vpow2.f32 %v6847_v7  ;;  %v2307_v38 = vadd.f32 %v2232_v22, %v10233_v10  ;;  %v2113_v7 = vadd.f32 %v8034_v31, %v10228_v2 }
 0x541   : > { %v8912_v52 = vpop.eup %8911  ;;  %v8063_v5 = vpop.f32.mrf.mxu0 }
 0x542   : > { %8925 = vrcp.f32 %v2284_v28  ;;  %v2283_v48 = vadd.f32 1.0, %v8912_v52 }
 0x543   : > { %v8914_v49 = vpop.eup %8913  ;;  %v2242_v28 = vpop.f32.mrf.mxu0 }
 0x544   : > { %8927 = vrcp.f32 %v2283_v48  ;;  %v2286_v44 = vadd.f32 1.0, %v8914_v49  ;;  %v2310_v49 = vadd.f32 %v8063_v5, %v10218_v39  ;;  %v2309_v22 = vadd.f32 %v2242_v28, %v10222_v51 }
 0x545   : > { %v8916_v58 = vpop.eup %8915 }
 0x546   : > { %8929 = vrcp.f32 %v2286_v44  ;;  %v2285_v1 = vadd.f32 1.0, %v8916_v58  ;;  %v2108_v58 = vadd.f32 %v2107_v17, %v10240_v40 }
 0x547   : > { %v8918_v43 = vpop.eup %8917 }
 0x548   : > { %8931 = vrcp.f32 %v2285_v1  ;;  %v2288_v24 = vadd.f32 1.0, %v8918_v43  ;;  %v2123_v43 = vadd.f32 %v8037_v6, %v10220_v45 }
 0x549   : > { %v8920_v29 = vpop.eup %8919 }
 0x54a   : > { %v2287_v35 = vadd.f32 1.0, %v8920_v29  ;;  %8933 = vrcp.f32 %v2288_v24  ;;  %v2118_v29 = vadd.f32 %v2117_v12, %v10224_v56 }
 0x54b   : > { %v8922_v61 = vpop.eup %8921 }
 0x54c   : > { %v2290_v21 = vadd.f32 1.0, %v8922_v61 }
 0x54d   : > { %v8924_v54 = vpop.eup %8923 }
 0x54e   : > { %v2289_v52 = vadd.f32 1.0, %v8924_v54  ;;  %8935 = vrcp.f32 %v2290_v21 }
 0x54f   : > { %v8926_v47 = vpop.eup %8925  ;;  %8937 = vrcp.f32 %v2287_v35 }
 0x550   : > { %v2312_v33 = vmul.f32 %v8926_v47, %v2308_v62  ;;  %8939 = vrcp.f32 %v2289_v52 }
 0x551   : > { %v8928_v57 = vpop.eup %8927 }
 0x552   : > { %v2311_v48 = vmul.f32 %v8928_v57, %v2307_v38  ;;  %v2316_v1 = vadd.f32 %v2312_v33, %v2113_v7 }
 0x553   : > { %v8930_v44 = vpop.eup %8929 }
 0x554   : > { %v2314_v61 = vmul.f32 %v8930_v44, %v2310_v49  ;;  %v2315_v31 = vadd.f32 %v2311_v48, %v2108_v58  ;;  %8941 = vtanh.f32 %v2316_v1 }
 0x555   : > { %v8932_v62 = vpop.eup %8931 }
 0x556   : > { %v2318_v54 = vadd.f32 %v2314_v61, %v2123_v43  ;;  %v2313_v5 = vmul.f32 %v8932_v62, %v2309_v22 }
 0x557   : > { %v8934_v47 = vpop.eup %8933 }
 0x558   : > { %8943 = vtanh.f32 %v2318_v54  ;;  %v2317_v17 = vadd.f32 %v2313_v5, %v2118_v29  ;;  %v2324_v52 = vsub.f32 1.0, %v8934_v47  ;;  %v2332_v22 = vmul.f32 %v8934_v47, %v10500_v9 }
 0x559   : > { %8945 = vtanh.f32 %v2315_v31 }
 0x55a   : > { %8947 = vtanh.f32 %v2317_v17 }
 0x55b   : > { %v8936_v24 = vpop.eup %8935 }
 0x55c   : > { %v8938_v6 = vpop.eup %8937  ;;  %v2326_v38 = vsub.f32 1.0, %v8936_v24  ;;  %v2334_v28 = vmul.f32 %v8936_v24, %v10491_v55 }
 0x55d   : > { %v8940_v21 = vpop.eup %8939  ;;  %v2323_v44 = vsub.f32 1.0, %v8938_v6  ;;  %v2331_v31 = vmul.f32 %v8938_v6, %v10505_v19 }
 0x55e   : > { %v2325_v48 = vsub.f32 1.0, %v8940_v21  ;;  %v2333_v1 = vmul.f32 %v8940_v21, %v10495_v14 }
 0x561   : > { %v8942_v33 = vpop.eup %8941 }
 0x562   : > { %v2328_v43 = vmul.f32 %v8942_v33, %v2324_v52 }
 0x564   : > { %v10560_v55 = vadd.f32 %v2332_v22, %v2328_v43 }
 0x565   : > { %v8944_v57 = vpop.eup %8943 }
 0x566   : > { %v8946_v7 = vpop.eup %8945  ;;  %v2330_v35 = vmul.f32 %v8944_v57, %v2326_v38 }
 0x567   : > { %v8948_v49 = vpop.eup %8947  ;;  %v2327_v62 = vmul.f32 %v8946_v7, %v2323_v44 }
 0x568   : > { %v10551_v58 = vadd.f32 %v2334_v28, %v2330_v35  ;;  %v2329_v12 = vmul.f32 %v8948_v49, %v2325_v48 }
 0x569   : > { %v10565_v14 = vadd.f32 %v2331_v31, %v2327_v62 }
 0x56a   : > { %8090 = vmatprep.subr.mxu0 %v10551_v58  ;;  %v10555_v61 = vadd.f32 %v2333_v1, %v2329_v12 }
 0x56b   : > { %8091 = vmatpush3.msra.mxu0 %v10551_v58 }
 0x56c   : > { %8092 = vmatprep.subr.mxu0 %v10555_v61 }
 0x56d   : > { %8093 = vmatpush3.msra.mxu0 %v10555_v61 }
 0x56e   : > { %8094 = vmatprep.subr.mxu0 %v10560_v55 }
 0x56f   : > { %8095 = vmatpush3.msra.mxu0 %v10560_v55 }
 0x570   : > { %8096 = vmatprep.subr.mxu0 %v10565_v14 }
 0x571   : > { %8097 = vmatpush3.msra.mxu0 %v10565_v14 }
 0x572   : > { %8099 = vmatmul.mubr.msk.f32.vlgmr.msra.gmra.mxu0 %vm536_vm0, %v10333_v3  ;;  %v8074_v3 = vpop.f32.mrf.mxu1 }
 0x573   : > { %8101 = vmatprep.mubr.msk.f32.mxu0 %vm536_vm0, %v10340_v0 }
 0x574   : > { %v2410_v0 = vpop.f32.mrf.mxu1 }
 0x576   : > { %8102 = vmatmul.mubr.msk.f32.gmra.mxu0 %vm536_vm0, %v10347_v8  ;;  %v8077_v8 = vpop.f32.mrf.mxu1 }
 0x577   : > { %8104 = vmatprep.mubr.msk.f32.mxu0 %vm536_vm0, %v10354_v37 }
 0x578   : > { %v2420_v37 = vpop.f32.mrf.mxu1 }
 0x57a   : > { %8105 = vmatmul.mubr.msk.f32.gmra.mxu0 %vm536_vm0, %v10361_v13  ;;  %v8080_v13 = vpop.f32.mrf.mxu1 }
 0x57b   : > { %8107 = vmatprep.mubr.msk.f32.mxu0 %vm536_vm0, %v10368_v42  ;;  %v2416_v42 = vadd.f32 %v8074_v3, %v10172_v20  ;;  %v2436_v6 = vadd.f32 %v8080_v13, %v10197_v59 }
 0x57c   : > { %v2430_v9 = vpop.f32.mrf.mxu1 }
 0x57d   : > { %v2431_v57 = vadd.f32 %v2430_v9, %v10205_v4 }
 0x57e   : > { %8108 = vmatmul.mubr.msk.f32.gmra.mxu0 %vm536_vm0, %v10375_v18  ;;  %v8083_v47 = vpop.f32.mrf.mxu1 }
 0x57f   : > { %8110 = vmatprep.mubr.msk.f32.mxu0 %vm536_vm0, %v10382_v11  ;;  %v2411_v11 = vadd.f32 %v2410_v0, %v10180_v34  ;;  %v2446_v52 = vadd.f32 %v8083_v47, %v10186_v46 }
 0x580   : > { %v2440_v28 = vpop.f32.mrf.mxu1 }
 0x581   : > { %v2441_v12 = vadd.f32 %v2440_v28, %v10189_v50 }
 0x582   : > { %8111 = vmatmul.mubr.msk.f32.gmra.mxu0 %vm536_vm0, %v10389_v25 }
 0x583   : > { %8113 = vmatprep.mubr.msk.f32.mxu0 %vm536_vm0, %v10396_v15  ;;  %v2426_v15 = vadd.f32 %v8077_v8, %v10168_v16 }
 0x586   : > { %8114 = vmatmul.mubr.msk.f32.gmra.mxu0 %vm536_vm0, %v10403_v27 }
 0x587   : > { %8150 = vmatprep.mubr.msk.f32.mxu0 %vm536_vm0, %v10410_v32  ;;  %v2421_v32 = vadd.f32 %v2420_v37, %v10176_v26 }
 0x632   : > { %v8100_v18 = vpop.f32.mrf.mxu0 }
 0x633   : > { %v2595_v25 = vadd.f32 %v8100_v18, %v2416_v42 }
 0x634   : > { %v2535_v19 = vpop.f32.mrf.mxu0 }
 0x635   : > { %v6878_v29 = vmul.f32 -1.442695, %v2595_v25  ;;  %v2594_v27 = vadd.f32 %v2535_v19, %v2411_v11 }
 0x636   : > { %v8103_v54 = vpop.f32.mrf.mxu0 }
 0x637   : > { %8949 = vpow2.f32 %v6878_v29  ;;  %v6877_v5 = vmul.f32 -1.442695, %v2594_v27  ;;  %v2597_v17 = vadd.f32 %v8103_v54, %v2426_v15  ;;  %v8086_v15 = vpop.f32.mrf.mxu1 }
 0x638   : > { %v2545_v24 = vpop.f32.mrf.mxu0  ;;  %v2456_v28 = vadd.f32 %v8086_v15, %v10228_v2 }
 0x639   : > { %8951 = vpow2.f32 %v6877_v5  ;;  %v6880_v21 = vmul.f32 -1.442695, %v2597_v17  ;;  %v2596_v33 = vadd.f32 %v2545_v24, %v2421_v32  ;;  %v2450_v54 = vpop.f32.mrf.mxu1 }
 0x63a   : > { %v8106_v38 = vpop.f32.mrf.mxu0 }
 0x63b   : > { %8953 = vpow2.f32 %v6880_v21  ;;  %v6879_v7 = vmul.f32 -1.442695, %v2596_v33  ;;  %v2599_v35 = vadd.f32 %v8106_v38, %v2436_v6  ;;  %v8089_v21 = vpop.f32.mrf.mxu1 }
 0x63c   : > { %v2555_v48 = vpop.f32.mrf.mxu0 }
 0x63d   : > { %8955 = vpow2.f32 %v6879_v7  ;;  %v2598_v49 = vadd.f32 %v2555_v48, %v2431_v57  ;;  %v6882_v1 = vmul.f32 -1.442695, %v2599_v35 }
 0x63e   : > { %v8109_v44 = vpop.f32.mrf.mxu0 }
 0x63f   : > { %v2601_v43 = vadd.f32 %v8109_v44, %v2446_v52  ;;  %v6881_v22 = vmul.f32 -1.442695, %v2598_v49  ;;  %8957 = vpow2.f32 %v6882_v1 }
 0x640   : > { %v2565_v62 = vpop.f32.mrf.mxu0 }
 0x641   : > { %v6884_v31 = vmul.f32 -1.442695, %v2601_v43  ;;  %v2600_v3 = vadd.f32 %v2565_v62, %v2441_v12  ;;  %8959 = vpow2.f32 %v6881_v22  ;;  %v2451_v43 = vadd.f32 %v2450_v54, %v10240_v40  ;;  %v2460_v22 = vpop.f32.mrf.mxu1 }
 0x642   : > { %v8112_v9 = vpop.f32.mrf.mxu0 }
 0x643   : > { %v6883_v0 = vmul.f32 -1.442695, %v2600_v3  ;;  %8961 = vpow2.f32 %v6884_v31  ;;  %v2651_v24 = vadd.f32 %v8112_v9, %v10226_v60  ;;  %v2466_v31 = vadd.f32 %v8089_v21, %v10220_v45 }
 0x644   : > { %v8950_v8 = vpop.eup %8949  ;;  %v2575_v29 = vpop.f32.mrf.mxu0 }
 0x645   : > { %v2627_v37 = vadd.f32 1.0, %v8950_v8  ;;  %8963 = vpow2.f32 %v6883_v0  ;;  %v2650_v7 = vadd.f32 %v2575_v29, %v10233_v10 }
 0x646   : > { %v8952_v13 = vpop.eup %8951  ;;  %v8115_v17 = vpop.f32.mrf.mxu0 }
 0x647   : > { %8965 = vrcp.f32 %v2627_v37  ;;  %v2626_v42 = vadd.f32 1.0, %v8952_v13  ;;  %v2653_v12 = vadd.f32 %v8115_v17, %v10218_v39  ;;  %v2461_v13 = vadd.f32 %v2460_v22, %v10224_v56  ;;  %v10682_v22 = vld [vmem:[%s11901_s3 + $0x40] sm:$0xff] }
 0x648   : > { %v8954_v18 = vpop.eup %8953  ;;  %v2585_v52 = vpop.f32.mrf.mxu0 }
 0x649   : > { %8967 = vrcp.f32 %v2626_v42  ;;  %v2629_v11 = vadd.f32 1.0, %v8954_v18  ;;  %v2652_v0 = vadd.f32 %v2585_v52, %v10222_v51 }
 0x64a   : > { %v8956_v25 = vpop.eup %8955 }
 0x64b   : > { %8969 = vrcp.f32 %v2629_v11  ;;  %v2628_v19 = vadd.f32 1.0, %v8956_v25 }
 0x64c   : > { %v8958_v27 = vpop.eup %8957 }
 0x64d   : > { %8971 = vrcp.f32 %v2628_v19  ;;  %v2631_v33 = vadd.f32 1.0, %v8958_v27 }
 0x64e   : > { %v8960_v32 = vpop.eup %8959 }
 0x64f   : > { %v2630_v48 = vadd.f32 1.0, %v8960_v32  ;;  %8973 = vrcp.f32 %v2631_v33 }
 0x650   : > { %v8962_v5 = vpop.eup %8961 }
 0x651   : > { %v2633_v38 = vadd.f32 1.0, %v8962_v5 }
 0x652   : > { %v8964_v47 = vpop.eup %8963 }
 0x653   : > { %v2632_v49 = vadd.f32 1.0, %v8964_v47  ;;  %8975 = vrcp.f32 %v2633_v38 }
 0x654   : > { %v8966_v6 = vpop.eup %8965  ;;  %8977 = vrcp.f32 %v2630_v48 }
 0x655   : > { %v2655_v57 = vmul.f32 %v8966_v6, %v2651_v24  ;;  %8979 = vrcp.f32 %v2632_v49  ;;  %v10647_v49 = vld [vmem:[%s11901_s3 + $0x18] sm:$0xff] }
 0x656   : > { %v8968_v35 = vpop.eup %8967 }
 0x657   : > { %v2654_v44 = vmul.f32 %v8968_v35, %v2650_v7  ;;  %v2659_v62 = vadd.f32 %v2655_v57, %v2456_v28 }
 0x658   : > { %v8970_v1 = vpop.eup %8969 }
 0x659   : > { %v2657_v3 = vmul.f32 %v8970_v1, %v2653_v12  ;;  %v2658_v37 = vadd.f32 %v2654_v44, %v2451_v43  ;;  %8981 = vtanh.f32 %v2659_v62  ;;  %v10654_v44 = vld [vmem:[%s11901_s3 + $0x20] sm:$0xff]  ;;  %v10661_v12 = vld [vmem:[%s11901_s3 + $0x28] sm:$0xff]  ;;  %v10668_v1 = vld [vmem:[%s11901_s3 + $0x30] sm:$0xff] }
 0x65a   : > { %v8972_v8 = vpop.eup %8971  ;;  %v10675_v43 = vld [vmem:[%s11901_s3 + $0x38] sm:$0xff]  ;;  %v10689_v62 = vld [vmem:[%s11901_s3 + $0x48] sm:$0xff] }
 0x65b   : > { %v2661_v42 = vadd.f32 %v2657_v3, %v2466_v31  ;;  %v2656_v18 = vmul.f32 %v8972_v8, %v2652_v0  ;;  %v10696_v31 = vld [vmem:[%s11901_s3 + $0x50] sm:$0xff]  ;;  %v10703_v3 = vld [vmem:[%s11901_s3 + $0x58] sm:$0xff]  ;;  %v9412_v0 = vld [vmem:[%s11901_s3] sm:$0xff]  ;;  %v8126_v8 = vpop.f32.mrf.mxu1 }
 0x65c   : > { %v8974_v25 = vpop.eup %8973 }
 0x65d   : > { %8983 = vtanh.f32 %v2661_v42  ;;  %v2660_v11 = vadd.f32 %v2656_v18, %v2461_v13  ;;  %v2667_v24 = vsub.f32 1.0, %v8974_v25  ;;  %v2675_v28 = vmul.f32 %v8974_v25, %v10560_v55  ;;  %v10633_v55 = vld [vmem:[%s11901_s3 + $0x8] sm:$0xff] }
 0x65e   : > { %8985 = vtanh.f32 %v2658_v37  ;;  %v2753_v37 = vpop.f32.mrf.mxu1 }
 0x65f   : > { %8987 = vtanh.f32 %v2660_v11  ;;  %v2759_v11 = vadd.f32 %v8126_v8, %v10172_v20 }
 0x660   : > { %v8976_v9 = vpop.eup %8975  ;;  %v8129_v13 = vpop.f32.mrf.mxu1 }
 0x661   : > { %v8978_v19 = vpop.eup %8977  ;;  %v2669_v27 = vsub.f32 1.0, %v8976_v9  ;;  %v2677_v17 = vmul.f32 %v8976_v9, %v10551_v58  ;;  %v2754_v9 = vadd.f32 %v2753_v37, %v10180_v34 }
 0x662   : > { %v8980_v15 = vpop.eup %8979  ;;  %v2666_v21 = vsub.f32 1.0, %v8978_v19  ;;  %v2674_v52 = vmul.f32 %v8978_v19, %v10565_v14  ;;  %v10640_v14 = vld [vmem:[%s11901_s3 + $0x10] sm:$0xff]  ;;  %v2763_v42 = vpop.f32.mrf.mxu1 }
 0x663   : > { %v2668_v47 = vsub.f32 1.0, %v8980_v15  ;;  %v2676_v57 = vmul.f32 %v8980_v15, %v10555_v61 }
 0x664   : > { %v8132_v18 = vpop.f32.mrf.mxu1 }
 0x666   : > { %v8982_v29 = vpop.eup %8981  ;;  %v2773_v15 = vpop.f32.mrf.mxu1 }
 0x667   : > { %v2671_v7 = vmul.f32 %v8982_v29, %v2667_v24 }
 0x669   : > { %v10620_v58 = vadd.f32 %v2675_v28, %v2671_v7 }
 0x66a   : > { %v8984_v54 = vpop.eup %8983 }
 0x66b   : > { %v8986_v32 = vpop.eup %8985  ;;  %v2673_v5 = vmul.f32 %v8984_v54, %v2669_v27  ;;  %v2769_v27 = vadd.f32 %v8129_v13, %v10168_v16 }
 0x66c   : > { %v8988_v6 = vpop.eup %8987  ;;  %v2670_v48 = vmul.f32 %v8986_v32, %v2666_v21 }
 0x66d   : > { %v10611_v33 = vadd.f32 %v2677_v17, %v2673_v5  ;;  %v2672_v38 = vmul.f32 %v8988_v6, %v2668_v47  ;;  %v2764_v17 = vadd.f32 %v2763_v42, %v10176_v26  ;;  %v8135_v6 = vpop.f32.mrf.mxu1 }
 0x66e   : > { %v10625_v61 = vadd.f32 %v2674_v52, %v2670_v48  ;;  %v2774_v48 = vadd.f32 %v2773_v15, %v10205_v4  ;;  %v2789_v13 = vadd.f32 %v8135_v6, %v10186_v46 }
 0x66f   : > { %8142 = vmatprep.subr.mxu0 %v10611_v33  ;;  %v10615_v35 = vadd.f32 %v2676_v57, %v2672_v38  ;;  %v2779_v38 = vadd.f32 %v8132_v18, %v10197_v59  ;;  %v2783_v8 = vpop.f32.mrf.mxu1 }
 0x670   : > { %8143 = vmatpush3.msra.mxu0 %v10611_v33 }
 0x671   : > { %8144 = vmatprep.subr.mxu0 %v10615_v35 }
 0x672   : > { %8145 = vmatpush3.msra.mxu0 %v10615_v35 }
 0x673   : > { %8146 = vmatprep.subr.mxu0 %v10620_v58 }
 0x674   : > { %8147 = vmatpush3.msra.mxu0 %v10620_v58 }
 0x675   : > { %8148 = vmatprep.subr.mxu0 %v10625_v61 }
 0x676   : > { %8149 = vmatpush3.msra.mxu0 %v10625_v61 }
 0x677   : > { %8151 = vmatmul.mubr.msk.f32.vlgmr.msra.gmra.mxu0 %vm536_vm0, %v10633_v55 }
 0x678   : > { %8153 = vmatprep.mubr.msk.f32.mxu0 %vm536_vm0, %v10640_v14 }
 0x67b   : > { %8154 = vmatmul.mubr.msk.f32.gmra.mxu0 %vm536_vm0, %v10647_v49 }
 0x67c   : > { %8156 = vmatprep.mubr.msk.f32.mxu0 %vm536_vm0, %v10654_v44 }
 0x67f   : > { %8157 = vmatmul.mubr.msk.f32.gmra.mxu0 %vm536_vm0, %v10661_v12 }
 0x680   : > { %8159 = vmatprep.mubr.msk.f32.mxu0 %vm536_vm0, %v10668_v1 }
 0x683   : > { %8160 = vmatmul.mubr.msk.f32.gmra.mxu0 %vm536_vm0, %v10675_v43 }
 0x684   : > { %8162 = vmatprep.mubr.msk.f32.mxu0 %vm536_vm0, %v10682_v22 }
 0x687   : > { %8163 = vmatmul.mubr.msk.f32.gmra.mxu0 %vm536_vm0, %v10689_v62 }
 0x688   : > { %8165 = vmatprep.mubr.msk.f32.mxu0 %vm536_vm0, %v10696_v31 }
 0x68b   : > { %8166 = vmatmul.mubr.msk.f32.gmra.mxu0 %vm536_vm0, %v10703_v3 }
 0x68c   : > { %8202 = vmatprep.mubr.msk.f32.mxu0 %vm536_vm0, %v9412_v0 }
 0x737   : > { %v8152_v25 = vpop.f32.mrf.mxu0 }
 0x738   : > { %v2938_v19 = vadd.f32 %v8152_v25, %v2759_v11  ;;  %v2784_v25 = vadd.f32 %v2783_v8, %v10189_v50 }
 0x739   : > { %v2878_v29 = vpop.f32.mrf.mxu0 }
 0x73a   : > { %v6914_v54 = vmul.f32 -1.442695, %v2938_v19  ;;  %v2937_v32 = vadd.f32 %v2878_v29, %v2754_v9 }
 0x73b   : > { %v8155_v5 = vpop.f32.mrf.mxu0 }
 0x73c   : > { %8989 = vpow2.f32 %v6914_v54  ;;  %v6913_v47 = vmul.f32 -1.442695, %v2937_v32  ;;  %v2940_v24 = vadd.f32 %v8155_v5, %v2769_v27 }
 0x73d   : > { %v2888_v21 = vpop.f32.mrf.mxu0 }
 0x73e   : > { %8991 = vpow2.f32 %v6913_v47  ;;  %v6916_v57 = vmul.f32 -1.442695, %v2940_v24  ;;  %v2939_v7 = vadd.f32 %v2888_v21, %v2764_v17 }
 0x73f   : > { %v8158_v28 = vpop.f32.mrf.mxu0 }
 0x740   : > { %8993 = vpow2.f32 %v6916_v57  ;;  %v6915_v52 = vmul.f32 -1.442695, %v2939_v7  ;;  %v2942_v0 = vadd.f32 %v8158_v28, %v2779_v38  ;;  %v8138_v7 = vpop.f32.mrf.mxu1 }
 0x741   : > { %v2898_v37 = vpop.f32.mrf.mxu0 }
 0x742   : > { %8995 = vpow2.f32 %v6915_v52  ;;  %v2941_v42 = vadd.f32 %v2898_v37, %v2774_v48  ;;  %v6918_v9 = vmul.f32 -1.442695, %v2942_v0  ;;  %v2793_v52 = vpop.f32.mrf.mxu1 }
 0x743   : > { %v8161_v11 = vpop.f32.mrf.mxu0 }
 0x744   : > { %v2944_v18 = vadd.f32 %v8161_v11, %v2789_v13  ;;  %v6917_v19 = vmul.f32 -1.442695, %v2941_v42  ;;  %8997 = vpow2.f32 %v6918_v9 }
 0x745   : > { %v2908_v29 = vpop.f32.mrf.mxu0 }
 0x746   : > { %v6920_v27 = vmul.f32 -1.442695, %v2944_v18  ;;  %v2943_v54 = vadd.f32 %v2908_v29, %v2784_v25  ;;  %8999 = vpow2.f32 %v6917_v19  ;;  %v8141_v25 = vpop.f32.mrf.mxu1 }
 0x747   : > { %v8164_v38 = vpop.f32.mrf.mxu0 }
 0x748   : > { %v6919_v15 = vmul.f32 -1.442695, %v2943_v54  ;;  %9001 = vpow2.f32 %v6920_v27  ;;  %v2994_v42 = vadd.f32 %v8164_v38, %v10226_v60  ;;  %v2799_v54 = vadd.f32 %v8138_v7, %v10228_v2 }
 0x749   : > { %v8990_v32 = vpop.eup %8989  ;;  %v2918_v28 = vpop.f32.mrf.mxu0 }
 0x74a   : > { %v2970_v5 = vadd.f32 1.0, %v8990_v32  ;;  %9003 = vpow2.f32 %v6919_v15  ;;  %v2993_v29 = vadd.f32 %v2918_v28, %v10233_v10 }
 0x74b   : > { %v8992_v17 = vpop.eup %8991  ;;  %v8167_v37 = vpop.f32.mrf.mxu0 }
 0x74c   : > { %9005 = vrcp.f32 %v2970_v5  ;;  %v2969_v47 = vadd.f32 1.0, %v8992_v17 }
 0x74d   : > { %v8994_v24 = vpop.eup %8993  ;;  %v2928_v32 = vpop.f32.mrf.mxu0 }
 0x74e   : > { %9007 = vrcp.f32 %v2969_v47  ;;  %v2972_v6 = vadd.f32 1.0, %v8994_v24  ;;  %v2996_v47 = vadd.f32 %v8167_v37, %v10218_v39  ;;  %v2995_v28 = vadd.f32 %v2928_v32, %v10222_v51 }
 0x74f   : > { %v8996_v21 = vpop.eup %8995 }
 0x750   : > { %9009 = vrcp.f32 %v2972_v6  ;;  %v2971_v57 = vadd.f32 1.0, %v8996_v21  ;;  %v2794_v6 = vadd.f32 %v2793_v52, %v10240_v40  ;;  %v2803_v21 = vpop.f32.mrf.mxu1 }
 0x751   : > { %v8998_v48 = vpop.eup %8997 }
 0x752   : > { %9011 = vrcp.f32 %v2971_v57  ;;  %v2974_v9 = vadd.f32 1.0, %v8998_v48  ;;  %v2809_v57 = vadd.f32 %v8141_v25, %v10220_v45 }
 0x753   : > { %v9000_v0 = vpop.eup %8999 }
 0x754   : > { %v2973_v15 = vadd.f32 1.0, %v9000_v0  ;;  %9013 = vrcp.f32 %v2974_v9  ;;  %v2804_v0 = vadd.f32 %v2803_v21, %v10224_v56 }
 0x755   : > { %v9002_v8 = vpop.eup %9001 }
 0x756   : > { %v2976_v18 = vadd.f32 1.0, %v9002_v8 }
 0x757   : > { %v9004_v13 = vpop.eup %9003 }
 0x758   : > { %v2975_v5 = vadd.f32 1.0, %v9004_v13  ;;  %9015 = vrcp.f32 %v2976_v18 }
 0x759   : > { %v9006_v11 = vpop.eup %9005  ;;  %9017 = vrcp.f32 %v2973_v15 }
 0x75a   : > { %v2998_v19 = vmul.f32 %v9006_v11, %v2994_v42  ;;  %9019 = vrcp.f32 %v2975_v5 }
 0x75b   : > { %v9008_v27 = vpop.eup %9007 }
 0x75c   : > { %v2997_v17 = vmul.f32 %v9008_v27, %v2993_v29  ;;  %v3002_v38 = vadd.f32 %v2998_v19, %v2799_v54 }
 0x75d   : > { %v9010_v24 = vpop.eup %9009 }
 0x75e   : > { %v3000_v48 = vmul.f32 %v9010_v24, %v2996_v47  ;;  %v3001_v7 = vadd.f32 %v2997_v17, %v2794_v6  ;;  %9021 = vtanh.f32 %v3002_v38 }
 0x75f   : > { %v9012_v8 = vpop.eup %9011 }
 0x760   : > { %v3004_v13 = vadd.f32 %v3000_v48, %v2809_v57  ;;  %v2999_v37 = vmul.f32 %v9012_v8, %v2995_v28 }
 0x761   : > { %v9014_v42 = vpop.eup %9013 }
 0x762   : > { %9023 = vtanh.f32 %v3004_v13  ;;  %v3003_v52 = vadd.f32 %v2999_v37, %v2804_v0  ;;  %v3010_v5 = vsub.f32 1.0, %v9014_v42  ;;  %v3018_v48 = vmul.f32 %v9014_v42, %v10620_v58  ;;  %v10746_v58 = vld [vmem:[%s9719_s17 + $0x30] sm:$0xff]  ;;  %v10765_v0 = vld [vmem:[%s9719_s17] sm:$0xff]  ;;  %v10821_v13 = vld [vmem:[%s11900_s2 + $0x8] sm:$0xff] }
 0x763   : > { %9025 = vtanh.f32 %v3001_v7  ;;  %v10751_v7 = vld [vmem:[%s9719_s17 + $0x20] sm:$0xff]  ;;  %v10828_v37 = vld [vmem:[%s11900_s2 + $0x10] sm:$0xff]  ;;  %v7029_v42 = vld [vmem:[%s9722_s25 + $0x88] sm:$0xff] }
 0x764   : > { %9027 = vtanh.f32 %v3003_v52  ;;  %v7030_v52 = vld [vmem:[%s9722_s25 + $0x98] sm:$0xff] }
 0x765   : > { %v9016_v11 = vpop.eup %9015 }
 0x766   : > { %v9018_v25 = vpop.eup %9017  ;;  %v3012_v19 = vsub.f32 1.0, %v9016_v11  ;;  %v3020_v15 = vmul.f32 %v9016_v11, %v10611_v33  ;;  %v10837_v11 = vld [vmem:[%s11900_s2 + $0x18] sm:$0xff] }
 0x767   : > { %v9020_v9 = vpop.eup %9019  ;;  %v3009_v47 = vsub.f32 1.0, %v9018_v25  ;;  %v3017_v8 = vmul.f32 %v9018_v25, %v10625_v61  ;;  %v10760_v61 = vld [vmem:[%s9719_s17 + $0x10] sm:$0xff]  ;;  %v10844_v25 = vld [vmem:[%s11900_s2 + $0x20] sm:$0xff] }
 0x768   : > { %v3011_v32 = vsub.f32 1.0, %v9020_v9  ;;  %v3019_v21 = vmul.f32 %v9020_v9, %v10615_v35  ;;  %v7068_v9 = vld [vmem:[%s9722_s25 + $0xf8] sm:$0xff] }
 0x76b   : > { %v9022_v18 = vpop.eup %9021 }
 0x76c   : > { %v3014_v38 = vmul.f32 %v9022_v18, %v3010_v5  ;;  %v10852_v18 = vld [vmem:[%s11900_s2 + $0x28] sm:$0xff] }
 0x76d   : > { %v7067_v5 = vld [vmem:[%s9722_s25 + $0xe8] sm:$0xff] }
 0x76e   : > { %v10737_v33 = vadd.f32 %v3018_v48, %v3014_v38  ;;  %v7102_v38 = vld [vmem:[%s9722_s25 + $0x118] sm:$0xff]  ;;  %v7101_v48 = vld [vmem:[%s9722_s25 + $0x108] sm:$0xff] }
 0x76f   : > { %v9024_v29 = vpop.eup %9023 }
 0x770   : > { %v9026_v27 = vpop.eup %9025  ;;  %v3016_v54 = vmul.f32 %v9024_v29, %v3012_v19  ;;  %v10859_v19 = vld [vmem:[%s11900_s2 + $0x30] sm:$0xff]  ;;  %v10866_v29 = vld [vmem:[%s11900_s2 + $0x38] sm:$0xff] }
 0x771   : > { %v9028_v17 = vpop.eup %9027  ;;  %v3013_v28 = vmul.f32 %v9026_v27, %v3009_v47  ;;  %v10873_v27 = vld [vmem:[%s11900_s2 + $0x40] sm:$0xff]  ;;  %v7065_v47 = vld [vmem:[%s9722_s25 + $0xc8] sm:$0xff] }
 0x772   : > { %v10728_v24 = vadd.f32 %v3020_v15, %v3016_v54  ;;  %v3015_v6 = vmul.f32 %v9028_v17, %v3011_v32  ;;  %v10880_v54 = vld [vmem:[%s11900_s2 + $0x48] sm:$0xff]  ;;  %v10887_v15 = vld [vmem:[%s11900_s2 + $0x50] sm:$0xff]  ;;  %v10894_v32 = vld [vmem:[%s11900_s2 + $0x58] sm:$0xff] }
 0x773   : > { %v10742_v35 = vadd.f32 %v3017_v8, %v3013_v28  ;;  %v7066_v17 = vld [vmem:[%s9722_s25 + $0xd8] sm:$0xff]  ;;  %v7139_v8 = vld [vmem:[%s9722_s25 + $0x168] sm:$0xff] }
 0x774   : > { %8194 = vmatprep.subr.mxu0 %v10728_v24  ;;  %v10732_v57 = vadd.f32 %v3019_v21, %v3015_v6  ;;  %v7104_v6 = vld [vmem:[%s9722_s25 + $0x138] sm:$0xff]  ;;  %v7103_v21 = vld [vmem:[%s9722_s25 + $0x128] sm:$0xff] }
 0x775   : > { %8195 = vmatpush3.msra.mxu0 %v10728_v24  ;;  %v7140_v28 = vld [vmem:[%s9722_s25 + $0x178] sm:$0xff] }
 0x776   : > { %8196 = vmatprep.subr.mxu0 %v10732_v57 }
 0x777   : > { %8197 = vmatpush3.msra.mxu0 %v10732_v57 }
 0x778   : > { %8198 = vmatprep.subr.mxu0 %v10737_v33 }
 0x779   : > { %8199 = vmatpush3.msra.mxu0 %v10737_v33 }
 0x77a   : > { %8200 = vmatprep.subr.mxu0 %v10742_v35 }
 0x77b   : > { %8201 = vmatpush3.msra.mxu0 %v10742_v35 }
 0x77c   : > { %8203 = vmatmul.mubr.msk.f32.vlgmr.msra.gmra.mxu0 %vm536_vm0, %v10633_v55  ;;  %8240 = vmatprep.subr.mxu0 %v10746_v58  ;;  %v6996_v55 = vld [vmem:[%s9722_s25 + $0x78] sm:$0xff] }
 0x77d   : > { %8205 = vmatprep.mubr.msk.f32.mxu0 %vm536_vm0, %v10640_v14  ;;  %8241 = vmatpush3.msra.mxu0 %v10746_v58  ;;  %v448_v14 = vld [vmem:[%s11904_s6] sm:$0xff] }
 0x77e   : > { %8242 = vmatprep.subr.mxu0 %v10751_v7 }
 0x77f   : > { %8243 = vmatpush3.msra.mxu0 %v10751_v7 }
 0x780   : > { %8206 = vmatmul.mubr.msk.f32.gmra.mxu0 %vm536_vm0, %v10647_v49  ;;  %8244 = vmatprep.subr.mxu0 %v10760_v61  ;;  %v449_v49 = vld [vmem:[%s11904_s6 + $0x8] sm:$0xff] }
 0x781   : > { %8208 = vmatprep.mubr.msk.f32.mxu0 %vm536_vm0, %v10654_v44  ;;  %8245 = vmatpush3.msra.mxu0 %v10760_v61  ;;  %v450_v44 = vld [vmem:[%s11904_s6 + $0x10] sm:$0xff] }
 0x782   : > { %8246 = vmatprep.subr.mxu0 %v10765_v0 }
 0x783   : > { %8247 = vmatpush3.msra.mxu0 %v10765_v0 }
 0x784   : > { %8209 = vmatmul.mubr.msk.f32.gmra.mxu0 %vm536_vm0, %v10661_v12  ;;  %8286 = vmatprep.subr.mxu0 %v6996_v55  ;;  %v6995_v12 = vld [vmem:[%s9722_s25 + $0x68] sm:$0xff] }
 0x785   : > { %8211 = vmatprep.mubr.msk.f32.mxu0 %vm536_vm0, %v10668_v1  ;;  %v451_v1 = vld [vmem:[%s11904_s6 + $0x18] sm:$0xff] }
 0x788   : > { %8212 = vmatmul.mubr.msk.f32.gmra.mxu0 %vm536_vm0, %v10675_v43  ;;  %v6994_v43 = vld [vmem:[%s9722_s25 + $0x58] sm:$0xff] }
 0x789   : > { %8214 = vmatprep.mubr.msk.f32.mxu0 %vm536_vm0, %v10682_v22  ;;  %v6993_v22 = vld [vmem:[%s9722_s25 + $0x48] sm:$0xff] }
 0x78c   : > { %8215 = vmatmul.mubr.msk.f32.gmra.mxu0 %vm536_vm0, %v10689_v62  ;;  %v10812_v62 = vld [vmem:[%s11900_s2] sm:$0xff] }
 0x78d   : > { %8217 = vmatprep.mubr.msk.f32.mxu0 %vm536_vm0, %v10696_v31  ;;  %v7032_v31 = vld [vmem:[%s9722_s25 + $0xb8] sm:$0xff] }
 0x790   : > { %8218 = vmatmul.mubr.msk.f32.gmra.mxu0 %vm536_vm0, %v10703_v3  ;;  %v7031_v3 = vld [vmem:[%s9722_s25 + $0xa8] sm:$0xff] }
 0x791   : > { %8248 = vmatprep.mubr.msk.f32.mxu0 %vm536_vm0, %v448_v14  ;;  %v7137_v14 = vld [vmem:[%s9722_s25 + $0x148] sm:$0xff] }
 0x794   : > { %8249 = vmatmul.mubr.msk.f32.vlgmr.msra.gmra.mxu0 %vm536_vm0, %v449_v49  ;;  %v7176_v49 = vld [vmem:[%s9722_s25 + $0x1b8] sm:$0xff] }
 0x795   : > { %8287 = vmatpush3.msra.mxu0 %v6996_v55  ;;  %8251 = vmatprep.mubr.msk.f32.mxu0 %vm536_vm0, %v450_v44  ;;  %v7138_v55 = vld [vmem:[%s9722_s25 + $0x158] sm:$0xff]  ;;  %v7175_v44 = vld [vmem:[%s9722_s25 + $0x1a8] sm:$0xff] }
 0x796   : > { %8288 = vmatprep.subr.mxu0 %v6995_v12 }
 0x797   : > { %8289 = vmatpush3.msra.mxu0 %v6995_v12  ;;  %v7174_v12 = vld [vmem:[%s9722_s25 + $0x198] sm:$0xff] }
 0x798   : > { %8252 = vmatmul.mubr.msk.f32.gmra.mxu0 %vm536_vm0, %v451_v1  ;;  %8290 = vmatprep.subr.mxu0 %v6994_v43  ;;  %v7173_v1 = vld [vmem:[%s9722_s25 + $0x188] sm:$0xff] }
 0x799   : > { %8291 = vmatpush3.msra.mxu0 %v6994_v43  ;;  %8294 = vmatprep.mubr.msk.f32.mxu0 %vm536_vm0, %v10812_v62  ;;  %v10996_v43 = vld [vmem:[%s11905_s7] sm:$0xff] }
 0x79a   : > { %8292 = vmatprep.subr.mxu0 %v6993_v22  ;;  %8228 = vmatprep.mubr.msk.f32.mxu1 %vm536_vm0, %v10996_v43 }
 0x79b   : > { %8293 = vmatpush3.msra.mxu0 %v6993_v22  ;;  %v7212_v22 = vld [vmem:[%s9722_s25 + $0x1f8] sm:$0xff] }
 0x79c   : > { %8295 = vmatmul.mubr.msk.f32.vlgmr.msra.gmra.mxu0 %vm536_vm0, %v10821_v13  ;;  %8338 = vmatprep.subr.mxu0 %v7032_v31 }
 0x79d   : > { %8297 = vmatprep.mubr.msk.f32.mxu0 %vm536_vm0, %v10828_v37  ;;  %8339 = vmatpush3.msra.mxu0 %v7032_v31  ;;  %v7211_v31 = vld [vmem:[%s9722_s25 + $0x1e8] sm:$0xff] }
 0x79e   : > { %8340 = vmatprep.subr.mxu0 %v7031_v3 }
 0x79f   : > { %8341 = vmatpush3.msra.mxu0 %v7031_v3  ;;  %v7210_v3 = vld [vmem:[%s9722_s25 + $0x1d8] sm:$0xff] }
 0x7a0   : > { %8298 = vmatmul.mubr.msk.f32.gmra.mxu0 %vm536_vm0, %v10837_v11  ;;  %8342 = vmatprep.subr.mxu0 %v7030_v52 }
 0x7a1   : > { %8300 = vmatprep.mubr.msk.f32.mxu0 %vm536_vm0, %v10844_v25  ;;  %8343 = vmatpush3.msra.mxu0 %v7030_v52  ;;  %v7209_v52 = vld [vmem:[%s9722_s25 + $0x1c8] sm:$0xff] }
 0x7a2   : > { %8344 = vmatprep.subr.mxu0 %v7029_v42 }
 0x7a3   : > { %8345 = vmatpush3.msra.mxu0 %v7029_v42  ;;  %v8178_v42 = vpop.f32.mrf.mxu1 }
 0x7a4   : > { %8301 = vmatmul.mubr.msk.f32.gmra.mxu0 %vm536_vm0, %v10852_v18  ;;  %8390 = vmatprep.subr.mxu0 %v7068_v9 }
 0x7a5   : > { %8303 = vmatprep.mubr.msk.f32.mxu0 %vm536_vm0, %v10859_v19 }
 0x7a8   : > { %8304 = vmatmul.mubr.msk.f32.gmra.mxu0 %vm536_vm0, %v10866_v29 }
 0x7a9   : > { %8306 = vmatprep.mubr.msk.f32.mxu0 %vm536_vm0, %v10873_v27 }
 0x7ac   : > { %8307 = vmatmul.mubr.msk.f32.gmra.mxu0 %vm536_vm0, %v10880_v54 }
 0x7ad   : > { %8309 = vmatprep.mubr.msk.f32.mxu0 %vm536_vm0, %v10887_v15 }
 0x7b0   : > { %8310 = vmatmul.mubr.msk.f32.gmra.mxu0 %vm536_vm0, %v10894_v32 }
 0x7b1   : > { %8346 = vmatprep.mubr.msk.f32.mxu0 %vm536_vm0, %v10812_v62 }
 0x7b4   : > { %8347 = vmatmul.mubr.msk.f32.vlgmr.msra.gmra.mxu0 %vm536_vm0, %v10821_v13 }
 0x7b5   : > { %8349 = vmatprep.mubr.msk.f32.mxu0 %vm536_vm0, %v10828_v37  ;;  %8391 = vmatpush3.msra.mxu0 %v7068_v9  ;;  %v3096_v9 = vpop.f32.mrf.mxu1 }
 0x7b6   : > { %8392 = vmatprep.subr.mxu0 %v7067_v5 }
 0x7b7   : > { %8393 = vmatpush3.msra.mxu0 %v7067_v5  ;;  %v8181_v5 = vpop.f32.mrf.mxu1 }
 0x7b8   : > { %8350 = vmatmul.mubr.msk.f32.gmra.mxu0 %vm536_vm0, %v10837_v11  ;;  %8394 = vmatprep.subr.mxu0 %v7066_v17 }
 0x7b9   : > { %8352 = vmatprep.mubr.msk.f32.mxu0 %vm536_vm0, %v10844_v25  ;;  %8395 = vmatpush3.msra.mxu0 %v7066_v17  ;;  %v3106_v17 = vpop.f32.mrf.mxu1 }
 0x7ba   : > { %8396 = vmatprep.subr.mxu0 %v7065_v47 }
 0x7bb   : > { %8397 = vmatpush3.msra.mxu0 %v7065_v47  ;;  %v8184_v47 = vpop.f32.mrf.mxu1 }
 0x7bc   : > { %8353 = vmatmul.mubr.msk.f32.gmra.mxu0 %vm536_vm0, %v10852_v18  ;;  %8442 = vmatprep.subr.mxu0 %v7104_v6 }
 0x7bd   : > { %8355 = vmatprep.mubr.msk.f32.mxu0 %vm536_vm0, %v10859_v19 }
 0x7c0   : > { %8356 = vmatmul.mubr.msk.f32.gmra.mxu0 %vm536_vm0, %v10866_v29 }
 0x7c1   : > { %8358 = vmatprep.mubr.msk.f32.mxu0 %vm536_vm0, %v10873_v27 }
 0x7c4   : > { %8359 = vmatmul.mubr.msk.f32.gmra.mxu0 %vm536_vm0, %v10880_v54 }
 0x7c5   : > { %8361 = vmatprep.mubr.msk.f32.mxu0 %vm536_vm0, %v10887_v15 }
 0x7c8   : > { %8362 = vmatmul.mubr.msk.f32.gmra.mxu0 %vm536_vm0, %v10894_v32 }
 0x7c9   : > { %8398 = vmatprep.mubr.msk.f32.mxu0 %vm536_vm0, %v10812_v62 }
 0x7cc   : > { %8399 = vmatmul.mubr.msk.f32.vlgmr.msra.gmra.mxu0 %vm536_vm0, %v10821_v13 }
 0x7cd   : > { %8401 = vmatprep.mubr.msk.f32.mxu0 %vm536_vm0, %v10828_v37  ;;  %8443 = vmatpush3.msra.mxu0 %v7104_v6  ;;  %v3102_v6 = vadd.f32 %v8178_v42, %v10172_v20 }
 0x7ce   : > { %8444 = vmatprep.subr.mxu0 %v7103_v21 }
 0x7cf   : > { %8445 = vmatpush3.msra.mxu0 %v7103_v21 }
 0x7d0   : > { %8402 = vmatmul.mubr.msk.f32.gmra.mxu0 %vm536_vm0, %v10837_v11  ;;  %8446 = vmatprep.subr.mxu0 %v7102_v38 }
 0x7d1   : > { %8404 = vmatprep.mubr.msk.f32.mxu0 %vm536_vm0, %v10844_v25  ;;  %8447 = vmatpush3.msra.mxu0 %v7102_v38  ;;  %v3097_v38 = vadd.f32 %v3096_v9, %v10180_v34 }
 0x7d2   : > { %8448 = vmatprep.subr.mxu0 %v7101_v48 }
 0x7d3   : > { %8449 = vmatpush3.msra.mxu0 %v7101_v48 }
 0x7d4   : > { %8405 = vmatmul.mubr.msk.f32.gmra.mxu0 %vm536_vm0, %v10852_v18  ;;  %8494 = vmatprep.subr.mxu0 %v7140_v28 }
 0x7d5   : > { %8407 = vmatprep.mubr.msk.f32.mxu0 %vm536_vm0, %v10859_v19 }
 0x7d8   : > { %8408 = vmatmul.mubr.msk.f32.gmra.mxu0 %vm536_vm0, %v10866_v29 }
 0x7d9   : > { %8410 = vmatprep.mubr.msk.f32.mxu0 %vm536_vm0, %v10873_v27 }
 0x7dc   : > { %8411 = vmatmul.mubr.msk.f32.gmra.mxu0 %vm536_vm0, %v10880_v54 }
 0x7dd   : > { %8413 = vmatprep.mubr.msk.f32.mxu0 %vm536_vm0, %v10887_v15 }
 0x7e0   : > { %8414 = vmatmul.mubr.msk.f32.gmra.mxu0 %vm536_vm0, %v10894_v32 }
 0x7e1   : > { %8450 = vmatprep.mubr.msk.f32.mxu0 %vm536_vm0, %v10812_v62 }
 0x7e4   : > { %8451 = vmatmul.mubr.msk.f32.vlgmr.msra.gmra.mxu0 %vm536_vm0, %v10821_v13 }
 0x7e5   : > { %8453 = vmatprep.mubr.msk.f32.mxu0 %vm536_vm0, %v10828_v37  ;;  %8495 = vmatpush3.msra.mxu0 %v7140_v28  ;;  %v3116_v28 = vpop.f32.mrf.mxu1 }
 0x7e6   : > { %8496 = vmatprep.subr.mxu0 %v7139_v8 }
 0x7e7   : > { %8497 = vmatpush3.msra.mxu0 %v7139_v8 }
 0x7e8   : > { %8454 = vmatmul.mubr.msk.f32.gmra.mxu0 %vm536_vm0, %v10837_v11  ;;  %8498 = vmatprep.subr.mxu0 %v7138_v55 }
 0x7e9   : > { %8456 = vmatprep.mubr.msk.f32.mxu0 %vm536_vm0, %v10844_v25  ;;  %8499 = vmatpush3.msra.mxu0 %v7138_v55  ;;  %v3112_v55 = vadd.f32 %v8181_v5, %v10168_v16 }
 0x7ea   : > { %8500 = vmatprep.subr.mxu0 %v7137_v14 }
 0x7eb   : > { %8501 = vmatpush3.msra.mxu0 %v7137_v14 }
 0x7ec   : > { %8457 = vmatmul.mubr.msk.f32.gmra.mxu0 %vm536_vm0, %v10852_v18  ;;  %8546 = vmatprep.subr.mxu0 %v7176_v49 }
 0x7ed   : > { %8459 = vmatprep.mubr.msk.f32.mxu0 %vm536_vm0, %v10859_v19 }
 0x7f0   : > { %8460 = vmatmul.mubr.msk.f32.gmra.mxu0 %vm536_vm0, %v10866_v29 }
 0x7f1   : > { %8462 = vmatprep.mubr.msk.f32.mxu0 %vm536_vm0, %v10873_v27 }
 0x7f4   : > { %8463 = vmatmul.mubr.msk.f32.gmra.mxu0 %vm536_vm0, %v10880_v54 }
 0x7f5   : > { %8465 = vmatprep.mubr.msk.f32.mxu0 %vm536_vm0, %v10887_v15 }
 0x7f8   : > { %8466 = vmatmul.mubr.msk.f32.gmra.mxu0 %vm536_vm0, %v10894_v32 }
 0x7f9   : > { %8502 = vmatprep.mubr.msk.f32.mxu0 %vm536_vm0, %v10812_v62 }
 0x7fc   : > { %8503 = vmatmul.mubr.msk.f32.vlgmr.msra.gmra.mxu0 %vm536_vm0, %v10821_v13 }
 0x7fd   : > { %8505 = vmatprep.mubr.msk.f32.mxu0 %vm536_vm0, %v10828_v37  ;;  %8547 = vmatpush3.msra.mxu0 %v7176_v49 }
 0x7fe   : > { %8548 = vmatprep.subr.mxu0 %v7175_v44 }
 0x7ff   : > { %8549 = vmatpush3.msra.mxu0 %v7175_v44 }
 0x800   : > { %8506 = vmatmul.mubr.msk.f32.gmra.mxu0 %vm536_vm0, %v10837_v11  ;;  %8550 = vmatprep.subr.mxu0 %v7174_v12 }
 0x801   : > { %8508 = vmatprep.mubr.msk.f32.mxu0 %vm536_vm0, %v10844_v25  ;;  %8551 = vmatpush3.msra.mxu0 %v7174_v12  ;;  %v3107_v12 = vadd.f32 %v3106_v17, %v10176_v26 }
 0x802   : > { %8552 = vmatprep.subr.mxu0 %v7173_v1 }
 0x803   : > { %8553 = vmatpush3.msra.mxu0 %v7173_v1 }
 0x804   : > { %8509 = vmatmul.mubr.msk.f32.gmra.mxu0 %vm536_vm0, %v10852_v18  ;;  %8598 = vmatprep.subr.mxu0 %v7212_v22 }
 0x805   : > { %8511 = vmatprep.mubr.msk.f32.mxu0 %vm536_vm0, %v10859_v19 }
 0x808   : > { %8512 = vmatmul.mubr.msk.f32.gmra.mxu0 %vm536_vm0, %v10866_v29 }
 0x809   : > { %8514 = vmatprep.mubr.msk.f32.mxu0 %vm536_vm0, %v10873_v27 }
 0x80c   : > { %8515 = vmatmul.mubr.msk.f32.gmra.mxu0 %vm536_vm0, %v10880_v54 }
 0x80d   : > { %8517 = vmatprep.mubr.msk.f32.mxu0 %vm536_vm0, %v10887_v15 }
 0x810   : > { %8518 = vmatmul.mubr.msk.f32.gmra.mxu0 %vm536_vm0, %v10894_v32 }
 0x811   : > { %8554 = vmatprep.mubr.msk.f32.mxu0 %vm536_vm0, %v10812_v62 }
 0x814   : > { %8555 = vmatmul.mubr.msk.f32.vlgmr.msra.gmra.mxu0 %vm536_vm0, %v10821_v13 }
 0x815   : > { %8557 = vmatprep.mubr.msk.f32.mxu0 %vm536_vm0, %v10828_v37  ;;  %8599 = vmatpush3.msra.mxu0 %v7212_v22 }
 0x816   : > { %8600 = vmatprep.subr.mxu0 %v7211_v31 }
 0x817   : > { %8601 = vmatpush3.msra.mxu0 %v7211_v31  ;;  %v8187_v31 = vpop.f32.mrf.mxu1 }
 0x818   : > { %8558 = vmatmul.mubr.msk.f32.gmra.mxu0 %vm536_vm0, %v10837_v11  ;;  %8602 = vmatprep.subr.mxu0 %v7210_v3 }
 0x819   : > { %8560 = vmatprep.mubr.msk.f32.mxu0 %vm536_vm0, %v10844_v25  ;;  %8603 = vmatpush3.msra.mxu0 %v7210_v3  ;;  %v3126_v17 = vpop.f32.mrf.mxu1 }
 0x81a   : > { %8604 = vmatprep.subr.mxu0 %v7209_v52 }
 0x81b   : > { %8605 = vmatpush3.msra.mxu0 %v7209_v52  ;;  %v3122_v52 = vadd.f32 %v8184_v47, %v10197_v59 }
 0x81c   : > { %8561 = vmatmul.mubr.msk.f32.gmra.mxu0 %vm536_vm0, %v10852_v18 }
 0x81d   : > { %8563 = vmatprep.mubr.msk.f32.mxu0 %vm536_vm0, %v10859_v19 }
 0x820   : > { %8564 = vmatmul.mubr.msk.f32.gmra.mxu0 %vm536_vm0, %v10866_v29 }
 0x821   : > { %8566 = vmatprep.mubr.msk.f32.mxu0 %vm536_vm0, %v10873_v27 }
 0x824   : > { %8567 = vmatmul.mubr.msk.f32.gmra.mxu0 %vm536_vm0, %v10880_v54 }
 0x825   : > { %8569 = vmatprep.mubr.msk.f32.mxu0 %vm536_vm0, %v10887_v15 }
 0x828   : > { %8570 = vmatmul.mubr.msk.f32.gmra.mxu0 %vm536_vm0, %v10894_v32 }
 0x829   : > { %8606 = vmatprep.mubr.msk.f32.mxu0 %vm536_vm0, %v10812_v62 }
 0x82c   : > { %8607 = vmatmul.mubr.msk.f32.vlgmr.msra.gmra.mxu0 %vm536_vm0, %v10821_v13 }
 0x82d   : > { %8609 = vmatprep.mubr.msk.f32.mxu0 %vm536_vm0, %v10828_v37 }
 0x830   : > { %8610 = vmatmul.mubr.msk.f32.gmra.mxu0 %vm536_vm0, %v10837_v11 }
 0x831   : > { %8612 = vmatprep.mubr.msk.f32.mxu0 %vm536_vm0, %v10844_v25 }
 0x834   : > { %8613 = vmatmul.mubr.msk.f32.gmra.mxu0 %vm536_vm0, %v10852_v18 }
 0x835   : > { %8615 = vmatprep.mubr.msk.f32.mxu0 %vm536_vm0, %v10859_v19 }
 0x838   : > { %8616 = vmatmul.mubr.msk.f32.gmra.mxu0 %vm536_vm0, %v10866_v29 }
 0x839   : > { %8618 = vmatprep.mubr.msk.f32.mxu0 %vm536_vm0, %v10873_v27 }
 0x83c   : > { %v8204_v21 = vpop.f32.mrf.mxu0  ;;  %8619 = vmatmul.mubr.msk.f32.gmra.mxu0 %vm536_vm0, %v10880_v54 }
 0x83d   : > { %v3281_v48 = vadd.f32 %v8204_v21, %v3102_v6  ;;  %8621 = vmatprep.mubr.msk.f32.mxu0 %vm536_vm0, %v10887_v15  ;;  %v3117_v6 = vadd.f32 %v3116_v28, %v10205_v4 }
 0x83e   : > { %v3221_v8 = vpop.f32.mrf.mxu0 }
 0x83f   : > { %v6950_v14 = vmul.f32 -1.442695, %v3281_v48  ;;  %v3280_v49 = vadd.f32 %v3221_v8, %v3097_v38  ;;  %v3132_v8 = vadd.f32 %v8187_v31, %v10186_v46 }
 0x840   : > { %v8207_v44 = vpop.f32.mrf.mxu0  ;;  %8622 = vmatmul.mubr.msk.f32.gmra.mxu0 %vm536_vm0, %v10894_v32 }
 0x841   : > { %9029 = vpow2.f32 %v6950_v14  ;;  %v6949_v1 = vmul.f32 -1.442695, %v3280_v49  ;;  %v3283_v22 = vadd.f32 %v8207_v44, %v3112_v55  ;;  %8658 = vmatprep.mubr.msk.f32.mxu0 %vm536_vm0, %v10996_v43  ;;  %v3127_v14 = vadd.f32 %v3126_v17, %v10189_v50  ;;  %v8190_v17 = vpop.f32.mrf.mxu1 }
 0x842   : > { %v3231_v3 = vpop.f32.mrf.mxu0 }
 0x843   : > { %9031 = vpow2.f32 %v6949_v1  ;;  %v6952_v42 = vmul.f32 -1.442695, %v3283_v22  ;;  %v3282_v9 = vadd.f32 %v3231_v3, %v3107_v12 }
 0x844   : > { %v8210_v5 = vpop.f32.mrf.mxu0 }
 0x845   : > { %9033 = vpow2.f32 %v6952_v42  ;;  %v6951_v21 = vmul.f32 -1.442695, %v3282_v9  ;;  %v3285_v38 = vadd.f32 %v8210_v5, %v3122_v52 }
 0x846   : > { %v3241_v48 = vpop.f32.mrf.mxu0 }
 0x847   : > { %9035 = vpow2.f32 %v6951_v21  ;;  %v3284_v55 = vadd.f32 %v3241_v48, %v3117_v6  ;;  %v6954_v49 = vmul.f32 -1.442695, %v3285_v38 }
 0x848   : > { %v8213_v43 = vpop.f32.mrf.mxu0 }
 0x849   : > { %v3287_v47 = vadd.f32 %v8213_v43, %v3132_v8  ;;  %v6953_v44 = vmul.f32 -1.442695, %v3284_v55  ;;  %9037 = vpow2.f32 %v6954_v49  ;;  %v3136_v55 = vpop.f32.mrf.mxu1 }
 0x84a   : > { %v3251_v1 = vpop.f32.mrf.mxu0  ;;  %v3137_v63 = vadd.f32 %v3136_v55, %v10240_v40 }
 0x84b   : > { %v6956_v12 = vmul.f32 -1.442695, %v3287_v47  ;;  %v3286_v22 = vadd.f32 %v3251_v1, %v3127_v14  ;;  %9039 = vpow2.f32 %v6953_v44 }
 0x84c   : > { %v8216_v21 = vpop.f32.mrf.mxu0 }
 0x84d   : > { %v6955_v28 = vmul.f32 -1.442695, %v3286_v22  ;;  %9041 = vpow2.f32 %v6956_v12  ;;  %v3337_v44 = vadd.f32 %v8216_v21, %v10226_v60  ;;  %v8193_v12 = vpop.f32.mrf.mxu1 }
 0x84e   : > { %v9030_v3 = vpop.eup %9029  ;;  %v3261_v48 = vpop.f32.mrf.mxu0 }
 0x84f   : > { %v3313_v52 = vadd.f32 1.0, %v9030_v3  ;;  %9043 = vpow2.f32 %v6955_v28  ;;  %v3146_v21 = vpop.f32.mrf.mxu1 }
 0x850   : > { %v9032_v42 = vpop.eup %9031  ;;  %v8219_v49 = vpop.f32.mrf.mxu0 }
 0x851   : > { %9045 = vrcp.f32 %v3313_v52  ;;  %v3312_v31 = vadd.f32 1.0, %v9032_v42  ;;  %v3336_v52 = vadd.f32 %v3261_v48, %v10233_v10  ;;  %v3339_v50 = vadd.f32 %v8219_v49, %v10218_v39 }
 0x852   : > { %v9034_v9 = vpop.eup %9033 }
 0x853   : > { %9047 = vrcp.f32 %v3312_v31  ;;  %v3315_v5 = vadd.f32 1.0, %v9034_v9  ;;  %v3142_v31 = vadd.f32 %v8190_v17, %v10228_v2 }
 0x854   : > { %v9036_v6 = vpop.eup %9035 }
 0x855   : > { %9049 = vrcp.f32 %v3315_v5  ;;  %v3314_v38 = vadd.f32 1.0, %v9036_v6  ;;  %v3271_v5 = vpop.f32.mrf.mxu0 }
 0x856   : > { %v9038_v8 = vpop.eup %9037  ;;  %v3338_v48 = vadd.f32 %v3271_v5, %v10222_v51 }
 0x857   : > { %9051 = vrcp.f32 %v3314_v38  ;;  %v3317_v22 = vadd.f32 1.0, %v9038_v8  ;;  %v3152_v8 = vadd.f32 %v8193_v12, %v10220_v45 }
 0x858   : > { %v9040_v43 = vpop.eup %9039 }
 0x859   : > { %v3316_v9 = vadd.f32 1.0, %v9040_v43  ;;  %9053 = vrcp.f32 %v3317_v22  ;;  %v3147_v43 = vadd.f32 %v3146_v21, %v10224_v56 }
 0x85a   : > { %v9042_v14 = vpop.eup %9041 }
 0x85b   : > { %v3319_v28 = vadd.f32 1.0, %v9042_v14 }
 0x85c   : > { %v9044_v47 = vpop.eup %9043 }
 0x85d   : > { %v3318_v6 = vadd.f32 1.0, %v9044_v47  ;;  %9055 = vrcp.f32 %v3319_v28 }
 0x85e   : > { %v9046_v1 = vpop.eup %9045  ;;  %9057 = vrcp.f32 %v3316_v9 }
 0x85f   : > { %v3341_v3 = vmul.f32 %v9046_v1, %v3337_v44  ;;  %9059 = vrcp.f32 %v3318_v6 }
 0x860   : > { %v9048_v42 = vpop.eup %9047 }
 0x861   : > { %v3340_v38 = vmul.f32 %v9048_v42, %v3336_v52  ;;  %v3345_v60 = vadd.f32 %v3341_v3, %v3142_v31 }
 0x862   : > { %v9050_v46 = vpop.eup %9049 }
 0x863   : > { %v3343_v14 = vmul.f32 %v9050_v46, %v3339_v50  ;;  %v3344_v17 = vadd.f32 %v3340_v38, %v3137_v63  ;;  %9061 = vtanh.f32 %v3345_v60 }
 0x864   : > { %v9052_v44 = vpop.eup %9051 }
 0x865   : > { %v3347_v47 = vadd.f32 %v3343_v14, %v3152_v8  ;;  %v3342_v49 = vmul.f32 %v9052_v44, %v3338_v48 }
 0x866   : > { %v9054_v1 = vpop.eup %9053 }
 0x867   : > { %9063 = vtanh.f32 %v3347_v47  ;;  %v3346_v55 = vadd.f32 %v3342_v49, %v3147_v43  ;;  %v3353_v9 = vsub.f32 1.0, %v9054_v1  ;;  %v3361_v48 = vmul.f32 %v9054_v1, %v10737_v33  ;;  %v457_v47 = vld [vmem:[%s11905_s7 + $0x8] sm:$0xff]  ;;  %v459_v33 = vld [vmem:[%s11905_s7 + $0x18] sm:$0xff]  ;;  %v454_v1 = vld [vmem:[%s11904_s6 + $0x30] sm:$0xff] }
 0x868   : > { %9065 = vtanh.f32 %v3344_v17  ;;  %v461_v49 = vld [vmem:[%s11905_s7 + $0x28] sm:$0xff] }
 0x869   : > { %9067 = vtanh.f32 %v3346_v55  ;;  %v462_v55 = vld [vmem:[%s11905_s7 + $0x30] sm:$0xff] }
 0x86a   : > { %v9056_v22 = vpop.eup %9055 }
 0x86b   : > { %v9058_v12 = vpop.eup %9057  ;;  %v3355_v50 = vsub.f32 1.0, %v9056_v22  ;;  %v3363_v63 = vmul.f32 %v9056_v22, %v10728_v24  ;;  %v3704_v22 = vld [vmem:[%s9722_s25 + $0x28] sm:$0xff] }
 0x86c   : > { %v9060_v28 = vpop.eup %9059  ;;  %v3352_v6 = vsub.f32 1.0, %v9058_v12  ;;  %v3360_v43 = vmul.f32 %v9058_v12, %v10742_v35  ;;  %v460_v35 = vld [vmem:[%s11905_s7 + $0x20] sm:$0xff]  ;;  %v455_v12 = vld [vmem:[%s11904_s6 + $0x38] sm:$0xff] }
 0x86d   : > { %v3354_v31 = vsub.f32 1.0, %v9060_v28  ;;  %v3362_v21 = vmul.f32 %v9060_v28, %v10732_v57  ;;  %v458_v57 = vld [vmem:[%s11905_s7 + $0x10] sm:$0xff]  ;;  %v3703_v28 = vld [vmem:[%s9722_s25 + $0x18] sm:$0xff] }
 0x870   : > { %v9062_v46 = vpop.eup %9061 }
 0x871   : > { %v3357_v8 = vmul.f32 %v9062_v46, %v3353_v9  ;;  %v3702_v46 = vld [vmem:[%s9722_s25 + $0x8] sm:$0xff] }
 0x873   : > { %v3365_v17 = vadd.f32 %v3361_v48, %v3357_v8 }
 0x874   : > { %v9064_v3 = vpop.eup %9063 }
 0x875   : > { %v9066_v52 = vpop.eup %9065  ;;  %v3359_v42 = vmul.f32 %v9064_v3, %v3355_v50 }
 0x876   : > { %v9068_v5 = vpop.eup %9067  ;;  %v3356_v44 = vmul.f32 %v9066_v52, %v3352_v6 }
 0x877   : > { %v3367_v60 = vadd.f32 %v3363_v63, %v3359_v42  ;;  %v3358_v38 = vmul.f32 %v9068_v5, %v3354_v31 }
 0x878   : > { %v3364_v24 = vadd.f32 %v3360_v43, %v3356_v44 }
 0x879   : > { %8220 = vmatprep.subr.mxu1 %v3367_v60  ;;  %v3366_v14 = vadd.f32 %v3362_v21, %v3358_v38 }
 0x87a   : > { %8221 = vmatpush3.msra.mxu1 %v3367_v60 }
 0x87b   : > { %8222 = vmatprep.subr.mxu1 %v3366_v14 }
 0x87c   : > { %8223 = vmatpush3.msra.mxu1 %v3366_v14 }
 0x87d   : > { %8224 = vmatprep.subr.mxu1 %v3365_v17 }
 0x87e   : > { %8225 = vmatpush3.msra.mxu1 %v3365_v17 }
 0x87f   : > { %8226 = vmatprep.subr.mxu1 %v3364_v24 }
 0x880   : > { %8227 = vmatpush3.msra.mxu1 %v3364_v24 }
 0x881   : > { %8229 = vmatmul.mubr.msk.f32.vlgmr.msra.gmra.mxu1 %vm536_vm0, %v457_v47  ;;  %8690 = vmatprep.subr.mxu1 %v10746_v58 }
 0x882   : > { %8231 = vmatprep.mubr.msk.f32.mxu1 %vm536_vm0, %v458_v57  ;;  %8694 = vmatpush3.msra.mxu1 %v10746_v58  ;;  %v3705_v58 = vld [vmem:[%s9722_s25 + $0x38] sm:$0xff]  ;;  %s7268_s25 = sshll.u32 %s9637_s13, 8  ;;  %s6556_s13 = scalar_lea.sflag [#allocation5], %s9715_s16 }
 0x883   : > { %8691 = vmatprep.subr.mxu1 %v10751_v7 }
 0x884   : > { %8695 = vmatpush3.msra.mxu1 %v10751_v7  ;;  %v463_v7 = vld [vmem:[%s11905_s7 + $0x38] sm:$0xff] }
 0x885   : > { %8232 = vmatmul.mubr.msk.f32.gmra.mxu1 %vm536_vm0, %v459_v33  ;;  %8692 = vmatprep.subr.mxu1 %v10760_v61 }
 0x886   : > { %8234 = vmatprep.mubr.msk.f32.mxu1 %vm536_vm0, %v460_v35  ;;  %8696 = vmatpush3.msra.mxu1 %v10760_v61  ;;  %v452_v61 = vld [vmem:[%s11904_s6 + $0x20] sm:$0xff] }
 0x887   : > { %8693 = vmatprep.subr.mxu1 %v10765_v0 }
 0x888   : > { %8697 = vmatpush3.msra.mxu1 %v10765_v0  ;;  %v453_v0 = vld [vmem:[%s11904_s6 + $0x28] sm:$0xff] }
 0x889   : > { %8235 = vmatmul.mubr.msk.f32.gmra.mxu1 %vm536_vm0, %v461_v49  ;;  %8260 = vmatprep.subr.mxu1 %v3705_v58 }
 0x88a   : > { %8237 = vmatprep.mubr.msk.f32.mxu1 %vm536_vm0, %v462_v55 }
 0x88d   : > { %8238 = vmatmul.mubr.msk.f32.gmra.mxu1 %vm536_vm0, %v463_v7 }
 0x88e   : > { %8254 = vmatprep.mubr.msk.f32.mxu1 %vm536_vm0, %v452_v61 }
 0x891   : > { %8255 = vmatmul.mubr.msk.f32.vlgmr.msra.gmra.mxu1 %vm536_vm0, %v453_v0 }
 0x892   : > { %8261 = vmatpush3.msra.mxu1 %v3705_v58  ;;  %8257 = vmatprep.mubr.msk.f32.mxu1 %vm536_vm0, %v454_v1 }
 0x893   : > { %8262 = vmatprep.subr.mxu1 %v3704_v22 }
 0x894   : > { %8263 = vmatpush3.msra.mxu1 %v3704_v22 }
 0x895   : > { %8258 = vmatmul.mubr.msk.f32.gmra.mxu1 %vm536_vm0, %v455_v12  ;;  %8264 = vmatprep.subr.mxu1 %v3703_v28 }
 0x896   : > { %8265 = vmatpush3.msra.mxu1 %v3703_v28  ;;  %8268 = vmatprep.mubr.msk.f32.mxu1 %vm536_vm0, %v10812_v62  ;;  %v11173_v62 = vld [vmem:[%s11901_s3] sm:$0xff] }
 0x897   : > { %8266 = vmatprep.subr.mxu1 %v3702_v46 }
 0x898   : > { %8267 = vmatpush3.msra.mxu1 %v3702_v46 }
 0x899   : > { %8269 = vmatmul.mubr.msk.f32.vlgmr.msra.gmra.mxu1 %vm536_vm0, %v10821_v13  ;;  %v8250_v13 = vpop.f32.mrf.mxu0 }
 0x89a   : > { %8271 = vmatprep.mubr.msk.f32.mxu1 %vm536_vm0, %v10828_v37 }
 0x89b   : > { %v3591_v37 = vpop.f32.mrf.mxu0 }
 0x89d   : > { %8272 = vmatmul.mubr.msk.f32.gmra.mxu1 %vm536_vm0, %v10837_v11  ;;  %v11177_v11 = vpop.permute.xlu1 %3645 }
 0x89e   : > { %8274 = vmatprep.mubr.msk.f32.mxu1 %vm536_vm0, %v10844_v25 }
 0x8a1   : > { %8275 = vmatmul.mubr.msk.f32.gmra.mxu1 %vm536_vm0, %v10852_v18  ;;  %v11180_v18 = vpop.permute.xlu0 %3640  ;;  %v11183_v50 = vpop.permute.xlu1 %3655 }
 0x8a2   : > { %8277 = vmatprep.mubr.msk.f32.mxu1 %vm536_vm0, %v10859_v19 }
 0x8a5   : > { %8278 = vmatmul.mubr.msk.f32.gmra.mxu1 %vm536_vm0, %v10866_v29  ;;  %v8253_v29 = vpop.f32.mrf.mxu0  ;;  %v11190_v60 = vpop.permute.xlu0 %3650 }
 0x8a6   : > { %8280 = vmatprep.mubr.msk.f32.mxu1 %vm536_vm0, %v10873_v27  ;;  %v11196_v43 = vpop.permute.xlu1 %3665 }
 0x8a7   : > { %v3601_v63 = vpop.f32.mrf.mxu0 }
 0x8a9   : > { %8281 = vmatmul.mubr.msk.f32.gmra.mxu1 %vm536_vm0, %v10880_v54  ;;  %v11198_v57 = vpop.permute.xlu0 %3660 }
 0x8aa   : > { %8283 = vmatprep.mubr.msk.f32.mxu1 %vm536_vm0, %v10887_v15  ;;  %v11202_v0 = vpop.permute.xlu1 %3675 }
 0x8ab   : > { %11941 = vst [vmem:[#allocation20_spill] sm:$0xff] %v11202_v0 }
 0x8ad   : > { %8284 = vmatmul.mubr.msk.f32.gmra.mxu1 %vm536_vm0, %v10894_v32  ;;  %v11206_v46 = vpop.permute.xlu0 %3670 }
 0x8ae   : > { %8320 = vmatprep.mubr.msk.f32.mxu1 %vm536_vm0, %v11173_v62  ;;  %11942 = vst [vmem:[#allocation21_spill] sm:$0xff] %v11206_v46 }
 0x941   : > { %v8230_v25 = vpop.f32.mrf.mxu1 }
 0x942   : > { %v3597_v19 = vadd.f32 %v8250_v13, %v8230_v25 }
 0x943   : > { %v3462_v27 = vpop.f32.mrf.mxu1 }
 0x944   : > { %vm3631_vm1 = vcmp.ge.f32.partialorder %v3597_v19, 0.0  ;;  %v3679_v54 = vmul.f32 %v11177_v11, %v3597_v19  ;;  %v3592_v15 = vadd.f32 %v3591_v37, %v3462_v27 }
 0x945   : > { %v8233_v32 = vpop.f32.mrf.mxu1 }
 0x946   : > { %v3687_v3 = vsel %vm3631_vm1, %v3597_v19, %v3679_v54  ;;  %vm3630_vm2 = vcmp.ge.f32.partialorder %v3592_v15, 0.0  ;;  %v3678_v52 = vmul.f32 %v11180_v18, %v3592_v15  ;;  %v3607_v42 = vadd.f32 %v8253_v29, %v8233_v32 }
 0x947   : > { %3695 = vst [vmem:[%s11186_s18 + $0x10] sm:$0xff] %v3687_v3  ;;  %v3472_v31 = vpop.f32.mrf.mxu1 }
 0x948   : > { %v3686_v9 = vsel %vm3630_vm2, %v3592_v15, %v3678_v52  ;;  %vm3633_vm3 = vcmp.ge.f32.partialorder %v3607_v42, 0.0  ;;  %v3681_v5 = vmul.f32 %v11183_v50, %v3607_v42  ;;  %v3602_v6 = vadd.f32 %v3601_v63, %v3472_v31 }
 0x949   : > { %3694 = vst [vmem:[%s11186_s18] sm:$0xff] %v3686_v9  ;;  %v8236_v38 = vpop.f32.mrf.mxu1 }
 0x94a   : > { %v3689_v21 = vsel %vm3633_vm3, %v3607_v42, %v3681_v5  ;;  %vm3632_vm4 = vcmp.ge.f32.partialorder %v3602_v6, 0.0  ;;  %v3680_v8 = vmul.f32 %v11190_v60, %v3602_v6 }
 0x94b   : > { %3697 = vst [vmem:[%s11186_s18 + $0x30] sm:$0xff] %v3689_v21  ;;  %v3482_v14 = vpop.f32.mrf.mxu1 }
 0x94c   : > { %v3688_v48 = vsel %vm3632_vm4, %v3602_v6, %v3680_v8 }
 0x94d   : > { %3696 = vst [vmem:[%s11186_s18 + $0x20] sm:$0xff] %v3688_v48  ;;  %v8239_v44 = vpop.f32.mrf.mxu1 }
 0x94f   : > { %v3492_v17 = vpop.f32.mrf.mxu1 }
 0x951   : > { %v8256_v24 = vpop.f32.mrf.mxu1 }
 0x952   : > { %v3617_v47 = vadd.f32 %v8256_v24, %v8236_v38  ;;  %v11944_v24 = vld [vmem:[#allocation10_spill] sm:$0xff] }
 0x953   : > { %v3611_v33 = vpop.f32.mrf.mxu1 }
 0x954   : > { %vm3635_vm5 = vcmp.ge.f32.partialorder %v3617_v47, 0.0  ;;  %v3683_v35 = vmul.f32 %v11196_v43, %v3617_v47  ;;  %v3612_v49 = vadd.f32 %v3611_v33, %v3482_v14 }
 0x955   : > { %v8259_v58 = vpop.f32.mrf.mxu1 }
 0x956   : > { %v3691_v55 = vsel %vm3635_vm5, %v3617_v47, %v3683_v35  ;;  %vm3634_vm6 = vcmp.ge.f32.partialorder %v3612_v49, 0.0  ;;  %v3682_v7 = vmul.f32 %v11198_v57, %v3612_v49  ;;  %v3627_v61 = vadd.f32 %v8259_v58, %v8239_v44 }
 0x957   : > { %3699 = vst [vmem:[%s11186_s18 + $0x50] sm:$0xff] %v3691_v55  ;;  %v3621_v1 = vpop.f32.mrf.mxu1 }
 0x958   : > { %v3690_v22 = vsel %vm3634_vm6, %v3612_v49, %v3682_v7  ;;  %vm3637_vm7 = vcmp.ge.f32.partialorder %v3627_v61, 0.0  ;;  %v3685_v12 = vmul.f32 %v11202_v0, %v3627_v61  ;;  %v3622_v28 = vadd.f32 %v3621_v1, %v3492_v17  ;;  %v11943_v17 = vld [vmem:[#allocation12_spill] sm:$0xff]  ;;  %v11945_v49 = vld [vmem:[#allocation13_spill] sm:$0xff]  ;;  %v11947_v1 = vld [vmem:[#allocation14_spill] sm:$0xff] }
 0x959   : > { %3698 = vst [vmem:[%s11186_s18 + $0x40] sm:$0xff] %v3690_v22  ;;  %v8270_v13 = vpop.f32.mrf.mxu1 }
 0x95a   : > { %v3693_v37 = vsel %vm3637_vm7, %v3627_v61, %v3685_v12  ;;  %vm3636_vm8 = vcmp.ge.f32.partialorder %v3622_v28, 0.0  ;;  %v3684_v25 = vmul.f32 %v11206_v46, %v3622_v28  ;;  %v3778_v19 = vadd.f32 %v8270_v13, %v10172_v20 }
 0x95b   : > { %3701 = vst [vmem:[%s11186_s18 + $0x70] sm:$0xff] %v3693_v37  ;;  %v3772_v29 = vpop.f32.mrf.mxu1 }
 0x95c   : > { %v3692_v27 = vsel %vm3636_vm8, %v3622_v28, %v3684_v25  ;;  %v3832_v54 = vadd.f32 %v10174_v23, %v3778_v19  ;;  %v3773_v15 = vadd.f32 %v3772_v29, %v10180_v34 }
 0x95d   : > { %3700 = vst [vmem:[%s11186_s18 + $0x60] sm:$0xff] %v3692_v27  ;;  %v8273_v32 = vpop.f32.mrf.mxu1 }
 0x95e   : > { %v6986_v3 = vmul.f32 -1.442695, %v3832_v54  ;;  %v3831_v52 = vadd.f32 %v3773_v15, %v10178_v30  ;;  %v3788_v42 = vadd.f32 %v8273_v32, %v10168_v16 }
 0x95f   : > { %v3782_v63 = vpop.f32.mrf.mxu1 }
 0x960   : > { %9069 = vpow2.f32 %v6986_v3  ;;  %v6985_v31 = vmul.f32 -1.442695, %v3831_v52  ;;  %v3834_v9 = vadd.f32 %v10182_v36, %v3788_v42  ;;  %v3783_v5 = vadd.f32 %v3782_v63, %v10176_v26 }
 0x961   : > { %v8276_v6 = vpop.f32.mrf.mxu1 }
 0x962   : > { %9071 = vpow2.f32 %v6985_v31  ;;  %v6988_v38 = vmul.f32 -1.442695, %v3834_v9  ;;  %v3833_v23 = vadd.f32 %v3783_v5, %v10184_v41  ;;  %v3798_v21 = vadd.f32 %v8276_v6, %v10197_v59  ;;  %v11946_v41 = vld [vmem:[#allocation11_spill] sm:$0xff]  ;;  %v11948_v6 = vld [vmem:[#allocation16_spill] sm:$0xff] }
 0x963   : > { %v3792_v8 = vpop.f32.mrf.mxu1 }
 0x964   : > { %9073 = vpow2.f32 %v6988_v38  ;;  %v6987_v14 = vmul.f32 -1.442695, %v3833_v23  ;;  %v3836_v30 = vadd.f32 %v10193_v53, %v3798_v21  ;;  %v3793_v48 = vadd.f32 %v3792_v8, %v10205_v4 }
 0x965   : > { %v8279_v44 = vpop.f32.mrf.mxu1 }
 0x966   : > { %9075 = vpow2.f32 %v6987_v14  ;;  %v3835_v36 = vadd.f32 %v3793_v48, %v11943_v17  ;;  %v3808_v47 = vadd.f32 %v8279_v44, %v11944_v24  ;;  %v6990_v35 = vmul.f32 -1.442695, %v3836_v30  ;;  %v11949_v30 = vld [vmem:[#allocation17_spill] sm:$0xff] }
 0x967   : > { %v3802_v33 = vpop.f32.mrf.mxu1 }
 0x968   : > { %v3838_v58 = vadd.f32 %v11945_v49, %v3808_v47  ;;  %v3803_v55 = vadd.f32 %v3802_v33, %v11946_v41  ;;  %v6989_v7 = vmul.f32 -1.442695, %v3835_v36  ;;  %9077 = vpow2.f32 %v6990_v35  ;;  %v11950_v35 = vld [vmem:[#allocation18_spill] sm:$0xff] }
 0x969   : > { %v8282_v54 = vpop.f32.mrf.mxu1 }
 0x96a   : > { %v6992_v61 = vmul.f32 -1.442695, %v3838_v58  ;;  %v3837_v22 = vadd.f32 %v3803_v55, %v11947_v1  ;;  %9079 = vpow2.f32 %v6989_v7  ;;  %v3818_v8 = vadd.f32 %v8282_v54, %v10228_v2  ;;  %v11951_v1 = vld [vmem:[#allocation19_spill] sm:$0xff] }
 0x96b   : > { %v3812_v32 = vpop.f32.mrf.mxu1 }
 0x96c   : > { %v6991_v53 = vmul.f32 -1.442695, %v3837_v22  ;;  %9081 = vpow2.f32 %v6992_v61  ;;  %v3813_v36 = vadd.f32 %v3812_v32, %v10240_v40 }
 0x96d   : > { %v9070_v12 = vpop.eup %9069  ;;  %v8285_v9 = vpop.f32.mrf.mxu1 }
 0x96e   : > { %v3864_v28 = vadd.f32 1.0, %v9070_v12  ;;  %9083 = vpow2.f32 %v6991_v53  ;;  %v3828_v33 = vadd.f32 %v8285_v9, %v10220_v45 }
 0x96f   : > { %v9072_v13 = vpop.eup %9071  ;;  %v3822_v47 = vpop.f32.mrf.mxu1 }
 0x970   : > { %9085 = vrcp.f32 %v3864_v28  ;;  %v3863_v37 = vadd.f32 1.0, %v9072_v13  ;;  %v3823_v61 = vadd.f32 %v3822_v47, %v10224_v56  ;;  %v11290_v47 = vld [vmem:[%s11901_s3 + $0x30] sm:$0xff] }
 0x971   : > { %v9074_v25 = vpop.eup %9073 }
 0x972   : > { %9087 = vrcp.f32 %v3863_v37  ;;  %v3866_v19 = vadd.f32 1.0, %v9074_v25 }
 0x973   : > { %v9076_v29 = vpop.eup %9075 }
 0x974   : > { %9089 = vrcp.f32 %v3866_v19  ;;  %v3865_v27 = vadd.f32 1.0, %v9076_v29 }
 0x975   : > { %v9078_v15 = vpop.eup %9077 }
 0x976   : > { %9091 = vrcp.f32 %v3865_v27  ;;  %v3868_v31 = vadd.f32 1.0, %v9078_v15 }
 0x977   : > { %v9080_v3 = vpop.eup %9079 }
 0x978   : > { %v3867_v21 = vadd.f32 1.0, %v9080_v3  ;;  %9093 = vrcp.f32 %v3868_v31 }
 0x979   : > { %v9082_v52 = vpop.eup %9081 }
 0x97a   : > { %v3870_v5 = vadd.f32 1.0, %v9082_v52 }
 0x97b   : > { %v9084_v42 = vpop.eup %9083 }
 0x97c   : > { %v3869_v14 = vadd.f32 1.0, %v9084_v42  ;;  %9095 = vrcp.f32 %v3870_v5 }
 0x97d   : > { %v9086_v63 = vpop.eup %9085  ;;  %9097 = vrcp.f32 %v3867_v21 }
 0x97e   : > { %v3888_v38 = vmul.f32 %v9086_v63, %v11948_v6  ;;  %9099 = vrcp.f32 %v3869_v14 }
 0x97f   : > { %v9088_v23 = vpop.eup %9087 }
 0x980   : > { %v3887_v48 = vmul.f32 %v9088_v23, %v11949_v30  ;;  %v3892_v17 = vadd.f32 %v3888_v38, %v3818_v8  ;;  %v11255_v30 = vld [vmem:[%s11901_s3 + $0x8] sm:$0xff] }
 0x981   : > { %v9090_v44 = vpop.eup %9089 }
 0x982   : > { %v3890_v49 = vmul.f32 %v9090_v44, %v11950_v35  ;;  %v3891_v55 = vadd.f32 %v3887_v48, %v3813_v36  ;;  %9101 = vtanh.f32 %v3892_v17  ;;  %v11262_v48 = vld [vmem:[%s11901_s3 + $0x10] sm:$0xff]  ;;  %v11269_v44 = vld [vmem:[%s11901_s3 + $0x18] sm:$0xff]  ;;  %v11276_v17 = vld [vmem:[%s11901_s3 + $0x20] sm:$0xff] }
 0x983   : > { %v9092_v58 = vpop.eup %9091  ;;  %v11283_v36 = vld [vmem:[%s11901_s3 + $0x28] sm:$0xff]  ;;  %v11304_v35 = vld [vmem:[%s11901_s3 + $0x40] sm:$0xff] }
 0x984   : > { %v3894_v7 = vadd.f32 %v3890_v49, %v3828_v33  ;;  %v3889_v22 = vmul.f32 %v9092_v58, %v11951_v1  ;;  %v11297_v33 = vld [vmem:[%s11901_s3 + $0x38] sm:$0xff]  ;;  %v11311_v49 = vld [vmem:[%s11901_s3 + $0x48] sm:$0xff]  ;;  %v11318_v58 = vld [vmem:[%s11901_s3 + $0x50] sm:$0xff] }
 0x985   : > { %v9094_v12 = vpop.eup %9093 }
 0x986   : > { %9103 = vtanh.f32 %v3894_v7  ;;  %v3893_v53 = vadd.f32 %v3889_v22, %v3823_v61  ;;  %v3900_v3 = vsub.f32 1.0, %v9094_v12  ;;  %v3908_v38 = vmul.f32 0.0, %v9094_v12  ;;  %v8296_v7 = vpop.f32.mrf.mxu0 }
 0x987   : > { %9105 = vtanh.f32 %v3891_v55  ;;  %v11325_v55 = vld [vmem:[%s11901_s3 + $0x58] sm:$0xff]  ;;  %v3991_v12 = vadd.f32 %v8296_v7, %v10172_v20 }
 0x988   : > { %9107 = vtanh.f32 %v3893_v53  ;;  %v3985_v61 = vpop.f32.mrf.mxu0 }
 0x989   : > { %v9096_v28 = vpop.eup %9095 }
 0x98a   : > { %v9098_v13 = vpop.eup %9097  ;;  %v3902_v19 = vsub.f32 1.0, %v9096_v28  ;;  %v3910_v15 = vmul.f32 0.0, %v9096_v28  ;;  %v8299_v1 = vpop.f32.mrf.mxu0 }
 0x98b   : > { %v9100_v37 = vpop.eup %9099  ;;  %v3899_v42 = vsub.f32 1.0, %v9098_v13  ;;  %v3907_v8 = vmul.f32 0.0, %v9098_v13  ;;  %v3986_v13 = vadd.f32 %v3985_v61, %v10180_v34 }
 0x98c   : > { %v3901_v32 = vsub.f32 1.0, %v9100_v37  ;;  %v3909_v9 = vmul.f32 0.0, %v9100_v37  ;;  %v3995_v22 = vpop.f32.mrf.mxu0 }
 0x98e   : > { %v8302_v53 = vpop.f32.mrf.mxu0 }
 0x98f   : > { %v9102_v25 = vpop.eup %9101 }
 0x990   : > { %v3904_v5 = vmul.f32 %v9102_v25, %v3900_v3  ;;  %v4005_v25 = vpop.f32.mrf.mxu0 }
 0x992   : > { %v11243_v21 = vadd.f32 %v3908_v38, %v3904_v5 }
 0x993   : > { %v9104_v29 = vpop.eup %9103 }
 0x994   : > { %v9106_v27 = vpop.eup %9105  ;;  %v3906_v54 = vmul.f32 %v9104_v29, %v3902_v19  ;;  %v4001_v29 = vadd.f32 %v8299_v1, %v10168_v16 }
 0x995   : > { %v9108_v52 = vpop.eup %9107  ;;  %v3903_v23 = vmul.f32 %v9106_v27, %v3899_v42  ;;  %v8305_v42 = vpop.f32.mrf.mxu0 }
 0x996   : > { %v11236_v63 = vadd.f32 %v3910_v15, %v3906_v54  ;;  %v3905_v31 = vmul.f32 %v9108_v52, %v3901_v32  ;;  %v3996_v32 = vadd.f32 %v3995_v22, %v10176_v26  ;;  %v4021_v22 = vadd.f32 %v8305_v42, %v11944_v24 }
 0x997   : > { %v11247_v14 = vadd.f32 %v3907_v8, %v3903_v23  ;;  %v4006_v8 = vadd.f32 %v4005_v25, %v10205_v4  ;;  %v4015_v1 = vpop.f32.mrf.mxu0 }
 0x998   : > { %8312 = vmatprep.subr.mxu1 %v11236_v63  ;;  %v11239_v6 = vadd.f32 %v3909_v9, %v3905_v31  ;;  %v4011_v9 = vadd.f32 %v8302_v53, %v10197_v59 }
 0x999   : > { %8313 = vmatpush3.msra.mxu1 %v11236_v63 }
 0x99a   : > { %8314 = vmatprep.subr.mxu1 %v11239_v6 }
 0x99b   : > { %8315 = vmatpush3.msra.mxu1 %v11239_v6 }
 0x99c   : > { %8316 = vmatprep.subr.mxu1 %v11243_v21 }
 0x99d   : > { %8317 = vmatpush3.msra.mxu1 %v11243_v21 }
 0x99e   : > { %8318 = vmatprep.subr.mxu1 %v11247_v14 }
 0x99f   : > { %8319 = vmatpush3.msra.mxu1 %v11247_v14 }
 0x9a0   : > { %8321 = vmatmul.mubr.msk.f32.vlgmr.msra.gmra.mxu1 %vm536_vm0, %v11255_v30 }
 0x9a1   : > { %8323 = vmatprep.mubr.msk.f32.mxu1 %vm536_vm0, %v11262_v48 }
 0x9a4   : > { %8324 = vmatmul.mubr.msk.f32.gmra.mxu1 %vm536_vm0, %v11269_v44 }
 0x9a5   : > { %8326 = vmatprep.mubr.msk.f32.mxu1 %vm536_vm0, %v11276_v17 }
 0x9a8   : > { %8327 = vmatmul.mubr.msk.f32.gmra.mxu1 %vm536_vm0, %v11283_v36 }
 0x9a9   : > { %8329 = vmatprep.mubr.msk.f32.mxu1 %vm536_vm0, %v11290_v47 }
 0x9ac   : > { %8330 = vmatmul.mubr.msk.f32.gmra.mxu1 %vm536_vm0, %v11297_v33 }
 0x9ad   : > { %8332 = vmatprep.mubr.msk.f32.mxu1 %vm536_vm0, %v11304_v35 }
 0x9b0   : > { %8333 = vmatmul.mubr.msk.f32.gmra.mxu1 %vm536_vm0, %v11311_v49 }
 0x9b1   : > { %8335 = vmatprep.mubr.msk.f32.mxu1 %vm536_vm0, %v11318_v58 }
 0x9b4   : > { %8336 = vmatmul.mubr.msk.f32.gmra.mxu1 %vm536_vm0, %v11325_v55 }
 0x9b5   : > { %8372 = vmatprep.mubr.msk.f32.mxu1 %vm536_vm0, %v11173_v62 }
 0xa60   : > { %v8322_v28 = vpop.f32.mrf.mxu1 }
 0xa61   : > { %v4170_v37 = vadd.f32 %v8322_v28, %v3991_v12 }
 0xa62   : > { %v4110_v19 = vpop.f32.mrf.mxu1 }
 0xa63   : > { %v7022_v27 = vmul.f32 -1.442695, %v4170_v37  ;;  %v4169_v54 = vadd.f32 %v4110_v19, %v3986_v13  ;;  %v4016_v37 = vadd.f32 %v4015_v1, %v11946_v41 }
 0xa64   : > { %v8325_v15 = vpop.f32.mrf.mxu1 }
 0xa65   : > { %9109 = vpow2.f32 %v7022_v27  ;;  %v7021_v3 = vmul.f32 -1.442695, %v4169_v54  ;;  %v4172_v52 = vadd.f32 %v8325_v15, %v4001_v29 }
 0xa66   : > { %v4120_v31 = vpop.f32.mrf.mxu1 }
 0xa67   : > { %9111 = vpow2.f32 %v7021_v3  ;;  %v7024_v5 = vmul.f32 -1.442695, %v4172_v52  ;;  %v4171_v38 = vadd.f32 %v4120_v31, %v3996_v32 }
 0xa68   : > { %v8328_v23 = vpop.f32.mrf.mxu1 }
 0xa69   : > { %9113 = vpow2.f32 %v7024_v5  ;;  %v7023_v7 = vmul.f32 -1.442695, %v4171_v38  ;;  %v4174_v61 = vadd.f32 %v8328_v23, %v4011_v9 }
 0xa6a   : > { %v4130_v12 = vpop.f32.mrf.mxu1 }
 0xa6b   : > { %9115 = vpow2.f32 %v7023_v7  ;;  %v4173_v28 = vadd.f32 %v4130_v12, %v4006_v8  ;;  %v7026_v19 = vmul.f32 -1.442695, %v4174_v61  ;;  %v8308_v8 = vpop.f32.mrf.mxu0 }
 0xa6c   : > { %v8331_v13 = vpop.f32.mrf.mxu1 }
 0xa6d   : > { %v4176_v53 = vadd.f32 %v8331_v13, %v4021_v22  ;;  %v7025_v29 = vmul.f32 -1.442695, %v4173_v28  ;;  %9117 = vpow2.f32 %v7026_v19  ;;  %v4025_v1 = vpop.f32.mrf.mxu0 }
 0xa6e   : > { %v4140_v27 = vpop.f32.mrf.mxu1  ;;  %v4026_v46 = vadd.f32 %v4025_v1, %v10240_v40 }
 0xa6f   : > { %v7028_v54 = vmul.f32 -1.442695, %v4176_v53  ;;  %v4175_v15 = vadd.f32 %v4140_v27, %v4016_v37  ;;  %9119 = vpow2.f32 %v7025_v29  ;;  %v11952_v37 = vld [vmem:[#allocation15_spill] sm:$0xff]  ;;  %v8311_v29 = vpop.f32.mrf.mxu0 }
 0xa70   : > { %v8334_v38 = vpop.f32.mrf.mxu1 }
 0xa71   : > { %v7027_v25 = vmul.f32 -1.442695, %v4175_v15  ;;  %9121 = vpow2.f32 %v7028_v54  ;;  %v4226_v19 = vadd.f32 %v8334_v38, %v11952_v37  ;;  %v4035_v38 = vpop.f32.mrf.mxu0 }
 0xa72   : > { %v9110_v32 = vpop.eup %9109  ;;  %v4150_v7 = vpop.f32.mrf.mxu1 }
 0xa73   : > { %v4202_v3 = vadd.f32 1.0, %v9110_v32  ;;  %9123 = vpow2.f32 %v7027_v25  ;;  %v4225_v25 = vadd.f32 %v4150_v7, %v10233_v10 }
 0xa74   : > { %v9112_v52 = vpop.eup %9111  ;;  %v8337_v28 = vpop.f32.mrf.mxu1 }
 0xa75   : > { %9125 = vrcp.f32 %v4202_v3  ;;  %v4201_v42 = vadd.f32 1.0, %v9112_v52  ;;  %v4031_v3 = vadd.f32 %v8308_v8, %v10228_v2 }
 0xa76   : > { %v9114_v31 = vpop.eup %9113 }
 0xa77   : > { %9127 = vrcp.f32 %v4201_v42  ;;  %v4204_v9 = vadd.f32 1.0, %v9114_v31  ;;  %v4160_v42 = vpop.f32.mrf.mxu1 }
 0xa78   : > { %v9116_v5 = vpop.eup %9115  ;;  %v4227_v7 = vadd.f32 %v4160_v42, %v10222_v51 }
 0xa79   : > { %9129 = vrcp.f32 %v4204_v9  ;;  %v4203_v23 = vadd.f32 1.0, %v9116_v5  ;;  %v4228_v5 = vadd.f32 %v8337_v28, %v10218_v39 }
 0xa7a   : > { %v9118_v61 = vpop.eup %9117 }
 0xa7b   : > { %9131 = vrcp.f32 %v4203_v23  ;;  %v4206_v27 = vadd.f32 1.0, %v9118_v61  ;;  %v4041_v61 = vadd.f32 %v8311_v29, %v10220_v45 }
 0xa7c   : > { %v9120_v12 = vpop.eup %9119 }
 0xa7d   : > { %v4205_v52 = vadd.f32 1.0, %v9120_v12  ;;  %9133 = vrcp.f32 %v4206_v27  ;;  %v4036_v12 = vadd.f32 %v4035_v38, %v10224_v56 }
 0xa7e   : > { %v9122_v22 = vpop.eup %9121 }
 0xa7f   : > { %v4208_v54 = vadd.f32 1.0, %v9122_v22 }
 0xa80   : > { %v9124_v13 = vpop.eup %9123 }
 0xa81   : > { %v4207_v31 = vadd.f32 1.0, %v9124_v13  ;;  %9135 = vrcp.f32 %v4208_v54 }
 0xa82   : > { %v9126_v53 = vpop.eup %9125  ;;  %9137 = vrcp.f32 %v4205_v52 }
 0xa83   : > { %v4230_v15 = vmul.f32 %v9126_v53, %v4226_v19  ;;  %9139 = vrcp.f32 %v4207_v31 }
 0xa84   : > { %v9128_v32 = vpop.eup %9127 }
 0xa85   : > { %v4229_v9 = vmul.f32 %v9128_v32, %v4225_v25  ;;  %v4234_v0 = vadd.f32 %v4230_v15, %v4031_v3 }
 0xa86   : > { %v9130_v23 = vpop.eup %9129 }
 0xa87   : > { %v4232_v22 = vmul.f32 %v9130_v23, %v4228_v5  ;;  %v4233_v8 = vadd.f32 %v4229_v9, %v4026_v46  ;;  %9141 = vtanh.f32 %v4234_v0 }
 0xa88   : > { %v9132_v19 = vpop.eup %9131 }
 0xa89   : > { %v4236_v13 = vadd.f32 %v4232_v22, %v4041_v61  ;;  %v4231_v28 = vmul.f32 %v9132_v19, %v4227_v7 }
 0xa8a   : > { %v9134_v53 = vpop.eup %9133 }
 0xa8b   : > { %9143 = vtanh.f32 %v4236_v13  ;;  %v4235_v1 = vadd.f32 %v4231_v28, %v4036_v12  ;;  %v4242_v31 = vsub.f32 1.0, %v9134_v53  ;;  %v4250_v7 = vmul.f32 %v9134_v53, %v11243_v21  ;;  %v8348_v21 = vpop.f32.mrf.mxu0 }
 0xa8c   : > { %9145 = vtanh.f32 %v4233_v8 }
 0xa8d   : > { %9147 = vtanh.f32 %v4235_v1  ;;  %v4333_v1 = vadd.f32 %v8348_v21, %v10172_v20 }
 0xa8e   : > { %v9136_v27 = vpop.eup %9135 }
 0xa8f   : > { %v9138_v29 = vpop.eup %9137  ;;  %v4244_v25 = vsub.f32 1.0, %v9136_v27  ;;  %v4252_v46 = vmul.f32 %v9136_v27, %v11236_v63 }
 0xa90   : > { %v9140_v54 = vpop.eup %9139  ;;  %v4241_v5 = vsub.f32 1.0, %v9138_v29  ;;  %v4249_v8 = vmul.f32 %v9138_v29, %v11247_v14  ;;  %v4327_v14 = vpop.f32.mrf.mxu0 }
 0xa91   : > { %v4243_v42 = vsub.f32 1.0, %v9140_v54  ;;  %v4251_v38 = vmul.f32 %v9140_v54, %v11239_v6  ;;  %v4328_v27 = vadd.f32 %v4327_v14, %v10180_v34 }
 0xa92   : > { %v8351_v12 = vpop.f32.mrf.mxu0 }
 0xa94   : > { %v9142_v15 = vpop.eup %9141  ;;  %v4337_v13 = vpop.f32.mrf.mxu0 }
 0xa95   : > { %v4246_v61 = vmul.f32 %v9142_v15, %v4242_v31 }
 0xa96   : > { %v8354_v28 = vpop.f32.mrf.mxu0 }
 0xa97   : > { %v11357_v63 = vadd.f32 %v4250_v7, %v4246_v61 }
 0xa98   : > { %v9144_v32 = vpop.eup %9143  ;;  %v4347_v54 = vpop.f32.mrf.mxu0 }
 0xa99   : > { %v9146_v3 = vpop.eup %9145  ;;  %v4248_v52 = vmul.f32 %v9144_v32, %v4244_v25  ;;  %v4343_v25 = vadd.f32 %v8351_v12, %v10168_v16 }
 0xa9a   : > { %v9148_v9 = vpop.eup %9147  ;;  %v4245_v19 = vmul.f32 %v9146_v3, %v4241_v5 }
 0xa9b   : > { %v11348_v0 = vadd.f32 %v4252_v46, %v4248_v52  ;;  %v4247_v23 = vmul.f32 %v9148_v9, %v4243_v42  ;;  %v4338_v46 = vadd.f32 %v4337_v13, %v10176_v26  ;;  %v8357_v9 = vpop.f32.mrf.mxu0 }
 0xa9c   : > { %v11362_v6 = vadd.f32 %v4249_v8, %v4245_v19  ;;  %v4348_v19 = vadd.f32 %v4347_v54, %v10205_v4  ;;  %v4363_v13 = vadd.f32 %v8357_v9, %v11944_v24 }
 0xa9d   : > { %8364 = vmatprep.subr.mxu1 %v11348_v0  ;;  %v11352_v22 = vadd.f32 %v4251_v38, %v4247_v23  ;;  %v4353_v23 = vadd.f32 %v8354_v28, %v10197_v59  ;;  %v4357_v14 = vpop.f32.mrf.mxu0 }
 0xa9e   : > { %8365 = vmatpush3.msra.mxu1 %v11348_v0 }
 0xa9f   : > { %8366 = vmatprep.subr.mxu1 %v11352_v22 }
 0xaa0   : > { %8367 = vmatpush3.msra.mxu1 %v11352_v22 }
 0xaa1   : > { %8368 = vmatprep.subr.mxu1 %v11357_v63 }
 0xaa2   : > { %8369 = vmatpush3.msra.mxu1 %v11357_v63 }
 0xaa3   : > { %8370 = vmatprep.subr.mxu1 %v11362_v6 }
 0xaa4   : > { %8371 = vmatpush3.msra.mxu1 %v11362_v6 }
 0xaa5   : > { %8373 = vmatmul.mubr.msk.f32.vlgmr.msra.gmra.mxu1 %vm536_vm0, %v11255_v30 }
 0xaa6   : > { %8375 = vmatprep.mubr.msk.f32.mxu1 %vm536_vm0, %v11262_v48 }
 0xaa9   : > { %8376 = vmatmul.mubr.msk.f32.gmra.mxu1 %vm536_vm0, %v11269_v44 }
 0xaaa   : > { %8378 = vmatprep.mubr.msk.f32.mxu1 %vm536_vm0, %v11276_v17 }
 0xaad   : > { %8379 = vmatmul.mubr.msk.f32.gmra.mxu1 %vm536_vm0, %v11283_v36 }
 0xaae   : > { %8381 = vmatprep.mubr.msk.f32.mxu1 %vm536_vm0, %v11290_v47 }
 0xab1   : > { %8382 = vmatmul.mubr.msk.f32.gmra.mxu1 %vm536_vm0, %v11297_v33 }
 0xab2   : > { %8384 = vmatprep.mubr.msk.f32.mxu1 %vm536_vm0, %v11304_v35 }
 0xab5   : > { %8385 = vmatmul.mubr.msk.f32.gmra.mxu1 %vm536_vm0, %v11311_v49 }
 0xab6   : > { %8387 = vmatprep.mubr.msk.f32.mxu1 %vm536_vm0, %v11318_v58 }
 0xab9   : > { %8388 = vmatmul.mubr.msk.f32.gmra.mxu1 %vm536_vm0, %v11325_v55 }
 0xaba   : > { %8424 = vmatprep.mubr.msk.f32.mxu1 %vm536_vm0, %v11173_v62 }
 0xb65   : > { %v8374_v53 = vpop.f32.mrf.mxu1 }
 0xb66   : > { %v4512_v29 = vadd.f32 %v8374_v53, %v4333_v1 }
 0xb67   : > { %v4452_v15 = vpop.f32.mrf.mxu1 }
 0xb68   : > { %v7058_v32 = vmul.f32 -1.442695, %v4512_v29  ;;  %v4511_v3 = vadd.f32 %v4452_v15, %v4328_v27  ;;  %v4358_v27 = vadd.f32 %v4357_v14, %v11946_v41 }
 0xb69   : > { %v8377_v52 = vpop.f32.mrf.mxu1 }
 0xb6a   : > { %9149 = vpow2.f32 %v7058_v32  ;;  %v7057_v42 = vmul.f32 -1.442695, %v4511_v3  ;;  %v4514_v31 = vadd.f32 %v8377_v52, %v4343_v25 }
 0xb6b   : > { %v4462_v5 = vpop.f32.mrf.mxu1 }
 0xb6c   : > { %9151 = vpow2.f32 %v7057_v42  ;;  %v7060_v38 = vmul.f32 -1.442695, %v4514_v31  ;;  %v4513_v61 = vadd.f32 %v4462_v5, %v4338_v46 }
 0xb6d   : > { %v8380_v7 = vpop.f32.mrf.mxu1 }
 0xb6e   : > { %9153 = vpow2.f32 %v7060_v38  ;;  %v7059_v8 = vmul.f32 -1.442695, %v4513_v61  ;;  %v4516_v21 = vadd.f32 %v8380_v7, %v4353_v23  ;;  %v8360_v7 = vpop.f32.mrf.mxu0 }
 0xb6f   : > { %v4472_v12 = vpop.f32.mrf.mxu1 }
 0xb70   : > { %9155 = vpow2.f32 %v7059_v8  ;;  %v4515_v1 = vadd.f32 %v4472_v12, %v4348_v19  ;;  %v7062_v29 = vmul.f32 -1.442695, %v4516_v21  ;;  %v4367_v21 = vpop.f32.mrf.mxu0 }
 0xb71   : > { %v8383_v53 = vpop.f32.mrf.mxu1 }
 0xb72   : > { %v4518_v28 = vadd.f32 %v8383_v53, %v4363_v13  ;;  %v7061_v15 = vmul.f32 -1.442695, %v4515_v1  ;;  %9157 = vpow2.f32 %v7062_v29  ;;  %v8363_v29 = vpop.f32.mrf.mxu0 }
 0xb73   : > { %v4482_v25 = vpop.f32.mrf.mxu1 }
 0xb74   : > { %v7064_v32 = vmul.f32 -1.442695, %v4518_v28  ;;  %v4517_v3 = vadd.f32 %v4482_v25, %v4358_v27  ;;  %9159 = vpow2.f32 %v7061_v15 }
 0xb75   : > { %v8386_v38 = vpop.f32.mrf.mxu1 }
 0xb76   : > { %v7063_v54 = vmul.f32 -1.442695, %v4517_v3  ;;  %9161 = vpow2.f32 %v7064_v32  ;;  %v4568_v53 = vadd.f32 %v8386_v38, %v11952_v37  ;;  %v4377_v38 = vpop.f32.mrf.mxu0 }
 0xb77   : > { %v9150_v52 = vpop.eup %9149  ;;  %v4492_v19 = vpop.f32.mrf.mxu1 }
 0xb78   : > { %v4544_v46 = vadd.f32 1.0, %v9150_v52  ;;  %9163 = vpow2.f32 %v7063_v54  ;;  %v4567_v32 = vadd.f32 %v4492_v19, %v10233_v10  ;;  %v4373_v54 = vadd.f32 %v8360_v7, %v10228_v2 }
 0xb79   : > { %v9152_v42 = vpop.eup %9151  ;;  %v8389_v13 = vpop.f32.mrf.mxu1 }
 0xb7a   : > { %9165 = vrcp.f32 %v4544_v46  ;;  %v4543_v31 = vadd.f32 1.0, %v9152_v42 }
 0xb7b   : > { %v9154_v9 = vpop.eup %9153  ;;  %v4502_v46 = vpop.f32.mrf.mxu1 }
 0xb7c   : > { %9167 = vrcp.f32 %v4543_v31  ;;  %v4546_v5 = vadd.f32 1.0, %v9154_v9  ;;  %v4570_v9 = vadd.f32 %v8389_v13, %v10218_v39  ;;  %v4569_v19 = vadd.f32 %v4502_v46, %v10222_v51 }
 0xb7d   : > { %v9156_v23 = vpop.eup %9155 }
 0xb7e   : > { %9169 = vrcp.f32 %v4546_v5  ;;  %v4545_v61 = vadd.f32 1.0, %v9156_v23  ;;  %v4368_v23 = vadd.f32 %v4367_v21, %v10240_v40 }
 0xb7f   : > { %v9158_v8 = vpop.eup %9157 }
 0xb80   : > { %9171 = vrcp.f32 %v4545_v61  ;;  %v4548_v28 = vadd.f32 1.0, %v9158_v8  ;;  %v4383_v8 = vadd.f32 %v8363_v29, %v10220_v45 }
 0xb81   : > { %v9160_v14 = vpop.eup %9159 }
 0xb82   : > { %v4547_v52 = vadd.f32 1.0, %v9160_v14  ;;  %9173 = vrcp.f32 %v4548_v28  ;;  %v4378_v14 = vadd.f32 %v4377_v38, %v10224_v56 }
 0xb83   : > { %v9162_v12 = vpop.eup %9161 }
 0xb84   : > { %v4550_v15 = vadd.f32 1.0, %v9162_v12 }
 0xb85   : > { %v9164_v1 = vpop.eup %9163 }
 0xb86   : > { %v4549_v42 = vadd.f32 1.0, %v9164_v1  ;;  %9175 = vrcp.f32 %v4550_v15 }
 0xb87   : > { %v9166_v27 = vpop.eup %9165  ;;  %9177 = vrcp.f32 %v4547_v52 }
 0xb88   : > { %v4572_v25 = vmul.f32 %v9166_v27, %v4568_v53  ;;  %9179 = vrcp.f32 %v4549_v42 }
 0xb89   : > { %v9168_v3 = vpop.eup %9167 }
 0xb8a   : > { %v4571_v31 = vmul.f32 %v9168_v3, %v4567_v32  ;;  %v4576_v61 = vadd.f32 %v4572_v25, %v4373_v54 }
 0xb8b   : > { %v9170_v5 = vpop.eup %9169 }
 0xb8c   : > { %v4574_v12 = vmul.f32 %v9170_v5, %v4570_v9  ;;  %v4575_v7 = vadd.f32 %v4571_v31, %v4368_v23  ;;  %9181 = vtanh.f32 %v4576_v61 }
 0xb8d   : > { %v9172_v53 = vpop.eup %9171 }
 0xb8e   : > { %v4578_v1 = vadd.f32 %v4574_v12, %v4383_v8  ;;  %v4573_v13 = vmul.f32 %v9172_v53, %v4569_v19 }
 0xb8f   : > { %v9174_v27 = vpop.eup %9173 }
 0xb90   : > { %9183 = vtanh.f32 %v4578_v1  ;;  %v4577_v21 = vadd.f32 %v4573_v13, %v4378_v14  ;;  %v4584_v42 = vsub.f32 1.0, %v9174_v27  ;;  %v4592_v19 = vmul.f32 %v9174_v27, %v11357_v63  ;;  %v8400_v63 = vpop.f32.mrf.mxu0 }
 0xb91   : > { %9185 = vtanh.f32 %v4575_v7 }
 0xb92   : > { %9187 = vtanh.f32 %v4577_v21  ;;  %v4675_v21 = vadd.f32 %v8400_v63, %v10172_v20 }
 0xb93   : > { %v9176_v28 = vpop.eup %9175 }
 0xb94   : > { %v9178_v29 = vpop.eup %9177  ;;  %v4586_v32 = vsub.f32 1.0, %v9176_v28  ;;  %v4594_v46 = vmul.f32 %v9176_v28, %v11348_v0 }
 0xb95   : > { %v9180_v15 = vpop.eup %9179  ;;  %v4583_v5 = vsub.f32 1.0, %v9178_v29  ;;  %v4591_v7 = vmul.f32 %v9178_v29, %v11362_v6  ;;  %v4669_v6 = vpop.f32.mrf.mxu0 }
 0xb96   : > { %v4585_v31 = vsub.f32 1.0, %v9180_v15  ;;  %v4593_v61 = vmul.f32 %v9180_v15, %v11352_v22  ;;  %v4670_v28 = vadd.f32 %v4669_v6, %v10180_v34 }
 0xb97   : > { %v8403_v14 = vpop.f32.mrf.mxu0 }
 0xb99   : > { %v9182_v25 = vpop.eup %9181  ;;  %v4679_v1 = vpop.f32.mrf.mxu0 }
 0xb9a   : > { %v4588_v8 = vmul.f32 %v9182_v25, %v4584_v42 }
 0xb9b   : > { %v8406_v13 = vpop.f32.mrf.mxu0 }
 0xb9c   : > { %v11417_v0 = vadd.f32 %v4592_v19, %v4588_v8 }
 0xb9d   : > { %v9184_v3 = vpop.eup %9183  ;;  %v4689_v15 = vpop.f32.mrf.mxu0 }
 0xb9e   : > { %v9186_v54 = vpop.eup %9185  ;;  %v4590_v52 = vmul.f32 %v9184_v3, %v4586_v32  ;;  %v4685_v32 = vadd.f32 %v8403_v14, %v10168_v16  ;;  %v4690_v19 = vadd.f32 %v4689_v15, %v10205_v4 }
 0xb9f   : > { %v9188_v9 = vpop.eup %9187  ;;  %v4587_v53 = vmul.f32 %v9186_v54, %v4583_v5  ;;  %v8409_v42 = vpop.f32.mrf.mxu0  ;;  %v4695_v5 = vadd.f32 %v8406_v13, %v10197_v59 }
 0xba0   : > { %v11408_v23 = vadd.f32 %v4594_v46, %v4590_v52  ;;  %v4589_v38 = vmul.f32 %v9188_v9, %v4585_v31  ;;  %v4705_v14 = vadd.f32 %v8409_v42, %v11944_v24 }
 0xba1   : > { %v11422_v22 = vadd.f32 %v4591_v7, %v4587_v53  ;;  %v4699_v63 = vpop.f32.mrf.mxu0 }
 0xba2   : > { %8416 = vmatprep.subr.mxu1 %v11408_v23  ;;  %v11412_v12 = vadd.f32 %v4593_v61, %v4589_v38 }
 0xba3   : > { %8417 = vmatpush3.msra.mxu1 %v11408_v23 }
 0xba4   : > { %8418 = vmatprep.subr.mxu1 %v11412_v12 }
 0xba5   : > { %8419 = vmatpush3.msra.mxu1 %v11412_v12 }
 0xba6   : > { %8420 = vmatprep.subr.mxu1 %v11417_v0 }
 0xba7   : > { %8421 = vmatpush3.msra.mxu1 %v11417_v0 }
 0xba8   : > { %8422 = vmatprep.subr.mxu1 %v11422_v22 }
 0xba9   : > { %8423 = vmatpush3.msra.mxu1 %v11422_v22 }
 0xbaa   : > { %8425 = vmatmul.mubr.msk.f32.vlgmr.msra.gmra.mxu1 %vm536_vm0, %v11255_v30 }
 0xbab   : > { %8427 = vmatprep.mubr.msk.f32.mxu1 %vm536_vm0, %v11262_v48 }
 0xbae   : > { %8428 = vmatmul.mubr.msk.f32.gmra.mxu1 %vm536_vm0, %v11269_v44 }
 0xbaf   : > { %8430 = vmatprep.mubr.msk.f32.mxu1 %vm536_vm0, %v11276_v17 }
 0xbb2   : > { %8431 = vmatmul.mubr.msk.f32.gmra.mxu1 %vm536_vm0, %v11283_v36 }
 0xbb3   : > { %8433 = vmatprep.mubr.msk.f32.mxu1 %vm536_vm0, %v11290_v47 }
 0xbb6   : > { %8434 = vmatmul.mubr.msk.f32.gmra.mxu1 %vm536_vm0, %v11297_v33 }
 0xbb7   : > { %8436 = vmatprep.mubr.msk.f32.mxu1 %vm536_vm0, %v11304_v35 }
 0xbba   : > { %8437 = vmatmul.mubr.msk.f32.gmra.mxu1 %vm536_vm0, %v11311_v49 }
 0xbbb   : > { %8439 = vmatprep.mubr.msk.f32.mxu1 %vm536_vm0, %v11318_v58 }
 0xbbe   : > { %8440 = vmatmul.mubr.msk.f32.gmra.mxu1 %vm536_vm0, %v11325_v55 }
 0xbbf   : > { %8476 = vmatprep.mubr.msk.f32.mxu1 %vm536_vm0, %v11173_v62  ;;  %v4680_v62 = vadd.f32 %v4679_v1, %v10176_v26 }
 0xc6a   : > { %v8426_v27 = vpop.f32.mrf.mxu1 }
 0xc6b   : > { %v4854_v29 = vadd.f32 %v8426_v27, %v4675_v21  ;;  %v4700_v27 = vadd.f32 %v4699_v63, %v11946_v41 }
 0xc6c   : > { %v4794_v25 = vpop.f32.mrf.mxu1 }
 0xc6d   : > { %v7094_v3 = vmul.f32 -1.442695, %v4854_v29  ;;  %v4853_v54 = vadd.f32 %v4794_v25, %v4670_v28 }
 0xc6e   : > { %v8429_v52 = vpop.f32.mrf.mxu1 }
 0xc6f   : > { %9189 = vpow2.f32 %v7094_v3  ;;  %v7093_v46 = vmul.f32 -1.442695, %v4853_v54  ;;  %v4856_v31 = vadd.f32 %v8429_v52, %v4685_v32 }
 0xc70   : > { %v4804_v9 = vpop.f32.mrf.mxu1 }
 0xc71   : > { %9191 = vpow2.f32 %v7093_v46  ;;  %v7096_v38 = vmul.f32 -1.442695, %v4856_v31  ;;  %v4855_v61 = vadd.f32 %v4804_v9, %v4680_v62 }
 0xc72   : > { %v8432_v8 = vpop.f32.mrf.mxu1 }
 0xc73   : > { %9193 = vpow2.f32 %v7096_v38  ;;  %v7095_v53 = vmul.f32 -1.442695, %v4855_v61  ;;  %v4858_v7 = vadd.f32 %v8432_v8, %v4695_v5  ;;  %v8412_v61 = vpop.f32.mrf.mxu0 }
 0xc74   : > { %v4814_v6 = vpop.f32.mrf.mxu1 }
 0xc75   : > { %9195 = vpow2.f32 %v7095_v53  ;;  %v4857_v1 = vadd.f32 %v4814_v6, %v4690_v19  ;;  %v7098_v28 = vmul.f32 -1.442695, %v4858_v7  ;;  %v4709_v53 = vpop.f32.mrf.mxu0 }
 0xc76   : > { %v8435_v21 = vpop.f32.mrf.mxu1 }
 0xc77   : > { %v4860_v13 = vadd.f32 %v8435_v21, %v4705_v14  ;;  %v7097_v29 = vmul.f32 -1.442695, %v4857_v1  ;;  %9197 = vpow2.f32 %v7098_v28 }
 0xc78   : > { %v4824_v25 = vpop.f32.mrf.mxu1 }
 0xc79   : > { %v7100_v32 = vmul.f32 -1.442695, %v4860_v13  ;;  %v4859_v3 = vadd.f32 %v4824_v25, %v4700_v27  ;;  %9199 = vpow2.f32 %v7097_v29  ;;  %v8415_v27 = vpop.f32.mrf.mxu0 }
 0xc7a   : > { %v8438_v5 = vpop.f32.mrf.mxu1 }
 0xc7b   : > { %v7099_v15 = vmul.f32 -1.442695, %v4859_v3  ;;  %9201 = vpow2.f32 %v7100_v32  ;;  %v4910_v1 = vadd.f32 %v8438_v5, %v11952_v37  ;;  %v4715_v3 = vadd.f32 %v8412_v61, %v10228_v2 }
 0xc7c   : > { %v9190_v54 = vpop.eup %9189  ;;  %v4834_v8 = vpop.f32.mrf.mxu1 }
 0xc7d   : > { %v4886_v52 = vadd.f32 1.0, %v9190_v54  ;;  %9203 = vpow2.f32 %v7099_v15  ;;  %v4909_v25 = vadd.f32 %v4834_v8, %v10233_v10 }
 0xc7e   : > { %v9192_v62 = vpop.eup %9191  ;;  %v8441_v6 = vpop.f32.mrf.mxu1 }
 0xc7f   : > { %9205 = vrcp.f32 %v4886_v52  ;;  %v4885_v46 = vadd.f32 1.0, %v9192_v62 }
 0xc80   : > { %v9194_v31 = vpop.eup %9193  ;;  %v4844_v54 = vpop.f32.mrf.mxu1 }
 0xc81   : > { %9207 = vrcp.f32 %v4885_v46  ;;  %v4888_v42 = vadd.f32 1.0, %v9194_v31  ;;  %v4912_v46 = vadd.f32 %v8441_v6, %v10218_v39  ;;  %v4911_v8 = vadd.f32 %v4844_v54, %v10222_v51 }
 0xc82   : > { %v9196_v9 = vpop.eup %9195 }
 0xc83   : > { %9209 = vrcp.f32 %v4888_v42  ;;  %v4887_v38 = vadd.f32 1.0, %v9196_v9  ;;  %v4710_v42 = vadd.f32 %v4709_v53, %v10240_v40  ;;  %v4719_v9 = vpop.f32.mrf.mxu0 }
 0xc84   : > { %v9198_v19 = vpop.eup %9197 }
 0xc85   : > { %9211 = vrcp.f32 %v4887_v38  ;;  %v4890_v28 = vadd.f32 1.0, %v9198_v19  ;;  %v4725_v38 = vadd.f32 %v8415_v27, %v10220_v45 }
 0xc86   : > { %v9200_v7 = vpop.eup %9199 }
 0xc87   : > { %v4889_v15 = vadd.f32 1.0, %v9200_v7  ;;  %9213 = vrcp.f32 %v4890_v28  ;;  %v4720_v7 = vadd.f32 %v4719_v9, %v10224_v56 }
 0xc88   : > { %v9202_v63 = vpop.eup %9201 }
 0xc89   : > { %v4892_v13 = vadd.f32 1.0, %v9202_v63 }
 0xc8a   : > { %v9204_v14 = vpop.eup %9203 }
 0xc8b   : > { %v4891_v52 = vadd.f32 1.0, %v9204_v14  ;;  %9215 = vrcp.f32 %v4892_v13 }
 0xc8c   : > { %v9206_v21 = vpop.eup %9205  ;;  %9217 = vrcp.f32 %v4889_v15 }
 0xc8d   : > { %v4914_v29 = vmul.f32 %v9206_v21, %v4910_v1  ;;  %9219 = vrcp.f32 %v4891_v52 }
 0xc8e   : > { %v9208_v32 = vpop.eup %9207 }
 0xc8f   : > { %v4913_v62 = vmul.f32 %v9208_v32, %v4909_v25  ;;  %v4918_v5 = vadd.f32 %v4914_v29, %v4715_v3 }
 0xc90   : > { %v9210_v31 = vpop.eup %9209 }
 0xc91   : > { %v4916_v19 = vmul.f32 %v9210_v31, %v4912_v46  ;;  %v4917_v61 = vadd.f32 %v4913_v62, %v4710_v42  ;;  %9221 = vtanh.f32 %v4918_v5 }
 0xc92   : > { %v9212_v63 = vpop.eup %9211 }
 0xc93   : > { %v4920_v14 = vadd.f32 %v4916_v19, %v4725_v38  ;;  %v4915_v6 = vmul.f32 %v9212_v63, %v4911_v8 }
 0xc94   : > { %v9214_v1 = vpop.eup %9213 }
 0xc95   : > { %9223 = vtanh.f32 %v4920_v14  ;;  %v4919_v53 = vadd.f32 %v4915_v6, %v4720_v7  ;;  %v4926_v52 = vsub.f32 1.0, %v9214_v1  ;;  %v4934_v19 = vmul.f32 %v9214_v1, %v11417_v0 }
 0xc96   : > { %9225 = vtanh.f32 %v4917_v61 }
 0xc97   : > { %9227 = vtanh.f32 %v4919_v53 }
 0xc98   : > { %v9216_v21 = vpop.eup %9215 }
 0xc99   : > { %v9218_v27 = vpop.eup %9217  ;;  %v4928_v29 = vsub.f32 1.0, %v9216_v21  ;;  %v4936_v15 = vmul.f32 %v9216_v21, %v11408_v23 }
 0xc9a   : > { %v9220_v28 = vpop.eup %9219  ;;  %v4925_v46 = vsub.f32 1.0, %v9218_v27  ;;  %v4933_v63 = vmul.f32 %v9218_v27, %v11422_v22 }
 0xc9b   : > { %v4927_v54 = vsub.f32 1.0, %v9220_v28  ;;  %v4935_v9 = vmul.f32 %v9220_v28, %v11412_v12 }
 0xc9e   : > { %v9222_v13 = vpop.eup %9221 }
 0xc9f   : > { %v4930_v5 = vmul.f32 %v9222_v13, %v4926_v52 }
 0xca1   : > { %v11477_v23 = vadd.f32 %v4934_v19, %v4930_v5 }
 0xca2   : > { %v9224_v25 = vpop.eup %9223 }
 0xca3   : > { %v9226_v32 = vpop.eup %9225  ;;  %v4932_v3 = vmul.f32 %v9224_v25, %v4928_v29 }
 0xca4   : > { %v9228_v62 = vpop.eup %9227  ;;  %v4929_v8 = vmul.f32 %v9226_v32, %v4925_v46 }
 0xca5   : > { %v11468_v31 = vadd.f32 %v4936_v15, %v4932_v3  ;;  %v4931_v42 = vmul.f32 %v9228_v62, %v4927_v54 }
 0xca6   : > { %v11482_v12 = vadd.f32 %v4933_v63, %v4929_v8 }
 0xca7   : > { %8468 = vmatprep.subr.mxu1 %v11468_v31  ;;  %v11472_v38 = vadd.f32 %v4935_v9, %v4931_v42 }
 0xca8   : > { %8469 = vmatpush3.msra.mxu1 %v11468_v31 }
 0xca9   : > { %8470 = vmatprep.subr.mxu1 %v11472_v38 }
 0xcaa   : > { %8471 = vmatpush3.msra.mxu1 %v11472_v38 }
 0xcab   : > { %8472 = vmatprep.subr.mxu1 %v11477_v23 }
 0xcac   : > { %8473 = vmatpush3.msra.mxu1 %v11477_v23 }
 0xcad   : > { %8474 = vmatprep.subr.mxu1 %v11482_v12 }
 0xcae   : > { %8475 = vmatpush3.msra.mxu1 %v11482_v12 }
 0xcaf   : > { %8477 = vmatmul.mubr.msk.f32.vlgmr.msra.gmra.mxu1 %vm536_vm0, %v11255_v30  ;;  %v11512_v30 = vld [vmem:[%s11901_s3] sm:$0xff] }
 0xcb0   : > { %8479 = vmatprep.mubr.msk.f32.mxu1 %vm536_vm0, %v11262_v48  ;;  %v8452_v48 = vpop.f32.mrf.mxu0 }
 0xcb3   : > { %8480 = vmatmul.mubr.msk.f32.gmra.mxu1 %vm536_vm0, %v11269_v44  ;;  %v5011_v44 = vpop.f32.mrf.mxu0 }
 0xcb4   : > { %8482 = vmatprep.mubr.msk.f32.mxu1 %vm536_vm0, %v11276_v17 }
 0xcb5   : > { %v8455_v17 = vpop.f32.mrf.mxu0 }
 0xcb6   : > { %v5027_v22 = vadd.f32 %v8455_v17, %v10168_v16 }
 0xcb7   : > { %8483 = vmatmul.mubr.msk.f32.gmra.mxu1 %vm536_vm0, %v11283_v36  ;;  %v5021_v36 = vpop.f32.mrf.mxu0 }
 0xcb8   : > { %8485 = vmatprep.mubr.msk.f32.mxu1 %vm536_vm0, %v11290_v47  ;;  %v5022_v6 = vadd.f32 %v5021_v36, %v10176_v26 }
 0xcb9   : > { %v8458_v47 = vpop.f32.mrf.mxu0 }
 0xcba   : > { %v5037_v28 = vadd.f32 %v8458_v47, %v10197_v59 }
 0xcbb   : > { %8486 = vmatmul.mubr.msk.f32.gmra.mxu1 %vm536_vm0, %v11297_v33  ;;  %v5017_v33 = vadd.f32 %v8452_v48, %v10172_v20 }
 0xcbc   : > { %8488 = vmatprep.mubr.msk.f32.mxu1 %vm536_vm0, %v11304_v35 }
 0xcbf   : > { %8489 = vmatmul.mubr.msk.f32.gmra.mxu1 %vm536_vm0, %v11311_v49  ;;  %v5012_v49 = vadd.f32 %v5011_v44, %v10180_v34 }
 0xcc0   : > { %8491 = vmatprep.mubr.msk.f32.mxu1 %vm536_vm0, %v11318_v58 }
 0xcc3   : > { %8492 = vmatmul.mubr.msk.f32.gmra.mxu1 %vm536_vm0, %v11325_v55  ;;  %v5031_v55 = vpop.f32.mrf.mxu0 }
 0xcc4   : > { %8528 = vmatprep.mubr.msk.f32.mxu1 %vm536_vm0, %v11512_v30  ;;  %v5032_v32 = vadd.f32 %v5031_v55, %v10205_v4 }
 0xcc5   : > { %v8461_v21 = vpop.f32.mrf.mxu0 }
 0xcc6   : > { %v5047_v62 = vadd.f32 %v8461_v21, %v11944_v24 }
 0xcc7   : > { %v5041_v54 = vpop.f32.mrf.mxu0 }
 0xcc8   : > { %v5042_v9 = vadd.f32 %v5041_v54, %v11946_v41 }
 0xd6f   : > { %v8478_v35 = vpop.f32.mrf.mxu1 }
 0xd70   : > { %v5196_v58 = vadd.f32 %v8478_v35, %v5017_v33 }
 0xd71   : > { %v5136_v0 = vpop.f32.mrf.mxu1 }
 0xd72   : > { %v7130_v61 = vmul.f32 -1.442695, %v5196_v58  ;;  %v5195_v7 = vadd.f32 %v5136_v0, %v5012_v49 }
 0xd73   : > { %v8481_v14 = vpop.f32.mrf.mxu1 }
 0xd74   : > { %9229 = vpow2.f32 %v7130_v61  ;;  %v7129_v53 = vmul.f32 -1.442695, %v5195_v7  ;;  %v5198_v1 = vadd.f32 %v8481_v14, %v5027_v22  ;;  %v8464_v61 = vpop.f32.mrf.mxu0 }
 0xd75   : > { %v5146_v27 = vpop.f32.mrf.mxu1 }
 0xd76   : > { %9231 = vpow2.f32 %v7129_v53  ;;  %v7132_v13 = vmul.f32 -1.442695, %v5198_v1  ;;  %v5197_v29 = vadd.f32 %v5146_v27, %v5022_v6  ;;  %v5051_v6 = vpop.f32.mrf.mxu0 }
 0xd77   : > { %v8484_v25 = vpop.f32.mrf.mxu1 }
 0xd78   : > { %9233 = vpow2.f32 %v7132_v13  ;;  %v7131_v3 = vmul.f32 -1.442695, %v5197_v29  ;;  %v5200_v15 = vadd.f32 %v8484_v25, %v5037_v28  ;;  %v8467_v29 = vpop.f32.mrf.mxu0 }
 0xd79   : > { %v5156_v52 = vpop.f32.mrf.mxu1 }
 0xd7a   : > { %9235 = vpow2.f32 %v7131_v3  ;;  %v5199_v46 = vadd.f32 %v5156_v52, %v5032_v32  ;;  %v7134_v5 = vmul.f32 -1.442695, %v5200_v15  ;;  %v5057_v52 = vadd.f32 %v8464_v61, %v10228_v2 }
 0xd7b   : > { %v8487_v42 = vpop.f32.mrf.mxu1 }
 0xd7c   : > { %v5202_v19 = vadd.f32 %v8487_v42, %v5047_v62  ;;  %v7133_v8 = vmul.f32 -1.442695, %v5199_v46  ;;  %9237 = vpow2.f32 %v7134_v5 }
 0xd7d   : > { %v5166_v63 = vpop.f32.mrf.mxu1 }
 0xd7e   : > { %v7136_v48 = vmul.f32 -1.442695, %v5202_v19  ;;  %v5201_v44 = vadd.f32 %v5166_v63, %v5042_v9  ;;  %9239 = vpow2.f32 %v7133_v8  ;;  %v5052_v8 = vadd.f32 %v5051_v6, %v10240_v40  ;;  %v5061_v63 = vpop.f32.mrf.mxu0 }
 0xd7f   : > { %v8490_v0 = vpop.f32.mrf.mxu1 }
 0xd80   : > { %v7135_v17 = vmul.f32 -1.442695, %v5201_v44  ;;  %9241 = vpow2.f32 %v7136_v48  ;;  %v5252_v28 = vadd.f32 %v8490_v0, %v11952_v37  ;;  %v5067_v44 = vadd.f32 %v8467_v29, %v10220_v45 }
 0xd81   : > { %v9230_v36 = vpop.eup %9229  ;;  %v5176_v7 = vpop.f32.mrf.mxu1 }
 0xd82   : > { %v5228_v47 = vadd.f32 1.0, %v9230_v36  ;;  %9243 = vpow2.f32 %v7135_v17  ;;  %v5251_v15 = vadd.f32 %v5176_v7, %v10233_v10 }
 0xd83   : > { %v9232_v33 = vpop.eup %9231  ;;  %v8493_v21 = vpop.f32.mrf.mxu1 }
 0xd84   : > { %9245 = vrcp.f32 %v5228_v47  ;;  %v5227_v35 = vadd.f32 1.0, %v9232_v33  ;;  %v5254_v5 = vadd.f32 %v8493_v21, %v10218_v39 }
 0xd85   : > { %v9234_v49 = vpop.eup %9233  ;;  %v5186_v46 = vpop.f32.mrf.mxu1 }
 0xd86   : > { %9247 = vrcp.f32 %v5227_v35  ;;  %v5230_v58 = vadd.f32 1.0, %v9234_v49  ;;  %v5253_v36 = vadd.f32 %v5186_v46, %v10222_v51  ;;  %v5062_v35 = vadd.f32 %v5061_v63, %v10224_v56  ;;  %v11597_v63 = vld [vmem:[%s11901_s3 + $0x38] sm:$0xff] }
 0xd87   : > { %v9236_v55 = vpop.eup %9235 }
 0xd88   : > { %9249 = vrcp.f32 %v5230_v58  ;;  %v5229_v22 = vadd.f32 1.0, %v9236_v55 }
 0xd89   : > { %v9238_v14 = vpop.eup %9237 }
 0xd8a   : > { %9251 = vrcp.f32 %v5229_v22  ;;  %v5232_v25 = vadd.f32 1.0, %v9238_v14 }
 0xd8b   : > { %v9240_v53 = vpop.eup %9239 }
 0xd8c   : > { %v5231_v62 = vadd.f32 1.0, %v9240_v53  ;;  %9253 = vrcp.f32 %v5232_v25 }
 0xd8d   : > { %v9242_v1 = vpop.eup %9241 }
 0xd8e   : > { %v5234_v32 = vadd.f32 1.0, %v9242_v1 }
 0xd8f   : > { %v9244_v27 = vpop.eup %9243 }
 0xd90   : > { %v5233_v42 = vadd.f32 1.0, %v9244_v27  ;;  %9255 = vrcp.f32 %v5234_v32 }
 0xd91   : > { %v9246_v13 = vpop.eup %9245  ;;  %9257 = vrcp.f32 %v5231_v62 }
 0xd92   : > { %v5256_v3 = vmul.f32 %v9246_v13, %v5252_v28  ;;  %9259 = vrcp.f32 %v5233_v42 }
 0xd93   : > { %v9248_v54 = vpop.eup %9247 }
 0xd94   : > { %v5255_v9 = vmul.f32 %v9248_v54, %v5251_v15  ;;  %v5260_v48 = vadd.f32 %v5256_v3, %v5057_v52 }
 0xd95   : > { %v9250_v19 = vpop.eup %9249 }
 0xd96   : > { %v5258_v17 = vmul.f32 %v9250_v19, %v5254_v5  ;;  %v5259_v33 = vadd.f32 %v5255_v9, %v5052_v8  ;;  %9261 = vtanh.f32 %v5260_v48  ;;  %v11569_v9 = vld [vmem:[%s11901_s3 + $0x18] sm:$0xff]  ;;  %v11576_v5 = vld [vmem:[%s11901_s3 + $0x20] sm:$0xff]  ;;  %v11583_v19 = vld [vmem:[%s11901_s3 + $0x28] sm:$0xff] }
 0xd97   : > { %v9252_v47 = vpop.eup %9251  ;;  %v11590_v8 = vld [vmem:[%s11901_s3 + $0x30] sm:$0xff]  ;;  %v11604_v48 = vld [vmem:[%s11901_s3 + $0x40] sm:$0xff] }
 0xd98   : > { %v5262_v49 = vadd.f32 %v5258_v17, %v5067_v44  ;;  %v5257_v58 = vmul.f32 %v9252_v47, %v5253_v36  ;;  %v11611_v44 = vld [vmem:[%s11901_s3 + $0x48] sm:$0xff]  ;;  %v11618_v17 = vld [vmem:[%s11901_s3 + $0x50] sm:$0xff]  ;;  %v11625_v36 = vld [vmem:[%s11901_s3 + $0x58] sm:$0xff]  ;;  %v8504_v47 = vpop.f32.mrf.mxu0 }
 0xd99   : > { %v9254_v0 = vpop.eup %9253 }
 0xd9a   : > { %9263 = vtanh.f32 %v5262_v49  ;;  %v5261_v55 = vadd.f32 %v5257_v58, %v5062_v35  ;;  %v5268_v13 = vsub.f32 1.0, %v9254_v0  ;;  %v5276_v62 = vmul.f32 %v9254_v0, %v11477_v23  ;;  %v11555_v23 = vld [vmem:[%s11901_s3 + $0x8] sm:$0xff] }
 0xd9b   : > { %9265 = vtanh.f32 %v5259_v33  ;;  %v5353_v33 = vpop.f32.mrf.mxu0 }
 0xd9c   : > { %9267 = vtanh.f32 %v5261_v55  ;;  %v5359_v55 = vadd.f32 %v8504_v47, %v10172_v20 }
 0xd9d   : > { %v9256_v22 = vpop.eup %9255  ;;  %v8507_v35 = vpop.f32.mrf.mxu0 }
 0xd9e   : > { %v9258_v61 = vpop.eup %9257  ;;  %v5270_v6 = vsub.f32 1.0, %v9256_v22  ;;  %v5278_v27 = vmul.f32 %v9256_v22, %v11468_v31  ;;  %v5354_v22 = vadd.f32 %v5353_v33, %v10180_v34 }
 0xd9f   : > { %v9260_v7 = vpop.eup %9259  ;;  %v5267_v25 = vsub.f32 1.0, %v9258_v61  ;;  %v5275_v42 = vmul.f32 %v9258_v61, %v11482_v12  ;;  %v11562_v12 = vld [vmem:[%s11901_s3 + $0x10] sm:$0xff]  ;;  %v5363_v49 = vpop.f32.mrf.mxu0 }
 0xda0   : > { %v5269_v28 = vsub.f32 1.0, %v9260_v7  ;;  %v5277_v15 = vmul.f32 %v9260_v7, %v11472_v38 }
 0xda1   : > { %v8510_v58 = vpop.f32.mrf.mxu0 }
 0xda3   : > { %v9262_v14 = vpop.eup %9261  ;;  %v5373_v7 = vpop.f32.mrf.mxu0 }
 0xda4   : > { %v5272_v54 = vmul.f32 %v9262_v14, %v5268_v13 }
 0xda6   : > { %v11542_v31 = vadd.f32 %v5276_v62, %v5272_v54 }
 0xda7   : > { %v9264_v53 = vpop.eup %9263 }
 0xda8   : > { %v9266_v1 = vpop.eup %9265  ;;  %v5274_v21 = vmul.f32 %v9264_v53, %v5270_v6  ;;  %v5369_v6 = vadd.f32 %v8507_v35, %v10168_v16 }
 0xda9   : > { %v9268_v29 = vpop.eup %9267  ;;  %v5271_v46 = vmul.f32 %v9266_v1, %v5267_v25 }
 0xdaa   : > { %v11533_v32 = vadd.f32 %v5278_v27, %v5274_v21  ;;  %v5273_v3 = vmul.f32 %v9268_v29, %v5269_v28  ;;  %v5364_v27 = vadd.f32 %v5363_v49, %v10176_v26  ;;  %v8513_v29 = vpop.f32.mrf.mxu0 }
 0xdab   : > { %v11547_v38 = vadd.f32 %v5275_v42, %v5271_v46  ;;  %v5374_v46 = vadd.f32 %v5373_v7, %v10205_v4  ;;  %v5389_v49 = vadd.f32 %v8513_v29, %v11944_v24 }
 0xdac   : > { %8520 = vmatprep.subr.mxu1 %v11533_v32  ;;  %v11537_v52 = vadd.f32 %v5277_v15, %v5273_v3  ;;  %v5379_v3 = vadd.f32 %v8510_v58, %v10197_v59  ;;  %v5383_v33 = vpop.f32.mrf.mxu0 }
 0xdad   : > { %8521 = vmatpush3.msra.mxu1 %v11533_v32 }
 0xdae   : > { %8522 = vmatprep.subr.mxu1 %v11537_v52 }
 0xdaf   : > { %8523 = vmatpush3.msra.mxu1 %v11537_v52 }
 0xdb0   : > { %8524 = vmatprep.subr.mxu1 %v11542_v31 }
 0xdb1   : > { %8525 = vmatpush3.msra.mxu1 %v11542_v31 }
 0xdb2   : > { %8526 = vmatprep.subr.mxu1 %v11547_v38 }
 0xdb3   : > { %8527 = vmatpush3.msra.mxu1 %v11547_v38 }
 0xdb4   : > { %8529 = vmatmul.mubr.msk.f32.vlgmr.msra.gmra.mxu1 %vm536_vm0, %v11555_v23 }
 0xdb5   : > { %8531 = vmatprep.mubr.msk.f32.mxu1 %vm536_vm0, %v11562_v12 }
 0xdb8   : > { %8532 = vmatmul.mubr.msk.f32.gmra.mxu1 %vm536_vm0, %v11569_v9 }
 0xdb9   : > { %8534 = vmatprep.mubr.msk.f32.mxu1 %vm536_vm0, %v11576_v5 }
 0xdbc   : > { %8535 = vmatmul.mubr.msk.f32.gmra.mxu1 %vm536_vm0, %v11583_v19 }
 0xdbd   : > { %8537 = vmatprep.mubr.msk.f32.mxu1 %vm536_vm0, %v11590_v8 }
 0xdc0   : > { %8538 = vmatmul.mubr.msk.f32.gmra.mxu1 %vm536_vm0, %v11597_v63 }
 0xdc1   : > { %8540 = vmatprep.mubr.msk.f32.mxu1 %vm536_vm0, %v11604_v48 }
 0xdc4   : > { %8541 = vmatmul.mubr.msk.f32.gmra.mxu1 %vm536_vm0, %v11611_v44 }
 0xdc5   : > { %8543 = vmatprep.mubr.msk.f32.mxu1 %vm536_vm0, %v11618_v17 }
 0xdc8   : > { %8544 = vmatmul.mubr.msk.f32.gmra.mxu1 %vm536_vm0, %v11625_v36 }
 0xdc9   : > { %8580 = vmatprep.mubr.msk.f32.mxu1 %vm536_vm0, %v11512_v30 }
 0xe74   : > { %v8530_v0 = vpop.f32.mrf.mxu1 }
 0xe75   : > { %v5538_v61 = vadd.f32 %v8530_v0, %v5359_v55 }
 0xe76   : > { %v5478_v14 = vpop.f32.mrf.mxu1 }
 0xe77   : > { %v7166_v53 = vmul.f32 -1.442695, %v5538_v61  ;;  %v5537_v1 = vadd.f32 %v5478_v14, %v5354_v22  ;;  %v5384_v22 = vadd.f32 %v5383_v33, %v11946_v41 }
 0xe78   : > { %v8533_v21 = vpop.f32.mrf.mxu1 }
 0xe79   : > { %9269 = vpow2.f32 %v7166_v53  ;;  %v7165_v28 = vmul.f32 -1.442695, %v5537_v1  ;;  %v5540_v13 = vadd.f32 %v8533_v21, %v5369_v6 }
 0xe7a   : > { %v5488_v25 = vpop.f32.mrf.mxu1 }
 0xe7b   : > { %9271 = vpow2.f32 %v7165_v28  ;;  %v7168_v15 = vmul.f32 -1.442695, %v5540_v13  ;;  %v5539_v54 = vadd.f32 %v5488_v25, %v5364_v27 }
 0xe7c   : > { %v8536_v62 = vpop.f32.mrf.mxu1 }
 0xe7d   : > { %9273 = vpow2.f32 %v7168_v15  ;;  %v7167_v42 = vmul.f32 -1.442695, %v5539_v54  ;;  %v5542_v47 = vadd.f32 %v8536_v62, %v5379_v3  ;;  %v8516_v62 = vpop.f32.mrf.mxu0 }
 0xe7e   : > { %v5498_v35 = vpop.f32.mrf.mxu1 }
 0xe7f   : > { %9275 = vpow2.f32 %v7167_v42  ;;  %v5541_v55 = vadd.f32 %v5498_v35, %v5374_v46  ;;  %v7170_v61 = vmul.f32 -1.442695, %v5542_v47  ;;  %v5393_v47 = vpop.f32.mrf.mxu0 }
 0xe80   : > { %v8539_v0 = vpop.f32.mrf.mxu1 }
 0xe81   : > { %v5544_v58 = vadd.f32 %v8539_v0, %v5389_v49  ;;  %v7169_v14 = vmul.f32 -1.442695, %v5541_v55  ;;  %9277 = vpow2.f32 %v7170_v61  ;;  %v8519_v61 = vpop.f32.mrf.mxu0 }
 0xe82   : > { %v5508_v6 = vpop.f32.mrf.mxu1 }
 0xe83   : > { %v7172_v53 = vmul.f32 -1.442695, %v5544_v58  ;;  %v5543_v1 = vadd.f32 %v5508_v6, %v5384_v22  ;;  %9279 = vpow2.f32 %v7169_v14 }
 0xe84   : > { %v8542_v15 = vpop.f32.mrf.mxu1 }
 0xe85   : > { %v7171_v7 = vmul.f32 -1.442695, %v5543_v1  ;;  %9281 = vpow2.f32 %v7172_v53  ;;  %v5594_v0 = vadd.f32 %v8542_v15, %v11952_v37  ;;  %v5403_v15 = vpop.f32.mrf.mxu0 }
 0xe86   : > { %v9270_v21 = vpop.eup %9269  ;;  %v5518_v46 = vpop.f32.mrf.mxu1 }
 0xe87   : > { %v5570_v27 = vadd.f32 1.0, %v9270_v21  ;;  %9283 = vpow2.f32 %v7171_v7  ;;  %v5593_v53 = vadd.f32 %v5518_v46, %v10233_v10  ;;  %v5399_v7 = vadd.f32 %v8516_v62, %v10228_v2 }
 0xe88   : > { %v9272_v28 = vpop.eup %9271  ;;  %v8545_v49 = vpop.f32.mrf.mxu1 }
 0xe89   : > { %9285 = vrcp.f32 %v5570_v27  ;;  %v5569_v13 = vadd.f32 1.0, %v9272_v28 }
 0xe8a   : > { %v9274_v29 = vpop.eup %9273  ;;  %v5528_v27 = vpop.f32.mrf.mxu1 }
 0xe8b   : > { %9287 = vrcp.f32 %v5569_v13  ;;  %v5572_v25 = vadd.f32 1.0, %v9274_v29  ;;  %v5596_v29 = vadd.f32 %v8545_v49, %v10218_v39  ;;  %v5595_v46 = vadd.f32 %v5528_v27, %v10222_v51 }
 0xe8c   : > { %v9276_v3 = vpop.eup %9275 }
 0xe8d   : > { %9289 = vrcp.f32 %v5572_v25  ;;  %v5571_v54 = vadd.f32 1.0, %v9276_v3  ;;  %v5394_v3 = vadd.f32 %v5393_v47, %v10240_v40 }
 0xe8e   : > { %v9278_v42 = vpop.eup %9277 }
 0xe8f   : > { %9291 = vrcp.f32 %v5571_v54  ;;  %v5574_v58 = vadd.f32 1.0, %v9278_v42  ;;  %v5409_v42 = vadd.f32 %v8519_v61, %v10220_v45 }
 0xe90   : > { %v9280_v33 = vpop.eup %9279 }
 0xe91   : > { %v5573_v21 = vadd.f32 1.0, %v9280_v33  ;;  %9293 = vrcp.f32 %v5574_v58  ;;  %v5404_v33 = vadd.f32 %v5403_v15, %v10224_v56 }
 0xe92   : > { %v9282_v35 = vpop.eup %9281 }
 0xe93   : > { %v5576_v14 = vadd.f32 1.0, %v9282_v35 }
 0xe94   : > { %v9284_v55 = vpop.eup %9283 }
 0xe95   : > { %v5575_v28 = vadd.f32 1.0, %v9284_v55  ;;  %9295 = vrcp.f32 %v5576_v14 }
 0xe96   : > { %v9286_v22 = vpop.eup %9285  ;;  %9297 = vrcp.f32 %v5573_v21 }
 0xe97   : > { %v5598_v6 = vmul.f32 %v9286_v22, %v5594_v0  ;;  %9299 = vrcp.f32 %v5575_v28 }
 0xe98   : > { %v9288_v1 = vpop.eup %9287 }
 0xe99   : > { %v5597_v13 = vmul.f32 %v9288_v1, %v5593_v53  ;;  %v5602_v54 = vadd.f32 %v5598_v6, %v5399_v7 }
 0xe9a   : > { %v9290_v25 = vpop.eup %9289 }
 0xe9b   : > { %v5600_v35 = vmul.f32 %v9290_v25, %v5596_v29  ;;  %v5601_v62 = vadd.f32 %v5597_v13, %v5394_v3  ;;  %9301 = vtanh.f32 %v5602_v54 }
 0xe9c   : > { %v9292_v0 = vpop.eup %9291 }
 0xe9d   : > { %v5604_v55 = vadd.f32 %v5600_v35, %v5409_v42  ;;  %v5599_v49 = vmul.f32 %v9292_v0, %v5595_v46 }
 0xe9e   : > { %v9294_v22 = vpop.eup %9293 }
 0xe9f   : > { %9303 = vtanh.f32 %v5604_v55  ;;  %v5603_v47 = vadd.f32 %v5599_v49, %v5404_v33  ;;  %v5610_v28 = vsub.f32 1.0, %v9294_v22  ;;  %v5618_v46 = vmul.f32 %v9294_v22, %v11542_v31  ;;  %v8556_v31 = vpop.f32.mrf.mxu0 }
 0xea0   : > { %9305 = vtanh.f32 %v5601_v62 }
 0xea1   : > { %9307 = vtanh.f32 %v5603_v47  ;;  %v5701_v47 = vadd.f32 %v8556_v31, %v10172_v20 }
 0xea2   : > { %v9296_v58 = vpop.eup %9295 }
 0xea3   : > { %v9298_v61 = vpop.eup %9297  ;;  %v5612_v53 = vsub.f32 1.0, %v9296_v58  ;;  %v5620_v27 = vmul.f32 %v9296_v58, %v11533_v32 }
 0xea4   : > { %v9300_v14 = vpop.eup %9299  ;;  %v5609_v25 = vsub.f32 1.0, %v9298_v61  ;;  %v5617_v62 = vmul.f32 %v9298_v61, %v11547_v38  ;;  %v5695_v38 = vpop.f32.mrf.mxu0 }
 0xea5   : > { %v5611_v13 = vsub.f32 1.0, %v9300_v14  ;;  %v5619_v54 = vmul.f32 %v9300_v14, %v11537_v52  ;;  %v5696_v58 = vadd.f32 %v5695_v38, %v10180_v34 }
 0xea6   : > { %v8559_v33 = vpop.f32.mrf.mxu0 }
 0xea8   : > { %v9302_v6 = vpop.eup %9301  ;;  %v5705_v55 = vpop.f32.mrf.mxu0 }
 0xea9   : > { %v5614_v42 = vmul.f32 %v9302_v6, %v5610_v28 }
 0xeaa   : > { %v8562_v49 = vpop.f32.mrf.mxu0 }
 0xeab   : > { %v11657_v32 = vadd.f32 %v5618_v46, %v5614_v42 }
 0xeac   : > { %v9304_v1 = vpop.eup %9303  ;;  %v5715_v14 = vpop.f32.mrf.mxu0 }
 0xead   : > { %v9306_v7 = vpop.eup %9305  ;;  %v5616_v21 = vmul.f32 %v9304_v1, %v5612_v53  ;;  %v5711_v53 = vadd.f32 %v8559_v33, %v10168_v16  ;;  %v5716_v46 = vadd.f32 %v5715_v14, %v10205_v4 }
 0xeae   : > { %v9308_v29 = vpop.eup %9307  ;;  %v5613_v0 = vmul.f32 %v9306_v7, %v5609_v25  ;;  %v8565_v28 = vpop.f32.mrf.mxu0  ;;  %v5721_v25 = vadd.f32 %v8562_v49, %v10197_v59 }
 0xeaf   : > { %v11648_v3 = vadd.f32 %v5620_v27, %v5616_v21  ;;  %v5615_v15 = vmul.f32 %v9308_v29, %v5611_v13  ;;  %v5731_v33 = vadd.f32 %v8565_v28, %v11944_v24 }
 0xeb0   : > { %v11662_v52 = vadd.f32 %v5617_v62, %v5613_v0  ;;  %v5725_v31 = vpop.f32.mrf.mxu0 }
 0xeb1   : > { %8572 = vmatprep.subr.mxu1 %v11648_v3  ;;  %v11652_v35 = vadd.f32 %v5619_v54, %v5615_v15 }
 0xeb2   : > { %8573 = vmatpush3.msra.mxu1 %v11648_v3 }
 0xeb3   : > { %8574 = vmatprep.subr.mxu1 %v11652_v35 }
 0xeb4   : > { %8575 = vmatpush3.msra.mxu1 %v11652_v35 }
 0xeb5   : > { %8576 = vmatprep.subr.mxu1 %v11657_v32 }
 0xeb6   : > { %8577 = vmatpush3.msra.mxu1 %v11657_v32 }
 0xeb7   : > { %8578 = vmatprep.subr.mxu1 %v11662_v52 }
 0xeb8   : > { %8579 = vmatpush3.msra.mxu1 %v11662_v52 }
 0xeb9   : > { %8581 = vmatmul.mubr.msk.f32.vlgmr.msra.gmra.mxu1 %vm536_vm0, %v11555_v23 }
 0xeba   : > { %8583 = vmatprep.mubr.msk.f32.mxu1 %vm536_vm0, %v11562_v12 }
 0xebd   : > { %8584 = vmatmul.mubr.msk.f32.gmra.mxu1 %vm536_vm0, %v11569_v9 }
 0xebe   : > { %8586 = vmatprep.mubr.msk.f32.mxu1 %vm536_vm0, %v11576_v5 }
 0xec1   : > { %8587 = vmatmul.mubr.msk.f32.gmra.mxu1 %vm536_vm0, %v11583_v19 }
 0xec2   : > { %8589 = vmatprep.mubr.msk.f32.mxu1 %vm536_vm0, %v11590_v8 }
 0xec5   : > { %8590 = vmatmul.mubr.msk.f32.gmra.mxu1 %vm536_vm0, %v11597_v63 }
 0xec6   : > { %8592 = vmatprep.mubr.msk.f32.mxu1 %vm536_vm0, %v11604_v48 }
 0xec9   : > { %8593 = vmatmul.mubr.msk.f32.gmra.mxu1 %vm536_vm0, %v11611_v44 }
 0xeca   : > { %8595 = vmatprep.mubr.msk.f32.mxu1 %vm536_vm0, %v11618_v17 }
 0xecd   : > { %8596 = vmatmul.mubr.msk.f32.gmra.mxu1 %vm536_vm0, %v11625_v36 }
 0xece   : > { %8632 = vmatprep.mubr.msk.f32.mxu1 %vm536_vm0, %v11512_v30  ;;  %v5706_v30 = vadd.f32 %v5705_v55, %v10176_v26 }
 0xf79   : > { %v8582_v22 = vpop.f32.mrf.mxu1 }
 0xf7a   : > { %v5880_v61 = vadd.f32 %v8582_v22, %v5701_v47  ;;  %v5726_v22 = vadd.f32 %v5725_v31, %v11946_v41 }
 0xf7b   : > { %v5820_v6 = vpop.f32.mrf.mxu1 }
 0xf7c   : > { %v7202_v1 = vmul.f32 -1.442695, %v5880_v61  ;;  %v5879_v7 = vadd.f32 %v5820_v6, %v5696_v58 }
 0xf7d   : > { %v8585_v21 = vpop.f32.mrf.mxu1 }
 0xf7e   : > { %9309 = vpow2.f32 %v7202_v1  ;;  %v7201_v27 = vmul.f32 -1.442695, %v5879_v7  ;;  %v5882_v13 = vadd.f32 %v8585_v21, %v5711_v53 }
 0xf7f   : > { %v5830_v29 = vpop.f32.mrf.mxu1 }
 0xf80   : > { %9311 = vpow2.f32 %v7201_v27  ;;  %v7204_v15 = vmul.f32 -1.442695, %v5882_v13  ;;  %v5881_v54 = vadd.f32 %v5830_v29, %v5706_v30 }
 0xf81   : > { %v8588_v42 = vpop.f32.mrf.mxu1 }
 0xf82   : > { %9313 = vpow2.f32 %v7204_v15  ;;  %v7203_v0 = vmul.f32 -1.442695, %v5881_v54  ;;  %v5884_v62 = vadd.f32 %v8588_v42, %v5721_v25  ;;  %v8568_v54 = vpop.f32.mrf.mxu0 }
 0xf83   : > { %v5840_v38 = vpop.f32.mrf.mxu1 }
 0xf84   : > { %9315 = vpow2.f32 %v7203_v0  ;;  %v5883_v55 = vadd.f32 %v5840_v38, %v5716_v46  ;;  %v7206_v58 = vmul.f32 -1.442695, %v5884_v62  ;;  %v5735_v0 = vpop.f32.mrf.mxu0 }
 0xf85   : > { %v8591_v47 = vpop.f32.mrf.mxu1 }
 0xf86   : > { %v5886_v49 = vadd.f32 %v8591_v47, %v5731_v33  ;;  %v7205_v61 = vmul.f32 -1.442695, %v5883_v55  ;;  %9317 = vpow2.f32 %v7206_v58 }
 0xf87   : > { %v5850_v6 = vpop.f32.mrf.mxu1 }
 0xf88   : > { %v7208_v53 = vmul.f32 -1.442695, %v5886_v49  ;;  %v5885_v1 = vadd.f32 %v5850_v6, %v5726_v22  ;;  %9319 = vpow2.f32 %v7205_v61  ;;  %v8571_v22 = vpop.f32.mrf.mxu0 }
 0xf89   : > { %v8594_v25 = vpop.f32.mrf.mxu1 }
 0xf8a   : > { %v7207_v14 = vmul.f32 -1.442695, %v5885_v1  ;;  %9321 = vpow2.f32 %v7208_v53  ;;  %v5936_v55 = vadd.f32 %v8594_v25, %v11952_v37  ;;  %v5741_v1 = vadd.f32 %v8568_v54, %v10228_v2 }
 0xf8b   : > { %v9310_v7 = vpop.eup %9309  ;;  %v5860_v42 = vpop.f32.mrf.mxu1 }
 0xf8c   : > { %v5912_v21 = vadd.f32 1.0, %v9310_v7  ;;  %9323 = vpow2.f32 %v7207_v14  ;;  %v5935_v6 = vadd.f32 %v5860_v42, %v10233_v10 }
 0xf8d   : > { %v9312_v30 = vpop.eup %9311  ;;  %v8597_v38 = vpop.f32.mrf.mxu1 }
 0xf8e   : > { %9325 = vrcp.f32 %v5912_v21  ;;  %v5911_v27 = vadd.f32 1.0, %v9312_v30 }
 0xf8f   : > { %v9314_v13 = vpop.eup %9313  ;;  %v5870_v7 = vpop.f32.mrf.mxu1 }
 0xf90   : > { %9327 = vrcp.f32 %v5911_v27  ;;  %v5914_v28 = vadd.f32 1.0, %v9314_v13  ;;  %v5938_v27 = vadd.f32 %v8597_v38, %v10218_v39  ;;  %v5937_v42 = vadd.f32 %v5870_v7, %v10222_v51 }
 0xf91   : > { %v9316_v29 = vpop.eup %9315 }
 0xf92   : > { %9329 = vrcp.f32 %v5914_v28  ;;  %v5913_v15 = vadd.f32 1.0, %v9316_v29  ;;  %v5736_v28 = vadd.f32 %v5735_v0, %v10240_v40  ;;  %v5745_v29 = vpop.f32.mrf.mxu0 }
 0xf93   : > { %v9318_v46 = vpop.eup %9317 }
 0xf94   : > { %9331 = vrcp.f32 %v5913_v15  ;;  %v5916_v58 = vadd.f32 1.0, %v9318_v46  ;;  %v5751_v15 = vadd.f32 %v8571_v22, %v10220_v45 }
 0xf95   : > { %v9320_v62 = vpop.eup %9319 }
 0xf96   : > { %v5915_v14 = vadd.f32 1.0, %v9320_v62  ;;  %9333 = vrcp.f32 %v5916_v58  ;;  %v5746_v62 = vadd.f32 %v5745_v29, %v10224_v56 }
 0xf97   : > { %v9322_v31 = vpop.eup %9321 }
 0xf98   : > { %v5918_v49 = vadd.f32 1.0, %v9322_v31 }
 0xf99   : > { %v9324_v33 = vpop.eup %9323 }
 0xf9a   : > { %v5917_v21 = vadd.f32 1.0, %v9324_v33  ;;  %9335 = vrcp.f32 %v5918_v49 }
 0xf9b   : > { %v9326_v47 = vpop.eup %9325  ;;  %9337 = vrcp.f32 %v5915_v14 }
 0xf9c   : > { %v5940_v61 = vmul.f32 %v9326_v47, %v5936_v55  ;;  %9339 = vrcp.f32 %v5917_v21 }
 0xf9d   : > { %v9328_v53 = vpop.eup %9327 }
 0xf9e   : > { %v5939_v30 = vmul.f32 %v9328_v53, %v5935_v6  ;;  %v5944_v25 = vadd.f32 %v5940_v61, %v5741_v1 }
 0xf9f   : > { %v9330_v13 = vpop.eup %9329 }
 0xfa0   : > { %v5942_v46 = vmul.f32 %v9330_v13, %v5938_v27  ;;  %v5943_v54 = vadd.f32 %v5939_v30, %v5736_v28  ;;  %9341 = vtanh.f32 %v5944_v25 }
 0xfa1   : > { %v9332_v31 = vpop.eup %9331 }
 0xfa2   : > { %v5946_v33 = vadd.f32 %v5942_v46, %v5751_v15  ;;  %v5941_v38 = vmul.f32 %v9332_v31, %v5937_v42 }
 0xfa3   : > { %v9334_v55 = vpop.eup %9333 }
 0xfa4   : > { %9343 = vtanh.f32 %v5946_v33  ;;  %v5945_v0 = vadd.f32 %v5941_v38, %v5746_v62  ;;  %v5952_v21 = vsub.f32 1.0, %v9334_v55  ;;  %v5960_v46 = vmul.f32 %v9334_v55, %v11657_v32 }
 0xfa5   : > { %9345 = vtanh.f32 %v5943_v54 }
 0xfa6   : > { %9347 = vtanh.f32 %v5945_v0 }
 0xfa7   : > { %v9336_v47 = vpop.eup %9335 }
 0xfa8   : > { %v9338_v22 = vpop.eup %9337  ;;  %v5954_v61 = vsub.f32 1.0, %v9336_v47  ;;  %v5962_v14 = vmul.f32 %v9336_v47, %v11648_v3 }
 0xfa9   : > { %v9340_v58 = vpop.eup %9339  ;;  %v5951_v27 = vsub.f32 1.0, %v9338_v22  ;;  %v5959_v31 = vmul.f32 %v9338_v22, %v11662_v52 }
 0xfaa   : > { %v5953_v7 = vsub.f32 1.0, %v9340_v58  ;;  %v5961_v29 = vmul.f32 %v9340_v58, %v11652_v35 }
 0xfad   : > { %v9342_v49 = vpop.eup %9341 }
 0xfae   : > { %v5956_v25 = vmul.f32 %v9342_v49, %v5952_v21 }
 0xfb0   : > { %v11717_v3 = vadd.f32 %v5960_v46, %v5956_v25 }
 0xfb1   : > { %v9344_v6 = vpop.eup %9343 }
 0xfb2   : > { %v9346_v53 = vpop.eup %9345  ;;  %v5958_v1 = vmul.f32 %v9344_v6, %v5954_v61 }
 0xfb3   : > { %v9348_v30 = vpop.eup %9347  ;;  %v5955_v42 = vmul.f32 %v9346_v53, %v5951_v27 }
 0xfb4   : > { %v11708_v13 = vadd.f32 %v5962_v14, %v5958_v1  ;;  %v5957_v28 = vmul.f32 %v9348_v30, %v5953_v7 }
 0xfb5   : > { %v11722_v35 = vadd.f32 %v5959_v31, %v5955_v42 }
 0xfb6   : > { %8624 = vmatprep.subr.mxu1 %v11708_v13  ;;  %v11712_v15 = vadd.f32 %v5961_v29, %v5957_v28 }
 0xfb7   : > { %8625 = vmatpush3.msra.mxu1 %v11708_v13 }
 0xfb8   : > { %8626 = vmatprep.subr.mxu1 %v11712_v15 }
 0xfb9   : > { %8627 = vmatpush3.msra.mxu1 %v11712_v15 }
 0xfba   : > { %8628 = vmatprep.subr.mxu1 %v11717_v3 }
 0xfbb   : > { %8629 = vmatpush3.msra.mxu1 %v11717_v3 }
 0xfbc   : > { %8630 = vmatprep.subr.mxu1 %v11722_v35 }
 0xfbd   : > { %8631 = vmatpush3.msra.mxu1 %v11722_v35 }
 0xfbe   : > { %8633 = vmatmul.mubr.msk.f32.vlgmr.msra.gmra.mxu1 %vm536_vm0, %v11555_v23  ;;  %v8608_v23 = vpop.f32.mrf.mxu0 }
 0xfbf   : > { %8635 = vmatprep.mubr.msk.f32.mxu1 %vm536_vm0, %v11562_v12 }
 0xfc0   : > { %v6037_v12 = vpop.f32.mrf.mxu0 }
 0xfc1   : > { %v6038_v32 = vadd.f32 %v6037_v12, %v10180_v34 }
 0xfc2   : > { %8636 = vmatmul.mubr.msk.f32.gmra.mxu1 %vm536_vm0, %v11569_v9  ;;  %v8611_v9 = vpop.f32.mrf.mxu0 }
 0xfc3   : > { %8638 = vmatprep.mubr.msk.f32.mxu1 %vm536_vm0, %v11576_v5 }
 0xfc4   : > { %v6047_v5 = vpop.f32.mrf.mxu0 }
 0xfc6   : > { %8639 = vmatmul.mubr.msk.f32.gmra.mxu1 %vm536_vm0, %v11583_v19  ;;  %v8614_v19 = vpop.f32.mrf.mxu0 }
 0xfc7   : > { %8641 = vmatprep.mubr.msk.f32.mxu1 %vm536_vm0, %v11590_v8  ;;  %v6043_v8 = vadd.f32 %v8608_v23, %v10172_v20  ;;  %v6063_v20 = vadd.f32 %v8614_v19, %v10197_v59 }
 0xfc8   : > { %v6057_v52 = vpop.f32.mrf.mxu0 }
 0xfc9   : > { %v6058_v49 = vadd.f32 %v6057_v52, %v10205_v4 }
 0xfca   : > { %8642 = vmatmul.mubr.msk.f32.gmra.mxu1 %vm536_vm0, %v11597_v63  ;;  %v8617_v55 = vpop.f32.mrf.mxu0 }
 0xfcb   : > { %8644 = vmatprep.mubr.msk.f32.mxu1 %vm536_vm0, %v11604_v48 }
 0xfcc   : > { %v6067_v6 = vpop.f32.mrf.mxu0 }
 0xfcd   : > { %v6068_v7 = vadd.f32 %v6067_v6, %v11946_v41 }
 0xfce   : > { %8645 = vmatmul.mubr.msk.f32.gmra.mxu1 %vm536_vm0, %v11611_v44  ;;  %v6053_v44 = vadd.f32 %v8611_v9, %v10168_v16 }
 0xfcf   : > { %8647 = vmatprep.mubr.msk.f32.mxu1 %vm536_vm0, %v11618_v17 }
 0xfd2   : > { %8648 = vmatmul.mubr.msk.f32.gmra.mxu1 %vm536_vm0, %v11625_v36  ;;  %v6048_v36 = vadd.f32 %v6047_v5, %v10176_v26  ;;  %v6073_v26 = vadd.f32 %v8617_v55, %v11944_v24  ;;  %v8620_v5 = vpop.f32.mrf.mxu0 }
0x107e   : > { %v8634_v63 = vpop.f32.mrf.mxu1 }
0x107f   : > { %v6222_v48 = vadd.f32 %v8634_v63, %v6043_v8  ;;  %v6077_v63 = vpop.f32.mrf.mxu0 }
0x1080   : > { %v6162_v54 = vpop.f32.mrf.mxu1 }
0x1081   : > { %v7238_v62 = vmul.f32 -1.442695, %v6222_v48  ;;  %v6221_v17 = vadd.f32 %v6162_v54, %v6038_v32 }
0x1082   : > { %v8637_v33 = vpop.f32.mrf.mxu1 }
0x1083   : > { %9349 = vpow2.f32 %v7238_v62  ;;  %v7237_v38 = vmul.f32 -1.442695, %v6221_v17  ;;  %v6224_v0 = vadd.f32 %v8637_v33, %v6053_v44  ;;  %v8623_v17 = vpop.f32.mrf.mxu0 }
0x1084   : > { %v6172_v47 = vpop.f32.mrf.mxu1 }
0x1085   : > { %9351 = vpow2.f32 %v7237_v38  ;;  %v7240_v22 = vmul.f32 -1.442695, %v6224_v0  ;;  %v6223_v34 = vadd.f32 %v6172_v47, %v6048_v36  ;;  %v6083_v47 = vadd.f32 %v8620_v5, %v10228_v2 }
0x1086   : > { %v8640_v58 = vpop.f32.mrf.mxu1 }
0x1087   : > { %9353 = vpow2.f32 %v7240_v22  ;;  %v7239_v16 = vmul.f32 -1.442695, %v6223_v34  ;;  %v6226_v61 = vadd.f32 %v8640_v58, %v6063_v20 }
0x1088   : > { %v6182_v53 = vpop.f32.mrf.mxu1 }
0x1089   : > { %9355 = vpow2.f32 %v7239_v16  ;;  %v6225_v1 = vadd.f32 %v6182_v53, %v6058_v49  ;;  %v7242_v21 = vmul.f32 -1.442695, %v6226_v61  ;;  %v6078_v61 = vadd.f32 %v6077_v63, %v10240_v40 }
0x108a   : > { %v8643_v14 = vpop.f32.mrf.mxu1  ;;  %v6093_v53 = vadd.f32 %v8623_v17, %v10220_v45  ;;  %v9454_v17 = vld [vmem:[%s11905_s7 + $0x30] sm:$0xff] }
0x108b   : > { %v6228_v59 = vadd.f32 %v8643_v14, %v6073_v26  ;;  %v7241_v30 = vmul.f32 -1.442695, %v6225_v1  ;;  %9357 = vpow2.f32 %v7242_v21 }
0x108c   : > { %v6192_v27 = vpop.f32.mrf.mxu1 }
0x108d   : > { %v7244_v28 = vmul.f32 -1.442695, %v6228_v59  ;;  %v6227_v29 = vadd.f32 %v6192_v27, %v6068_v7  ;;  %9359 = vpow2.f32 %v7241_v30 }
0x108e   : > { %v8646_v12 = vpop.f32.mrf.mxu1 }
0x108f   : > { %v7243_v4 = vmul.f32 -1.442695, %v6227_v29  ;;  %9361 = vpow2.f32 %v7244_v28  ;;  %v6278_v44 = vadd.f32 %v8646_v12, %v11952_v37  ;;  %v6087_v37 = vpop.f32.mrf.mxu0 }
0x1090   : > { %v9350_v25 = vpop.eup %9349  ;;  %v6202_v19 = vpop.f32.mrf.mxu1  ;;  %v6088_v14 = vadd.f32 %v6087_v37, %v10224_v56 }
0x1091   : > { %v6254_v46 = vadd.f32 1.0, %v9350_v25  ;;  %9363 = vpow2.f32 %v7243_v4  ;;  %v6277_v0 = vadd.f32 %v6202_v19, %v10233_v10 }
0x1092   : > { %v9352_v42 = vpop.eup %9351  ;;  %v8649_v52 = vpop.f32.mrf.mxu1 }
0x1093   : > { %9365 = vrcp.f32 %v6254_v46  ;;  %v6253_v24 = vadd.f32 1.0, %v9352_v42  ;;  %v6280_v49 = vadd.f32 %v8649_v52, %v10218_v39  ;;  %v6309_v52 = vld [vmem:[%s9719_s17 + $0x8] sm:$0xff] }
0x1094   : > { %v9354_v31 = vpop.eup %9353  ;;  %v6212_v22 = vpop.f32.mrf.mxu1 }
0x1095   : > { %9367 = vrcp.f32 %v6253_v24  ;;  %v6256_v23 = vadd.f32 1.0, %v9354_v31  ;;  %v6279_v10 = vadd.f32 %v6212_v22, %v10222_v51  ;;  %v9462_v22 = vld [vmem:[%s11904_s6 + $0x30] sm:$0xff] }
0x1096   : > { %v9356_v41 = vpop.eup %9355 }
0x1097   : > { %9369 = vrcp.f32 %v6256_v23  ;;  %v6255_v9 = vadd.f32 1.0, %v9356_v41 }
0x1098   : > { %v9358_v8 = vpop.eup %9357 }
0x1099   : > { %9371 = vrcp.f32 %v6255_v9  ;;  %v6258_v33 = vadd.f32 1.0, %v9358_v8 }
0x109a   : > { %v9360_v32 = vpop.eup %9359 }
0x109b   : > { %v6257_v20 = vadd.f32 1.0, %v9360_v32  ;;  %9373 = vrcp.f32 %v6258_v33  ;;  %v6312_v32 = vld [vmem:[%s9719_s17 + $0x38] sm:$0xff] }
0x109c   : > { %v9362_v48 = vpop.eup %9361  ;;  %v9455_v33 = vld [vmem:[%s11905_s7 + $0x38] sm:$0xff] }
0x109d   : > { %v6260_v36 = vadd.f32 1.0, %v9362_v48  ;;  %v6310_v48 = vld [vmem:[%s9719_s17 + $0x18] sm:$0xff] }
0x109e   : > { %v9364_v54 = vpop.eup %9363 }
0x109f   : > { %v6259_v34 = vadd.f32 1.0, %v9364_v54  ;;  %9375 = vrcp.f32 %v6260_v36  ;;  %v9451_v54 = vld [vmem:[%s11905_s7 + $0x18] sm:$0xff]  ;;  %v9456_v36 = vld [vmem:[%s11904_s6] sm:$0xff] }
0x10a0   : > { %v9366_v62 = vpop.eup %9365  ;;  %9377 = vrcp.f32 %v6257_v20  ;;  %v9461_v20 = vld [vmem:[%s11904_s6 + $0x28] sm:$0xff] }
0x10a1   : > { %v6282_v38 = vmul.f32 %v9366_v62, %v6278_v44  ;;  %9379 = vrcp.f32 %v6259_v34  ;;  %v9452_v44 = vld [vmem:[%s11905_s7 + $0x20] sm:$0xff]  ;;  %v9453_v62 = vld [vmem:[%s11905_s7 + $0x28] sm:$0xff]  ;;  %v9463_v34 = vld [vmem:[%s11904_s6 + $0x38] sm:$0xff] }
0x10a2   : > { %v9368_v55 = vpop.eup %9367 }
0x10a3   : > { %v6281_v58 = vmul.f32 %v9368_v55, %v6277_v0  ;;  %v6286_v6 = vadd.f32 %v6282_v38, %v6083_v47  ;;  %v9457_v38 = vld [vmem:[%s11904_s6 + $0x8] sm:$0xff]  ;;  %v9458_v0 = vld [vmem:[%s11904_s6 + $0x10] sm:$0xff]  ;;  %v9459_v55 = vld [vmem:[%s11904_s6 + $0x18] sm:$0xff] }
0x10a4   : > { %v9370_v16 = vpop.eup %9369  ;;  %v9460_v47 = vld [vmem:[%s11904_s6 + $0x20] sm:$0xff] }
0x10a5   : > { %v6284_v26 = vmul.f32 %v9370_v16, %v6280_v49  ;;  %v6285_v2 = vadd.f32 %v6281_v58, %v6078_v61  ;;  %9381 = vtanh.f32 %v6286_v6 }
0x10a6   : > { %v9372_v1 = vpop.eup %9371 }
0x10a7   : > { %v6288_v7 = vadd.f32 %v6284_v26, %v6093_v53  ;;  %v6283_v39 = vmul.f32 %v9372_v1, %v6279_v10 }
0x10a8   : > { %v9374_v21 = vpop.eup %9373 }
0x10a9   : > { %9383 = vtanh.f32 %v6288_v7  ;;  %v6287_v40 = vadd.f32 %v6283_v39, %v6088_v14  ;;  %v6294_v46 = vsub.f32 1.0, %v9374_v21  ;;  %v6302_v5 = vmul.f32 %v9374_v21, %v11717_v3  ;;  %v9449_v3 = vld [vmem:[%s11905_s7 + $0x8] sm:$0xff] }
0x10aa   : > { %9385 = vtanh.f32 %v6285_v2 }
0x10ab   : > { %9387 = vtanh.f32 %v6287_v40 }
0x10ac   : > { %v9376_v59 = vpop.eup %9375 }
0x10ad   : > { %v9378_v45 = vpop.eup %9377  ;;  %v6296_v28 = vsub.f32 1.0, %v9376_v59  ;;  %v6304_v25 = vmul.f32 %v9376_v59, %v11708_v13 }
0x10ae   : > { %v9380_v30 = vpop.eup %9379  ;;  %v6293_v24 = vsub.f32 1.0, %v9378_v45  ;;  %v6301_v13 = vmul.f32 %v9378_v45, %v11722_v35  ;;  %v9450_v35 = vld [vmem:[%s11905_s7 + $0x10] sm:$0xff] }
0x10af   : > { %v6295_v56 = vsub.f32 1.0, %v9380_v30  ;;  %v6303_v41 = vmul.f32 %v9380_v30, %v11712_v15  ;;  %v6311_v15 = vld [vmem:[%s9719_s17 + $0x28] sm:$0xff]  ;;  %s11851_s17 = scalar_lea.hbm %s11907_s9, %s7268_s25 }
0x10b2   : > { %v9382_v27 = vpop.eup %9381 }
0x10b3   : > { %v6298_v12 = vmul.f32 %v9382_v27, %v6294_v46 }
0x10b5   : > { %v6306_v8 = vadd.f32 %v6302_v5, %v6298_v12 }
0x10b6   : > { %v9384_v51 = vpop.eup %9383 }
0x10b7   : > { %v9386_v29 = vpop.eup %9385  ;;  %v6300_v4 = vmul.f32 %v9384_v51, %v6296_v28 }
0x10b8   : > { %v9388_v42 = vpop.eup %9387  ;;  %v6297_v19 = vmul.f32 %v9386_v29, %v6293_v24 }
0x10b9   : > { %v6308_v31 = vadd.f32 %v6304_v25, %v6300_v4  ;;  %v6299_v23 = vmul.f32 %v9388_v42, %v6295_v56 }
0x10ba   : > { %v6305_v63 = vadd.f32 %v6301_v13, %v6297_v19 }
0x10bb   : > { %8650 = vmatprep.subr.mxu0 %v6308_v31  ;;  %v6307_v9 = vadd.f32 %v6303_v41, %v6299_v23 }
0x10bc   : > { %8651 = vmatpush3.msra.mxu0 %v6308_v31 }
0x10bd   : > { %8652 = vmatprep.subr.mxu0 %v6307_v9 }
0x10be   : > { %8653 = vmatpush3.msra.mxu0 %v6307_v9  ;;  %v11954_v9 = vld [vmem:[#allocation21_spill] sm:$0xff] }
0x10bf   : > { %8654 = vmatprep.subr.mxu0 %v6306_v8 }
0x10c0   : > { %8655 = vmatpush3.msra.mxu0 %v6306_v8 }
0x10c1   : > { %8656 = vmatprep.subr.mxu0 %v6305_v63 }
0x10c2   : > { %8657 = vmatpush3.msra.mxu0 %v6305_v63 }
0x10c3   : > { %8659 = vmatmul.mubr.msk.f32.vlgmr.msra.gmra.mxu0 %vm536_vm0, %v9449_v3  ;;  %8670 = vmatprep.subr.mxu0 %v6312_v32 }
0x10c4   : > { %8661 = vmatprep.mubr.msk.f32.mxu0 %vm536_vm0, %v9450_v35  ;;  %8671 = vmatpush3.msra.mxu0 %v6312_v32 }
0x10c5   : > { %8672 = vmatprep.subr.mxu0 %v6311_v15 }
0x10c6   : > { %8673 = vmatpush3.msra.mxu0 %v6311_v15 }
0x10c7   : > { %8662 = vmatmul.mubr.msk.f32.gmra.mxu0 %vm536_vm0, %v9451_v54  ;;  %8674 = vmatprep.subr.mxu0 %v6310_v48 }
0x10c8   : > { %8664 = vmatprep.mubr.msk.f32.mxu0 %vm536_vm0, %v9452_v44  ;;  %8675 = vmatpush3.msra.mxu0 %v6310_v48 }
0x10c9   : > { %8676 = vmatprep.subr.mxu0 %v6309_v52 }
0x10ca   : > { %8677 = vmatpush3.msra.mxu0 %v6309_v52 }
0x10cb   : > { %8665 = vmatmul.mubr.msk.f32.gmra.mxu0 %vm536_vm0, %v9453_v62 }
0x10cc   : > { %8667 = vmatprep.mubr.msk.f32.mxu0 %vm536_vm0, %v9454_v17 }
0x10cf   : > { %8668 = vmatmul.mubr.msk.f32.gmra.mxu0 %vm536_vm0, %v9455_v33 }
0x10d0   : > { %8678 = vmatprep.mubr.msk.f32.mxu0 %vm536_vm0, %v9456_v36 }
0x10d3   : > { %8679 = vmatmul.mubr.msk.f32.vlgmr.msra.gmra.mxu0 %vm536_vm0, %v9457_v38 }
0x10d4   : > { %8681 = vmatprep.mubr.msk.f32.mxu0 %vm536_vm0, %v9458_v0 }
0x10d7   : > { %8682 = vmatmul.mubr.msk.f32.gmra.mxu0 %vm536_vm0, %v9459_v55 }
0x10d8   : > { %8684 = vmatprep.mubr.msk.f32.mxu0 %vm536_vm0, %v9460_v47 }
0x10db   : > { %8685 = vmatmul.mubr.msk.f32.gmra.mxu0 %vm536_vm0, %v9461_v20 }
0x10dc   : > { %8687 = vmatprep.mubr.msk.f32.mxu0 %vm536_vm0, %v9462_v22 }
0x10df   : > { %8688 = vmatmul.mubr.msk.f32.gmra.mxu0 %vm536_vm0, %v9463_v34 }
0x1183   : > { %v8660_v58 = vpop.f32.mrf.mxu0 }
0x1185   : > { %v6379_v49 = vpop.f32.mrf.mxu0 }
0x1187   : > { %v8663_v16 = vpop.f32.mrf.mxu0 }
0x1189   : > { %v6389_v61 = vpop.f32.mrf.mxu0 }
0x118b   : > { %v8666_v37 = vpop.f32.mrf.mxu0 }
0x118d   : > { %v6399_v6 = vpop.f32.mrf.mxu0 }
0x118f   : > { %v8669_v53 = vpop.f32.mrf.mxu0 }
0x1191   : > { %v6409_v26 = vpop.f32.mrf.mxu0 }
0x1193   : > { %v8680_v10 = vpop.f32.mrf.mxu0 }
0x1194   : > { %v6490_v1 = vadd.f32 %v8680_v10, %v8660_v58 }
0x1195   : > { %v6484_v2 = vpop.f32.mrf.mxu0 }
0x1196   : > { %vm6524_vm9 = vcmp.ge.f32.partialorder %v6490_v1, 0.0  ;;  %v6532_v14 = vmul.f32 %v6490_v1, %v11177_v11  ;;  %v6485_v7 = vadd.f32 %v6484_v2, %v6379_v49 }
0x1197   : > { %v8683_v39 = vpop.f32.mrf.mxu0 }
0x1198   : > { %v6540_v40 = vsel %vm6524_vm9, %v6490_v1, %v6532_v14  ;;  %vm6523_vm10 = vcmp.ge.f32.partialorder %v6485_v7, 0.0  ;;  %v6531_v21 = vmul.f32 %v6485_v7, %v11180_v18  ;;  %v6500_v59 = vadd.f32 %v8683_v39, %v8663_v16 }
0x1199   : > { %6548 = vst [vmem:[%s11186_s18 + $0x18] sm:$0xff] %v6540_v40  ;;  %v6494_v45 = vpop.f32.mrf.mxu0 }
0x119a   : > { %v6539_v30 = vsel %vm6523_vm10, %v6485_v7, %v6531_v21  ;;  %vm6526_vm11 = vcmp.ge.f32.partialorder %v6500_v59, 0.0  ;;  %v6534_v27 = vmul.f32 %v6500_v59, %v11183_v50  ;;  %v6495_v28 = vadd.f32 %v6494_v45, %v6389_v61 }
0x119b   : > { %6547 = vst [vmem:[%s11186_s18 + $0x8] sm:$0xff] %v6539_v30  ;;  %v8686_v51 = vpop.f32.mrf.mxu0 }
0x119c   : > { %v6542_v29 = vsel %vm6526_vm11, %v6500_v59, %v6534_v27  ;;  %vm6525_vm12 = vcmp.ge.f32.partialorder %v6495_v28, 0.0  ;;  %v6533_v11 = vmul.f32 %v6495_v28, %v11190_v60  ;;  %v6510_v4 = vadd.f32 %v8686_v51, %v8666_v37 }
0x119d   : > { %6550 = vst [vmem:[%s11186_s18 + $0x38] sm:$0xff] %v6542_v29  ;;  %v6504_v18 = vpop.f32.mrf.mxu0 }
0x119e   : > { %v6541_v25 = vsel %vm6525_vm12, %v6495_v28, %v6533_v11  ;;  %vm6528_vm13 = vcmp.ge.f32.partialorder %v6510_v4, 0.0  ;;  %v6536_v56 = vmul.f32 %v6510_v4, %v11196_v43  ;;  %v6505_v46 = vadd.f32 %v6504_v18, %v6399_v6  ;;  %v11953_v43 = vld [vmem:[#allocation20_spill] sm:$0xff] }
0x119f   : > { %6549 = vst [vmem:[%s11186_s18 + $0x28] sm:$0xff] %v6541_v25  ;;  %v8689_v50 = vpop.f32.mrf.mxu0 }
0x11a0   : > { %v6544_v42 = vsel %vm6528_vm13, %v6510_v4, %v6536_v56  ;;  %vm6527_vm14 = vcmp.ge.f32.partialorder %v6505_v46, 0.0  ;;  %v6535_v24 = vmul.f32 %v6505_v46, %v11198_v57  ;;  %v6520_v31 = vadd.f32 %v8689_v50, %v8669_v53 }
0x11a1   : > { %6552 = vst [vmem:[%s11186_s18 + $0x58] sm:$0xff] %v6544_v42  ;;  %v6514_v60 = vpop.f32.mrf.mxu0 }
0x11a2   : > { %v6543_v23 = vsel %vm6527_vm14, %v6505_v46, %v6535_v24  ;;  %vm6530_vm15 = vcmp.ge.f32.partialorder %v6520_v31, 0.0  ;;  %v6538_v41 = vmul.f32 %v6520_v31, %v11953_v43  ;;  %v6515_v12 = vadd.f32 %v6514_v60, %v6409_v26 }
0x11a3   : > { %6551 = vst [vmem:[%s11186_s18 + $0x48] sm:$0xff] %v6543_v23 }
0x11a4   : > { %v6546_v57 = vsel %vm6530_vm15, %v6520_v31, %v6538_v41  ;;  %vm6529_vm0 = vcmp.ge.f32.partialorder %v6515_v12, 0.0  ;;  %v6537_v5 = vmul.f32 %v6515_v12, %v11954_v9 }
0x11a5   : > { %6554 = vst [vmem:[%s11186_s18 + $0x78] sm:$0xff] %v6546_v57 }
0x11a6   : > { %v6545_v19 = vsel %vm6529_vm0, %v6515_v12, %v6537_v5 }
0x11a7   : > { %6553 = vst [vmem:[%s11186_s18 + $0x68] sm:$0xff] %v6545_v19 }
0x11a8   : > { %9503 = shalt.err (!%p9500_p8)
}
0x11a9   : > { %s9504_s18 = scalar_lea.hbm %s11851_s17, 2048  ;;  %s9508_s28 = scalar_lea.hbm %s11907_s9, 8192 }
0x11aa   : > { %p9505_p11 = scmp.ne.s32.totalorder %s11851_s17, %s9504_s18  ;;  %p9509_p0 = scmp.lt.s32.totalorder %s11851_s17, %s11907_s9 }
0x11ab   : > { %p9510_p1 = scmp.lt.s32.totalorder %s9508_s28, %s9504_s18 }
0x11ac   : > { %p9506_p12 = pnand %p9505_p11, %p11955_p6 }
0x11ad   : > { %p9511_p2 = por %p9510_p1, %p9509_p0 }
0x11ae   : > { %p9507_p13 = pneg %p9506_p12 }
0x11b0   : > { %p9512_p5 = pnand %p9511_p2, %p9507_p13 }
0x11b2   : > { %9515 = shalt.err (!%p9512_p5)
}
0x11b3   : > { %s9563_s26 = smov 256   ;;  %s9564_s29 = smov 1024  }
0x11b4   : > { %s9565_s23 = smov 16  }
0x11b5   : > { %8700 = dma.vmem_to_hbm [thread:$0]  (%p11955_p6), %s11854_s0, 2048, %s11851_s17, %s6556_s13, %s9563_s26, %s9564_s29, %s9565_s23  }
0x11b6 PF: > { %p8706_p9 = scmp.ge.s32.totalorder %s9554_s12, 2  ;;  %s6584_s24 = sand.u32 1, %s9542_s30  }
0x11b7   : > { %p11956_p10 = scmp.ne.s32.totalorder %s11929_s22, 0  ;;  %s6585_s14 = scalar_lea.sflag [#allocation5], %s6584_s24 }
0x11b9   : > { %p8703_p3 = pnand %p8706_p9, %p11956_p10 }
0x11bb   : > { %p8704_p4 = pneg %p8703_p3 }
0x11bd   : > { %9537 = dma.done.wait (%p8704_p4), %s6585_s14, 2048  }
0x11be   : > { %9539 = vsyncadd (%p8704_p4), %s6585_s14, 4294965248  ;;  %s11957_s18 = sld [smem:[#allocation9_spill]]  ;;  %p22_p7 = scmp.ge.s32.totalorder %s9641_s15, 6  }
0x11bf   : > { %s11958_s30 = smov %s9546_s10  ;;  %s11959_s10 = smov %s9550_s11 }
0x11c0   : > { %s11961_s12 = smov %s9641_s15  ;;  %24 = sbr.rel (!%p22_p7) target bundleno = 7 (0x7), region = 139 }
0x11c4   : > { %s11960_s11 = smov %s11957_s18 }
0x11c5   :  { %6590 = vsyncpa [#allocation4], 1 }
0x11c6   :  { %6592 = vsyncpa [#allocation4 + $0x1], 1 }
0x11c7   :  { %6593 = vsyncpa [#allocation5], 1 }
0x11c8   :  { %6595 = vsyncpa [#allocation5 + $0x1], 1 }

</bundles_post_ra>
